<compile_context>
chip_gen: v5e
topology: v5e:2x2
jax: 0.10.0
libtpu: 0.0.40
codegen_flags: <defaults>
</compile_context>

<pallas_src>
import functools

import jax
import jax.numpy as jnp
from jax.experimental import pallas as pl
from jax.experimental.pallas import tpu as pltpu

LANE = 128


def _round_up(x, m):
    return (x + m - 1) // m * m


def bottleneck_kernel(W, top_pad, use_roll,
                      x_ref,
                      w1_ref, s1_ref, b1_ref,
                      w2_ref, s2_ref, b2_ref,
                      w3_ref, s3_ref, b3_ref,
                      o_ref,
                      h1_scr):
    """Grid = (N, R).  x_ref holds one full image as (1, R, TH*W, C_pad) bf16 and
    stays resident across the spatial axis; o_ref is one (1, 1, TH*W, C_pad) row
    tile; h1_scr (f32, halo-padded) persists across the spatial (r) axis."""
    R, THW = x_ref.shape[1], x_ref.shape[2]
    HW = R * THW
    mid_p = w1_ref.shape[1]
    scr_rows = h1_scr.shape[0]
    bot_pad = scr_rows - (top_pad + HW)

    r = pl.program_id(1)

    # ---- conv1 (1x1) + BN1 + ReLU, whole image, once per batch element --------
    @pl.when(r == 0)
    def _():
        # Zero halo rows so conv2's vertical zero padding costs nothing later.
        h1_scr[pl.ds(0, top_pad), :] = jnp.zeros((top_pad, mid_p), jnp.float32)
        h1_scr[pl.ds(top_pad + HW, bot_pad), :] = jnp.zeros((bot_pad, mid_p),
                                                            jnp.float32)
        for rr in range(R):  # static unroll: all scratch stores at static offsets
            h1 = jnp.dot(x_ref[0, rr], w1_ref[...],
                         preferred_element_type=jnp.float32)  # bf16 MXU, f32 acc
            h1 = jnp.maximum(h1 * s1_ref[...] + b1_ref[...], 0.0)
            h1_scr[pl.ds(top_pad + rr * THW, THW), :] = h1

    # ---- conv2 (3x3, stride 1, pad 1) on this row tile -------------------------
    base = (top_pad - W) + r * THW          # scratch row of the (ky=0, kx=1) tap
    aligned = ((top_pad - W) % 8 == 0) and (THW % 8 == 0) and (W % 8 == 0)

    col = jax.lax.broadcasted_iota(jnp.int32, (THW, 1), 0) % W
    not_left = col > 0            # valid positions for the x-1 tap
    not_right = col < (W - 1)     # valid positions for the x+1 tap

    taps = []
    for ky in range(3):
        start = base + ky * W
        if aligned:
            start = pl.multiple_of(start, 8)
        c = h1_scr[pl.ds(start, THW), :]                     # (y+ky-1, x), f32
        if use_roll:
            # XLU sublane rotations; wrapped rows land only on masked positions.
            lt = pltpu.roll(c, shift=1, axis=0)              # (y+ky-1, x-1)
            rt = pltpu.roll(c, shift=-1, axis=0)             # (y+ky-1, x+1)
        else:
            lt = h1_scr[pl.ds(base + ky * W - 1, THW), :]
            rt = h1_scr[pl.ds(base + ky * W + 1, THW), :]
        taps.append(jnp.where(not_left, lt, 0.0).astype(jnp.bfloat16))
        taps.append(c.astype(jnp.bfloat16))
        taps.append(jnp.where(not_right, rt, 0.0).astype(jnp.bfloat16))
    taps9 = jnp.concatenate(taps, axis=-1)                   # (THW, 9*mid_p) bf16

    h2 = jnp.dot(taps9, w2_ref[...], preferred_element_type=jnp.float32)
    h2 = jnp.maximum(h2 * s2_ref[...] + b2_ref[...], 0.0)

    # ---- conv3 (1x1) + BN3 + residual + ReLU -----------------------------------
    h3 = jnp.dot(h2.astype(jnp.bfloat16), w3_ref[...],
                 preferred_element_type=jnp.float32)
    h3 = h3 * s3_ref[...] + b3_ref[...]

    identity = x_ref[0, r].astype(jnp.float32)               # bf16 -> f32 (VPU)
    o_ref[0, 0] = jnp.maximum(h3 + identity, 0.0).astype(o_ref.dtype)


def _pick_block_h(H, W, mid_p, C_p, out_itemsize, tile_budget_bytes):
    """Largest divisor of H whose row-tile working set fits the VMEM budget."""
    per_row = W * (9 * mid_p * 6              # f32 taps + bf16 concat copy
                   + mid_p * 4                # h2 (f32)
                   + C_p * 4                  # h3 (f32)
                   + C_p * 4                  # identity (f32 after cast)
                   + 2 * C_p * out_itemsize)  # output tile (double-buffered)
    row_cap = max(int(tile_budget_bytes) // max(per_row, 1), 1)
    divisors = [d for d in range(1, H + 1) if H % d == 0]
    fitting = [d for d in divisors if d * W <= row_cap]
    return max(fitting) if fitting else 1


def bottleneck_forward(x_nhwc, kernel_params, block_h=None,
                       out_dtype=jnp.bfloat16):
    """x_nhwc: (N, H, W, C_in) with C_in == 4*inplanes (stride=1, first=False).
    Returns (N, H, W, C_in) in `out_dtype` (bf16 by default: kernel is HBM-bound,
    so the half-width output slab is the single biggest saving)."""
    (w1, s1, b1, w2g, s2, b2, w3, s3, b3) = kernel_params
    N, H, W, C_in = x_nhwc.shape
    C_p, mid_p = w1.shape
    # stride=1 / first=False path: identity == x, so C_out == C_in.
    assert w3.shape == (mid_p, C_p) and C_in <= C_p, \
        "stride=1 bottleneck requires identity shape == input shape"
    # TODO(synk): guard/dispatch for the stride != 1 (downsample) configuration.

    HW = H * W
    out_itemsize = jnp.dtype(out_dtype).itemsize
    top_pad = _round_up(W + 1, 8)
    bot_pad = _round_up(W + 1, 8)
    scr_rows = top_pad + HW + bot_pad

    # Physical VMEM (generation aware: v7x only has 64 MiB per TensorCore).
    try:
        phys_vmem = int(pltpu.get_tpu_info().vmem_capacity_bytes)
    except Exception:  # conservative default if the query is unavailable
        phys_vmem = 64 * (1 << 20)

    wbytes = ((w1.size + w2g.size + w3.size) * 2
              + (s1.size + b1.size + s2.size + b2.size
                 + s3.size + b3.size) * 4)
    fixed_vmem = 2 * HW * C_p * 2 + 2 * wbytes + scr_rows * mid_p * 4

    if block_h is None:
        tile_budget = max(phys_vmem // 3 - fixed_vmem, 2 << 20)
        block_h = _pick_block_h(H, W, mid_p, C_p, out_itemsize, tile_budget)
    assert H % block_h == 0
    R = H // block_h
    THW = block_h * W

    # bf16 activations in HBM; lane-pad channels; (N, R, THW, C_p) layout so the
    # kernel never needs a dynamic sublane slice of a packed (bf16) ref.
    x_flat = x_nhwc.reshape(N, HW, C_in)
    if C_p > C_in:
        # NOTE: this pad (and the final channel slice) is an extra HBM copy when
        # C_in < C_p; it is a no-op for standard ResNet channel counts (>=128).
        x_flat = jnp.pad(x_flat, ((0, 0), (0, 0), (0, C_p - C_in)))
    x_tiled = x_flat.astype(jnp.bfloat16).reshape(N, R, THW, C_p)

    flops = 2 * N * HW * (C_p * mid_p + 9 * mid_p * mid_p + mid_p * C_p)
    bytes_accessed = int(x_tiled.size * 2 + N * HW * C_p * out_itemsize + wbytes)

    est_vmem = (fixed_vmem
                + 2 * THW * C_p * out_itemsize
                + THW * (9 * mid_p * 6 + mid_p * 4 + 2 * C_p * 4))
    # Always set an explicit scoped-VMEM limit (v5e default is only 16 MiB) and
    # cap it at 3/4 of physical VMEM (v7x: 64 MiB -> 48 MiB cap).
    vmem_limit = int(min(max(est_vmem * 3 // 2, 32 * (1 << 20)),
                         phys_vmem * 3 // 4))

    def _run(use_roll, single_buffer_weights):
        def const_spec(shape):
            zeros = (0,) * len(shape)
            idx = lambda n, r, _z=zeros: _z
            if single_buffer_weights:
                # Constant index map -> a second pipeline buffer is dead weight.
                return pl.BlockSpec(shape, idx, pipeline_mode=pl.Buffered(1))
            return pl.BlockSpec(shape, idx)

        kernel = functools.partial(bottleneck_kernel, W, top_pad, use_roll)
        return pl.pallas_call(
            kernel,
            out_shape=jax.ShapeDtypeStruct((N, R, THW, C_p), out_dtype),
            grid=(N, R),
            in_specs=[
                pl.BlockSpec((1, R, THW, C_p), lambda n, r: (n, 0, 0, 0)),  # x
                const_spec((C_p, mid_p)),        # w1
                const_spec((1, mid_p)),          # bn1 scale
                const_spec((1, mid_p)),          # bn1 shift
                const_spec((9 * mid_p, mid_p)),  # w2 (K = 9*mid, tap-major)
                const_spec((1, mid_p)),          # bn2 scale
                const_spec((1, mid_p)),          # bn2 shift
                const_spec((mid_p, C_p)),        # w3
                const_spec((1, C_p)),            # bn3 scale
                const_spec((1, C_p)),            # bn3 shift
            ],
            out_specs=pl.BlockSpec((1, 1, THW, C_p), lambda n, r: (n, r, 0, 0)),
            scratch_shapes=[pltpu.VMEM((scr_rows, mid_p), jnp.float32)],
            compiler_params=pltpu.CompilerParams(
                dimension_semantics=("parallel", "arbitrary"),
                vmem_limit_bytes=vmem_limit),
            cost_estimate=pl.CostEstimate(flops=flops, transcendentals=0,
                                          bytes_accessed=bytes_accessed),
        )(x_tiled, w1, s1, b1, w2g, s2, b2, w3, s3, b3)

    # Portability fallbacks: some Pallas/Mosaic versions may reject Buffered(1)
    # or a sublane roll; degrade gracefully instead of failing to run.
    attempts = ((True, True), (True, False), (False, True), (False, False))
    out = None
    last_err = None
    for use_roll, single_buf in attempts:
        try:
            out = jax.block_until_ready(_run(use_roll, single_buf))
            break
        except Exception as e:  # pragma: no cover - portability fallback
            last_err = e
            out = None
    if out is None:
        raise last_err

    out = out.reshape(N, H, W, C_p)
    return out[..., :C_in]


def make_params(key, inplanes):
    """Synthetic parameters matching the PyTorch module (stride=1, first=False).
    Conv weights generated in PyTorch OIHW, rounded to bf16 (shared by kernel and
    reference); BN (gamma, beta, mean, var) folded into eval-mode scale/shift.
    Kernel layouts are input-major, bf16, lane-padded to multiples of 128."""
    mid, cin, cout = inplanes, 4 * inplanes, 4 * inplanes
    mid_p, c_p = _round_up(mid, LANE), _round_up(cin, LANE)
    eps = 1e-5
    ks = jax.random.split(key, 15)

    def bn_fold(kg, kb, km, kv, c, c_pad):
        gamma = jax.random.uniform(kg, (c,), jnp.float32, 0.5, 1.5)
        beta = 0.1 * jax.random.normal(kb, (c,), jnp.float32)
        mean = 0.1 * jax.random.normal(km, (c,), jnp.float32)
        var = jax.random.uniform(kv, (c,), jnp.float32, 0.5, 1.5)
        scale = gamma / jnp.sqrt(var + eps)
        shift = beta - mean * scale
        sp = jnp.zeros((1, c_pad), jnp.float32).at[0, :c].set(scale)
        bp = jnp.zeros((1, c_pad), jnp.float32).at[0, :c].set(shift)
        return sp, bp, scale, shift

    def bf16_round(w):
        return w.astype(jnp.bfloat16).astype(jnp.float32)

    w1_t = bf16_round(0.1 * jax.random.normal(ks[0], (mid, cin, 1, 1), jnp.float32))
    w2_t = bf16_round(0.1 * jax.random.normal(ks[1], (mid, mid, 3, 3), jnp.float32))
    w3_t = bf16_round(0.1 * jax.random.normal(ks[2], (cout, mid, 1, 1), jnp.float32))

    s1, b1, s1v, b1v = bn_fold(ks[3], ks[4], ks[5], ks[6], mid, mid_p)
    s2, b2, s2v, b2v = bn_fold(ks[7], ks[8], ks[9], ks[10], mid, mid_p)
    s3, b3, s3v, b3v = bn_fold(ks[11], ks[12], ks[13], ks[14], cout, c_p)

    w1 = jnp.zeros((c_p, mid_p), jnp.bfloat16).at[:cin, :mid].set(
        w1_t[:, :, 0, 0].T.astype(jnp.bfloat16))
    # conv2 weights flattened to a single (9*mid_p, mid_p) K-major matrix:
    # K block (ky*3 + kx) holds w2[:, :, ky, kx].T (input-channel major), matching
    # the in-kernel tap order [x-1, x, x+1] per ky.
    w2g = jnp.zeros((9 * mid_p, mid_p), jnp.bfloat16)
    for ky in range(3):
        for kx in range(3):
            kk = ky * 3 + kx
            w2g = w2g.at[kk * mid_p:kk * mid_p + mid, :mid].set(
                w2_t[:, :, ky, kx].T.astype(jnp.bfloat16))
    w3 = jnp.zeros((mid_p, c_p), jnp.bfloat16).at[:mid, :cout].set(
        w3_t[:, :, 0, 0].T.astype(jnp.bfloat16))

    kernel_params = (w1, s1, b1, w2g, s2, b2, w3, s3, b3)
    torch_params = (w1_t, w2_t, w3_t, (s1v, b1v), (s2v, b2v), (s3v, b3v))
    return kernel_params, torch_params


def reference_forward(x_nhwc, torch_params):
    """Pure-JAX NHWC reference reproducing the PyTorch forward (eval-mode BN)."""
    w1_t, w2_t, w3_t, (s1, b1), (s2, b2), (s3, b3) = torch_params

    def conv(x, w_oihw, pad):
        w = jnp.transpose(w_oihw, (2, 3, 1, 0))  # HWIO
        return jax.lax.conv_general_dilated(
            x, w, window_strides=(1, 1), padding=pad,
            dimension_numbers=("NHWC", "HWIO", "NHWC"))

    identity = x_nhwc
    out = conv(x_nhwc, w1_t, "VALID")
    out = jnp.maximum(out * s1 + b1, 0.0)
    out = conv(out, w2_t, [(1, 1), (1, 1)])
    out = jnp.maximum(out * s2 + b2, 0.0)
    out = conv(out, w3_t, "VALID")
    out = out * s3 + b3
    return jnp.maximum(out + identity, 0.0)


if __name__ == "__main__":
    key = jax.random.PRNGKey(0)
    k_x, k_p = jax.random.split(key)

    inplanes = 8
    N, H, W = 2, 8, 8
    C_in = 4 * inplanes                       # stride=1, first=False path

    # PyTorch-convention input (NCHW), transposed to NHWC for the kernel.
    x_nchw = jax.random.normal(k_x, (N, C_in, H, W), jnp.float32)
    x_nhwc = jnp.transpose(x_nchw, (0, 2, 3, 1))

    kernel_params, torch_params = make_params(k_p, inplanes)
    ref = reference_forward(x_nhwc, torch_params)

    # block_h=4 -> two spatial row tiles per image (exercises the tiled path);
    # block_h=None -> VMEM-budget-derived tile height (single tile at this size).
    for bh in (4, None):
        out = bottleneck_forward(x_nhwc, kernel_params, block_h=bh)
        out = jax.block_until_ready(out)
        assert out.shape == (N, H, W, C_in)
        out_f32 = out.astype(jnp.float32)
        max_err = float(jnp.max(jnp.abs(out_f32 - ref)))
        # bf16 activations in/out + bf16 MXU (f32 accumulate) -> widened tolerance.
        assert jnp.allclose(out_f32, ref, atol=3e-2, rtol=3e-2), \
            f"mismatch vs JAX reference (block_h={bh}, max abs err {max_err})"

    print("KERNEL_OK")
</pallas_src>

<mosaic_0001>
module attributes {stable_mosaic.version = 11 : i64} {
  func.func @bottleneck_kernel(%arg0: i32, %arg1: i32, %arg2: memref<1x2x32x128xbf16, #tpu.memory_space<vmem>>, %arg3: memref<128x128xbf16, #tpu.memory_space<vmem>>, %arg4: memref<1x128xf32, #tpu.memory_space<vmem>>, %arg5: memref<1x128xf32, #tpu.memory_space<vmem>>, %arg6: memref<1152x128xbf16, #tpu.memory_space<vmem>>, %arg7: memref<1x128xf32, #tpu.memory_space<vmem>>, %arg8: memref<1x128xf32, #tpu.memory_space<vmem>>, %arg9: memref<128x128xbf16, #tpu.memory_space<vmem>>, %arg10: memref<1x128xf32, #tpu.memory_space<vmem>>, %arg11: memref<1x128xf32, #tpu.memory_space<vmem>>, %arg12: memref<1x1x32x128xbf16, #tpu.memory_space<vmem>>, %arg13: memref<96x128xf32, #tpu.memory_space<vmem>>) attributes {dimension_semantics = [#tpu.dimension_semantics<parallel>, #tpu.dimension_semantics<arbitrary>], iteration_bounds = array<i64: 2, 2>, scalar_prefetch = 0 : i64, scratch_operands = 1 : i64, tpu.core_type = #tpu.core_type<tc>, window_params = [{transform_indices = @transform_0, window_bounds = array<i64: 1, 2, 32, 128>}, {pipeline_mode = #tpu.pipeline_mode<synchronous>, transform_indices = @transform_1, window_bounds = array<i64: 128, 128>}, {pipeline_mode = #tpu.pipeline_mode<synchronous>, transform_indices = @transform_2, window_bounds = array<i64: 1, 128>}, {pipeline_mode = #tpu.pipeline_mode<synchronous>, transform_indices = @transform_3, window_bounds = array<i64: 1, 128>}, {pipeline_mode = #tpu.pipeline_mode<synchronous>, transform_indices = @transform_4, window_bounds = array<i64: 1152, 128>}, {pipeline_mode = #tpu.pipeline_mode<synchronous>, transform_indices = @transform_5, window_bounds = array<i64: 1, 128>}, {pipeline_mode = #tpu.pipeline_mode<synchronous>, transform_indices = @transform_6, window_bounds = array<i64: 1, 128>}, {pipeline_mode = #tpu.pipeline_mode<synchronous>, transform_indices = @transform_7, window_bounds = array<i64: 128, 128>}, {pipeline_mode = #tpu.pipeline_mode<synchronous>, transform_indices = @transform_8, window_bounds = array<i64: 1, 128>}, {pipeline_mode = #tpu.pipeline_mode<synchronous>, transform_indices = @transform_9, window_bounds = array<i64: 1, 128>}, {transform_indices = @transform_10, window_bounds = array<i64: 1, 1, 32, 128>}]} {
    %c0_i32 = arith.constant 0 : i32
    %0 = arith.cmpi eq, %arg1, %c0_i32 : i32
    %1 = arith.extui %0 : i1 to i32
    %c0_i32_0 = arith.constant 0 : i32
    %2 = arith.cmpi ne, %1, %c0_i32_0 : i32
    scf.if %2 {
      %cst_57 = arith.constant 0.000000e+00 : f32
      %126 = vector.broadcast %cst_57 : f32 to vector<16x128xf32>
      %c0_58 = arith.constant 0 : index
      %c0_59 = arith.constant 0 : index
      %127 = vector.load %arg13[%c0_58, %c0_59] : memref<96x128xf32, #tpu.memory_space<vmem>>, vector<16x128xf32>
      tpu.vector_store %arg13[%c0_58, %c0_59], %126 {strides = array<i32>} : memref<96x128xf32, #tpu.memory_space<vmem>>, vector<16x128xf32>,
      %cst_60 = arith.constant 0.000000e+00 : f32
      %128 = vector.broadcast %cst_60 : f32 to vector<16x128xf32>
      %c80 = arith.constant 80 : index
      %c0_61 = arith.constant 0 : index
      %129 = vector.load %arg13[%c80, %c0_61] : memref<96x128xf32, #tpu.memory_space<vmem>>, vector<16x128xf32>
      tpu.vector_store %arg13[%c80, %c0_61], %128 {strides = array<i32>} : memref<96x128xf32, #tpu.memory_space<vmem>>, vector<16x128xf32>,
      %c0_62 = arith.constant 0 : index
      %c0_63 = arith.constant 0 : index
      %c0_64 = arith.constant 0 : index
      %c0_65 = arith.constant 0 : index
      %130 = vector.load %arg2[%c0_62, %c0_63, %c0_64, %c0_65] : memref<1x2x32x128xbf16, #tpu.memory_space<vmem>>, vector<1x1x32x128xbf16>
      %131 = vector.shape_cast %130 : vector<1x1x32x128xbf16> to vector<32x128xbf16>
      %c0_66 = arith.constant 0 : index
      %c0_67 = arith.constant 0 : index
      %132 = vector.load %arg3[%c0_66, %c0_67] : memref<128x128xbf16, #tpu.memory_space<vmem>>, vector<128x128xbf16>
      %cst_68 = arith.constant dense<0.000000e+00> : vector<32x128xf32>
      %133 = tpu.matmul %131, %132, %cst_68 {dimension_numbers = #tpu.dot_dimension_numbers<[1], [0], [0], [1], [0, 0, 1, 1], [], []>} : vector<32x128xbf16>, vector<128x128xbf16>, vector<32x128xf32> -> vector<32x128xf32>
      %c0_69 = arith.constant 0 : index
      %c0_70 = arith.constant 0 : index
      %134 = vector.load %arg4[%c0_69, %c0_70] : memref<1x128xf32, #tpu.memory_space<vmem>>, vector<1x128xf32>
      %135 = vector.broadcast %134 : vector<1x128xf32> to vector<32x128xf32>
      %136 = arith.mulf %133, %135 : vector<32x128xf32>
      %c0_71 = arith.constant 0 : index
      %c0_72 = arith.constant 0 : index
      %137 = vector.load %arg5[%c0_71, %c0_72] : memref<1x128xf32, #tpu.memory_space<vmem>>, vector<1x128xf32>
      %138 = vector.broadcast %137 : vector<1x128xf32> to vector<32x128xf32>
      %139 = arith.addf %136, %138 : vector<32x128xf32>
      %cst_73 = arith.constant 0.000000e+00 : f32
      %140 = vector.broadcast %cst_73 : f32 to vector<32x128xf32>
      %141 = arith.maximumf %139, %140 : vector<32x128xf32>
      %c16 = arith.constant 16 : index
      %c0_74 = arith.constant 0 : index
      %142 = vector.load %arg13[%c16, %c0_74] : memref<96x128xf32, #tpu.memory_space<vmem>>, vector<32x128xf32>
      tpu.vector_store %arg13[%c16, %c0_74], %141 {strides = array<i32>} : memref<96x128xf32, #tpu.memory_space<vmem>>, vector<32x128xf32>,
      %c0_75 = arith.constant 0 : index
      %c1 = arith.constant 1 : index
      %c0_76 = arith.constant 0 : index
      %c0_77 = arith.constant 0 : index
      %143 = vector.load %arg2[%c0_75, %c1, %c0_76, %c0_77] : memref<1x2x32x128xbf16, #tpu.memory_space<vmem>>, vector<1x1x32x128xbf16>
      %144 = vector.shape_cast %143 : vector<1x1x32x128xbf16> to vector<32x128xbf16>
      %c0_78 = arith.constant 0 : index
      %c0_79 = arith.constant 0 : index
      %145 = vector.load %arg3[%c0_78, %c0_79] : memref<128x128xbf16, #tpu.memory_space<vmem>>, vector<128x128xbf16>
      %cst_80 = arith.constant dense<0.000000e+00> : vector<32x128xf32>
      %146 = tpu.matmul %144, %145, %cst_80 {dimension_numbers = #tpu.dot_dimension_numbers<[1], [0], [0], [1], [0, 0, 1, 1], [], []>} : vector<32x128xbf16>, vector<128x128xbf16>, vector<32x128xf32> -> vector<32x128xf32>
      %c0_81 = arith.constant 0 : index
      %c0_82 = arith.constant 0 : index
      %147 = vector.load %arg4[%c0_81, %c0_82] : memref<1x128xf32, #tpu.memory_space<vmem>>, vector<1x128xf32>
      %148 = vector.broadcast %147 : vector<1x128xf32> to vector<32x128xf32>
      %149 = arith.mulf %146, %148 : vector<32x128xf32>
      %c0_83 = arith.constant 0 : index
      %c0_84 = arith.constant 0 : index
      %150 = vector.load %arg5[%c0_83, %c0_84] : memref<1x128xf32, #tpu.memory_space<vmem>>, vector<1x128xf32>
      %151 = vector.broadcast %150 : vector<1x128xf32> to vector<32x128xf32>
      %152 = arith.addf %149, %151 : vector<32x128xf32>
      %cst_85 = arith.constant 0.000000e+00 : f32
      %153 = vector.broadcast %cst_85 : f32 to vector<32x128xf32>
      %154 = arith.maximumf %152, %153 : vector<32x128xf32>
      %c48 = arith.constant 48 : index
      %c0_86 = arith.constant 0 : index
      %155 = vector.load %arg13[%c48, %c0_86] : memref<96x128xf32, #tpu.memory_space<vmem>>, vector<32x128xf32>
      tpu.vector_store %arg13[%c48, %c0_86], %154 {strides = array<i32>} : memref<96x128xf32, #tpu.memory_space<vmem>>, vector<32x128xf32>,
    } else {
    }
    %c32_i32 = arith.constant 32 : i32
    %3 = arith.muli %arg1, %c32_i32 : i32
    %c8_i32 = arith.constant 8 : i32
    %4 = arith.addi %c8_i32, %3 : i32
    %5 = tpu.iota {dimensions = array<i32: 0>} : vector<32x1xi32>
    %c8_i32_1 = arith.constant 8 : i32
    %c0_i32_2 = arith.constant 0 : i32
    %6 = arith.cmpi eq, %c8_i32_1, %c0_i32_2 : i32
    %c1_i32 = arith.constant 1 : i32
    %7 = arith.select %6, %c1_i32, %c8_i32_1 : i32
    %8 = vector.broadcast %7 : i32 to vector<32x1xi32>
    %9 = arith.remsi %5, %8 : vector<32x1xi32>
    %c0_i32_3 = arith.constant 0 : i32
    %10 = vector.broadcast %c0_i32_3 : i32 to vector<32x1xi32>
    %11 = arith.cmpi ne, %9, %10 : vector<32x1xi32>
    %c0_i32_4 = arith.constant 0 : i32
    %12 = vector.broadcast %c0_i32_4 : i32 to vector<32x1xi32>
    %13 = arith.cmpi slt, %9, %12 : vector<32x1xi32>
    %c0_i32_5 = arith.constant 0 : i32
    %14 = arith.cmpi slt, %7, %c0_i32_5 : i32
    %15 = vector.broadcast %14 : i1 to vector<32x1xi1>
    %16 = vector.broadcast %15 : vector<32x1xi1> to vector<32x1xi1>
    %17 = arith.xori %13, %16 : vector<32x1xi1>
    %18 = arith.andi %17, %11 : vector<32x1xi1>
    %19 = vector.broadcast %7 : i32 to vector<32x1xi32>
    %20 = arith.addi %9, %19 : vector<32x1xi32>
    %21 = arith.select %18, %20, %9 : vector<32x1xi1>, vector<32x1xi32>
    %c0_i32_6 = arith.constant 0 : i32
    %22 = vector.broadcast %c0_i32_6 : i32 to vector<32x1xi32>
    %23 = arith.cmpi sgt, %21, %22 : vector<32x1xi32>
    %c7_i32 = arith.constant 7 : i32
    %24 = vector.broadcast %c7_i32 : i32 to vector<32x1xi32>
    %25 = arith.cmpi slt, %21, %24 : vector<32x1xi32>
    %c0_i32_7 = arith.constant 0 : i32
    %26 = arith.addi %4, %c0_i32_7 : i32
    %27 = tpu.assume_multiple %26, 8 : i32
    %28 = arith.index_cast %27 : i32 to index
    %c0 = arith.constant 0 : index
    %29 = vector.load %arg13[%28, %c0] : memref<96x128xf32, #tpu.memory_space<vmem>>, vector<32x128xf32>
    %c0_i32_8 = arith.constant 0 : i32
    %30 = arith.addi %4, %c0_i32_8 : i32
    %c1_i32_9 = arith.constant 1 : i32
    %31 = arith.subi %30, %c1_i32_9 : i32
    %32 = arith.index_cast %31 : i32 to index
    %c0_10 = arith.constant 0 : index
    %33 = vector.load %arg13[%32, %c0_10] : memref<96x128xf32, #tpu.memory_space<vmem>>, vector<32x128xf32>
    %c0_i32_11 = arith.constant 0 : i32
    %34 = arith.addi %4, %c0_i32_11 : i32
    %c1_i32_12 = arith.constant 1 : i32
    %35 = arith.addi %34, %c1_i32_12 : i32
    %36 = arith.index_cast %35 : i32 to index
    %c0_13 = arith.constant 0 : index
    %37 = vector.load %arg13[%36, %c0_13] : memref<96x128xf32, #tpu.memory_space<vmem>>, vector<32x128xf32>
    %cst = arith.constant 0.000000e+00 : f32
    %38 = vector.shape_cast %23 : vector<32x1xi1> to vector<32x1xi1>
    %39 = vector.broadcast %38 : vector<32x1xi1> to vector<32x128xi1>
    %40 = vector.broadcast %cst : f32 to vector<32x128xf32>
    %41 = arith.select %39, %33, %40 : vector<32x128xi1>, vector<32x128xf32>
    %42 = arith.truncf %41 : vector<32x128xf32> to vector<32x128xbf16>
    %43 = arith.truncf %29 : vector<32x128xf32> to vector<32x128xbf16>
    %cst_14 = arith.constant 0.000000e+00 : f32
    %44 = vector.shape_cast %25 : vector<32x1xi1> to vector<32x1xi1>
    %45 = vector.broadcast %44 : vector<32x1xi1> to vector<32x128xi1>
    %46 = vector.broadcast %cst_14 : f32 to vector<32x128xf32>
    %47 = arith.select %45, %37, %46 : vector<32x128xi1>, vector<32x128xf32>
    %48 = arith.truncf %47 : vector<32x128xf32> to vector<32x128xbf16>
    %c8_i32_15 = arith.constant 8 : i32
    %49 = arith.addi %4, %c8_i32_15 : i32
    %50 = tpu.assume_multiple %49, 8 : i32
    %51 = arith.index_cast %50 : i32 to index
    %c0_16 = arith.constant 0 : index
    %52 = vector.load %arg13[%51, %c0_16] : memref<96x128xf32, #tpu.memory_space<vmem>>, vector<32x128xf32>
    %c8_i32_17 = arith.constant 8 : i32
    %53 = arith.addi %4, %c8_i32_17 : i32
    %c1_i32_18 = arith.constant 1 : i32
    %54 = arith.subi %53, %c1_i32_18 : i32
    %55 = arith.index_cast %54 : i32 to index
    %c0_19 = arith.constant 0 : index
    %56 = vector.load %arg13[%55, %c0_19] : memref<96x128xf32, #tpu.memory_space<vmem>>, vector<32x128xf32>
    %c8_i32_20 = arith.constant 8 : i32
    %57 = arith.addi %4, %c8_i32_20 : i32
    %c1_i32_21 = arith.constant 1 : i32
    %58 = arith.addi %57, %c1_i32_21 : i32
    %59 = arith.index_cast %58 : i32 to index
    %c0_22 = arith.constant 0 : index
    %60 = vector.load %arg13[%59, %c0_22] : memref<96x128xf32, #tpu.memory_space<vmem>>, vector<32x128xf32>
    %cst_23 = arith.constant 0.000000e+00 : f32
    %61 = vector.shape_cast %23 : vector<32x1xi1> to vector<32x1xi1>
    %62 = vector.broadcast %61 : vector<32x1xi1> to vector<32x128xi1>
    %63 = vector.broadcast %cst_23 : f32 to vector<32x128xf32>
    %64 = arith.select %62, %56, %63 : vector<32x128xi1>, vector<32x128xf32>
    %65 = arith.truncf %64 : vector<32x128xf32> to vector<32x128xbf16>
    %66 = arith.truncf %52 : vector<32x128xf32> to vector<32x128xbf16>
    %cst_24 = arith.constant 0.000000e+00 : f32
    %67 = vector.shape_cast %25 : vector<32x1xi1> to vector<32x1xi1>
    %68 = vector.broadcast %67 : vector<32x1xi1> to vector<32x128xi1>
    %69 = vector.broadcast %cst_24 : f32 to vector<32x128xf32>
    %70 = arith.select %68, %60, %69 : vector<32x128xi1>, vector<32x128xf32>
    %71 = arith.truncf %70 : vector<32x128xf32> to vector<32x128xbf16>
    %c16_i32 = arith.constant 16 : i32
    %72 = arith.addi %4, %c16_i32 : i32
    %73 = tpu.assume_multiple %72, 8 : i32
    %74 = arith.index_cast %73 : i32 to index
    %c0_25 = arith.constant 0 : index
    %75 = vector.load %arg13[%74, %c0_25] : memref<96x128xf32, #tpu.memory_space<vmem>>, vector<32x128xf32>
    %c16_i32_26 = arith.constant 16 : i32
    %76 = arith.addi %4, %c16_i32_26 : i32
    %c1_i32_27 = arith.constant 1 : i32
    %77 = arith.subi %76, %c1_i32_27 : i32
    %78 = arith.index_cast %77 : i32 to index
    %c0_28 = arith.constant 0 : index
    %79 = vector.load %arg13[%78, %c0_28] : memref<96x128xf32, #tpu.memory_space<vmem>>, vector<32x128xf32>
    %c16_i32_29 = arith.constant 16 : i32
    %80 = arith.addi %4, %c16_i32_29 : i32
    %c1_i32_30 = arith.constant 1 : i32
    %81 = arith.addi %80, %c1_i32_30 : i32
    %82 = arith.index_cast %81 : i32 to index
    %c0_31 = arith.constant 0 : index
    %83 = vector.load %arg13[%82, %c0_31] : memref<96x128xf32, #tpu.memory_space<vmem>>, vector<32x128xf32>
    %cst_32 = arith.constant 0.000000e+00 : f32
    %84 = vector.shape_cast %23 : vector<32x1xi1> to vector<32x1xi1>
    %85 = vector.broadcast %84 : vector<32x1xi1> to vector<32x128xi1>
    %86 = vector.broadcast %cst_32 : f32 to vector<32x128xf32>
    %87 = arith.select %85, %79, %86 : vector<32x128xi1>, vector<32x128xf32>
    %88 = arith.truncf %87 : vector<32x128xf32> to vector<32x128xbf16>
    %89 = arith.truncf %75 : vector<32x128xf32> to vector<32x128xbf16>
    %cst_33 = arith.constant 0.000000e+00 : f32
    %90 = vector.shape_cast %25 : vector<32x1xi1> to vector<32x1xi1>
    %91 = vector.broadcast %90 : vector<32x1xi1> to vector<32x128xi1>
    %92 = vector.broadcast %cst_33 : f32 to vector<32x128xf32>
    %93 = arith.select %91, %83, %92 : vector<32x128xi1>, vector<32x128xf32>
    %94 = arith.truncf %93 : vector<32x128xf32> to vector<32x128xbf16>
    %95 = tpu.concatenate %42, %43, %48, %65, %66, %71, %88, %89, %94 in 1 : vector<32x128xbf16>, vector<32x128xbf16>, vector<32x128xbf16>, vector<32x128xbf16>, vector<32x128xbf16>, vector<32x128xbf16>, vector<32x128xbf16>, vector<32x128xbf16>, vector<32x128xbf16> -> vector<32x1152xbf16>
    %c0_34 = arith.constant 0 : index
    %c0_35 = arith.constant 0 : index
    %96 = vector.load %arg6[%c0_34, %c0_35] : memref<1152x128xbf16, #tpu.memory_space<vmem>>, vector<1152x128xbf16>
    %cst_36 = arith.constant dense<0.000000e+00> : vector<32x128xf32>
    %97 = tpu.matmul %95, %96, %cst_36 {dimension_numbers = #tpu.dot_dimension_numbers<[1], [0], [0], [1], [0, 0, 1, 1], [], []>} : vector<32x1152xbf16>, vector<1152x128xbf16>, vector<32x128xf32> -> vector<32x128xf32>
    %c0_37 = arith.constant 0 : index
    %c0_38 = arith.constant 0 : index
    %98 = vector.load %arg7[%c0_37, %c0_38] : memref<1x128xf32, #tpu.memory_space<vmem>>, vector<1x128xf32>
    %99 = vector.broadcast %98 : vector<1x128xf32> to vector<32x128xf32>
    %100 = arith.mulf %97, %99 : vector<32x128xf32>
    %c0_39 = arith.constant 0 : index
    %c0_40 = arith.constant 0 : index
    %101 = vector.load %arg8[%c0_39, %c0_40] : memref<1x128xf32, #tpu.memory_space<vmem>>, vector<1x128xf32>
    %102 = vector.broadcast %101 : vector<1x128xf32> to vector<32x128xf32>
    %103 = arith.addf %100, %102 : vector<32x128xf32>
    %cst_41 = arith.constant 0.000000e+00 : f32
    %104 = vector.broadcast %cst_41 : f32 to vector<32x128xf32>
    %105 = arith.maximumf %103, %104 : vector<32x128xf32>
    %106 = arith.truncf %105 : vector<32x128xf32> to vector<32x128xbf16>
    %c0_42 = arith.constant 0 : index
    %c0_43 = arith.constant 0 : index
    %107 = vector.load %arg9[%c0_42, %c0_43] : memref<128x128xbf16, #tpu.memory_space<vmem>>, vector<128x128xbf16>
    %cst_44 = arith.constant dense<0.000000e+00> : vector<32x128xf32>
    %108 = tpu.matmul %106, %107, %cst_44 {dimension_numbers = #tpu.dot_dimension_numbers<[1], [0], [0], [1], [0, 0, 1, 1], [], []>} : vector<32x128xbf16>, vector<128x128xbf16>, vector<32x128xf32> -> vector<32x128xf32>
    %c0_45 = arith.constant 0 : index
    %c0_46 = arith.constant 0 : index
    %109 = vector.load %arg10[%c0_45, %c0_46] : memref<1x128xf32, #tpu.memory_space<vmem>>, vector<1x128xf32>
    %110 = vector.broadcast %109 : vector<1x128xf32> to vector<32x128xf32>
    %111 = arith.mulf %108, %110 : vector<32x128xf32>
    %c0_47 = arith.constant 0 : index
    %c0_48 = arith.constant 0 : index
    %112 = vector.load %arg11[%c0_47, %c0_48] : memref<1x128xf32, #tpu.memory_space<vmem>>, vector<1x128xf32>
    %113 = vector.broadcast %112 : vector<1x128xf32> to vector<32x128xf32>
    %114 = arith.addf %111, %113 : vector<32x128xf32>
    %c0_49 = arith.constant 0 : index
    %115 = arith.index_cast %arg1 : i32 to index
    %c0_50 = arith.constant 0 : index
    %c0_51 = arith.constant 0 : index
    %116 = vector.load %arg2[%c0_49, %115, %c0_50, %c0_51] : memref<1x2x32x128xbf16, #tpu.memory_space<vmem>>, vector<1x1x32x128xbf16>
    %117 = vector.shape_cast %116 : vector<1x1x32x128xbf16> to vector<32x128xbf16>
    %118 = arith.extf %117 : vector<32x128xbf16> to vector<32x128xf32>
    %119 = arith.addf %114, %118 : vector<32x128xf32>
    %cst_52 = arith.constant 0.000000e+00 : f32
    %120 = vector.broadcast %cst_52 : f32 to vector<32x128xf32>
    %121 = arith.maximumf %119, %120 : vector<32x128xf32>
    %122 = arith.truncf %121 : vector<32x128xf32> to vector<32x128xbf16>
    %c0_53 = arith.constant 0 : index
    %c0_54 = arith.constant 0 : index
    %c0_55 = arith.constant 0 : index
    %c0_56 = arith.constant 0 : index
    %123 = vector.load %arg12[%c0_53, %c0_54, %c0_55, %c0_56] : memref<1x1x32x128xbf16, #tpu.memory_space<vmem>>, vector<1x1x32x128xbf16>
    %124 = vector.shape_cast %123 : vector<1x1x32x128xbf16> to vector<32x128xbf16>
    %125 = vector.shape_cast %122 : vector<32x128xbf16> to vector<1x1x32x128xbf16>
    tpu.vector_store %arg12[%c0_53, %c0_54, %c0_55, %c0_56], %125 {strides = array<i32>} : memref<1x1x32x128xbf16, #tpu.memory_space<vmem>>, vector<1x1x32x128xbf16>,
    return
  }
  func.func @transform_0(%arg0: i32, %arg1: i32) -> (i32, i32, i32, i32) {
    %c0_i32 = arith.constant 0 : i32
    %c0_i32_0 = arith.constant 0 : i32
    %c0_i32_1 = arith.constant 0 : i32
    %c0_i32_2 = arith.constant 0 : i32
    return %arg0, %c0_i32, %c0_i32_0, %c0_i32_1 : i32, i32, i32, i32
  }
  func.func @transform_1(%arg0: i32, %arg1: i32) -> (i32, i32) {
    %c0_i32 = arith.constant 0 : i32
    %c0_i32_0 = arith.constant 0 : i32
    %c0_i32_1 = arith.constant 0 : i32
    return %c0_i32, %c0_i32_0 : i32, i32
  }
  func.func @transform_2(%arg0: i32, %arg1: i32) -> (i32, i32) {
    %c0_i32 = arith.constant 0 : i32
    %c0_i32_0 = arith.constant 0 : i32
    %c0_i32_1 = arith.constant 0 : i32
    return %c0_i32, %c0_i32_0 : i32, i32
  }
  func.func @transform_3(%arg0: i32, %arg1: i32) -> (i32, i32) {
    %c0_i32 = arith.constant 0 : i32
    %c0_i32_0 = arith.constant 0 : i32
    %c0_i32_1 = arith.constant 0 : i32
    return %c0_i32, %c0_i32_0 : i32, i32
  }
  func.func @transform_4(%arg0: i32, %arg1: i32) -> (i32, i32) {
    %c0_i32 = arith.constant 0 : i32
    %c0_i32_0 = arith.constant 0 : i32
    %c0_i32_1 = arith.constant 0 : i32
    return %c0_i32, %c0_i32_0 : i32, i32
  }
  func.func @transform_5(%arg0: i32, %arg1: i32) -> (i32, i32) {
    %c0_i32 = arith.constant 0 : i32
    %c0_i32_0 = arith.constant 0 : i32
    %c0_i32_1 = arith.constant 0 : i32
    return %c0_i32, %c0_i32_0 : i32, i32
  }
  func.func @transform_6(%arg0: i32, %arg1: i32) -> (i32, i32) {
    %c0_i32 = arith.constant 0 : i32
    %c0_i32_0 = arith.constant 0 : i32
    %c0_i32_1 = arith.constant 0 : i32
    return %c0_i32, %c0_i32_0 : i32, i32
  }
  func.func @transform_7(%arg0: i32, %arg1: i32) -> (i32, i32) {
    %c0_i32 = arith.constant 0 : i32
    %c0_i32_0 = arith.constant 0 : i32
    %c0_i32_1 = arith.constant 0 : i32
    return %c0_i32, %c0_i32_0 : i32, i32
  }
  func.func @transform_8(%arg0: i32, %arg1: i32) -> (i32, i32) {
    %c0_i32 = arith.constant 0 : i32
    %c0_i32_0 = arith.constant 0 : i32
    %c0_i32_1 = arith.constant 0 : i32
    return %c0_i32, %c0_i32_0 : i32, i32
  }
  func.func @transform_9(%arg0: i32, %arg1: i32) -> (i32, i32) {
    %c0_i32 = arith.constant 0 : i32
    %c0_i32_0 = arith.constant 0 : i32
    %c0_i32_1 = arith.constant 0 : i32
    return %c0_i32, %c0_i32_0 : i32, i32
  }
  func.func @transform_10(%arg0: i32, %arg1: i32) -> (i32, i32, i32, i32) {
    %c0_i32 = arith.constant 0 : i32
    %c0_i32_0 = arith.constant 0 : i32
    %c0_i32_1 = arith.constant 0 : i32
    return %arg0, %arg1, %c0_i32, %c0_i32_0 : i32, i32, i32, i32
  }
}

module attributes {stable_mosaic.version = 11 : i64} {
  func.func @bottleneck_kernel(%arg0: i32, %arg1: i32, %arg2: memref<1x2x32x128xbf16, #tpu.memory_space<vmem>>, %arg3: memref<128x128xbf16, #tpu.memory_space<vmem>>, %arg4: memref<1x128xf32, #tpu.memory_space<vmem>>, %arg5: memref<1x128xf32, #tpu.memory_space<vmem>>, %arg6: memref<1152x128xbf16, #tpu.memory_space<vmem>>, %arg7: memref<1x128xf32, #tpu.memory_space<vmem>>, %arg8: memref<1x128xf32, #tpu.memory_space<vmem>>, %arg9: memref<128x128xbf16, #tpu.memory_space<vmem>>, %arg10: memref<1x128xf32, #tpu.memory_space<vmem>>, %arg11: memref<1x128xf32, #tpu.memory_space<vmem>>, %arg12: memref<1x1x32x128xbf16, #tpu.memory_space<vmem>>, %arg13: memref<96x128xf32, #tpu.memory_space<vmem>>) attributes {dimension_semantics = [#tpu.dimension_semantics<parallel>, #tpu.dimension_semantics<arbitrary>], iteration_bounds = array<i64: 2, 2>, scalar_prefetch = 0 : i64, scratch_operands = 1 : i64, tpu.core_type = #tpu.core_type<tc>, window_params = [{transform_indices = @transform_0, window_bounds = array<i64: 1, 2, 32, 128>}, {pipeline_mode = #tpu.pipeline_mode<synchronous>, transform_indices = @transform_1, window_bounds = array<i64: 128, 128>}, {pipeline_mode = #tpu.pipeline_mode<synchronous>, transform_indices = @transform_2, window_bounds = array<i64: 1, 128>}, {pipeline_mode = #tpu.pipeline_mode<synchronous>, transform_indices = @transform_3, window_bounds = array<i64: 1, 128>}, {pipeline_mode = #tpu.pipeline_mode<synchronous>, transform_indices = @transform_4, window_bounds = array<i64: 1152, 128>}, {pipeline_mode = #tpu.pipeline_mode<synchronous>, transform_indices = @transform_5, window_bounds = array<i64: 1, 128>}, {pipeline_mode = #tpu.pipeline_mode<synchronous>, transform_indices = @transform_6, window_bounds = array<i64: 1, 128>}, {pipeline_mode = #tpu.pipeline_mode<synchronous>, transform_indices = @transform_7, window_bounds = array<i64: 128, 128>}, {pipeline_mode = #tpu.pipeline_mode<synchronous>, transform_indices = @transform_8, window_bounds = array<i64: 1, 128>}, {pipeline_mode = #tpu.pipeline_mode<synchronous>, transform_indices = @transform_9, window_bounds = array<i64: 1, 128>}, {transform_indices = @transform_10, window_bounds = array<i64: 1, 1, 32, 128>}]} {
    %c0_i32 = arith.constant 0 : i32
    %0 = arith.cmpi eq, %arg1, %c0_i32 : i32
    %1 = arith.extui %0 : i1 to i32
    %c0_i32_0 = arith.constant 0 : i32
    %2 = arith.cmpi ne, %1, %c0_i32_0 : i32
    scf.if %2 {
      %cst_57 = arith.constant 0.000000e+00 : f32
      %126 = vector.broadcast %cst_57 : f32 to vector<16x128xf32>
      %c0_58 = arith.constant 0 : index
      %c0_59 = arith.constant 0 : index
      %127 = vector.load %arg13[%c0_58, %c0_59] : memref<96x128xf32, #tpu.memory_space<vmem>>, vector<16x128xf32>
      tpu.vector_store %arg13[%c0_58, %c0_59], %126 {strides = array<i32>} : memref<96x128xf32, #tpu.memory_space<vmem>>, vector<16x128xf32>,
      %cst_60 = arith.constant 0.000000e+00 : f32
      %128 = vector.broadcast %cst_60 : f32 to vector<16x128xf32>
      %c80 = arith.constant 80 : index
      %c0_61 = arith.constant 0 : index
      %129 = vector.load %arg13[%c80, %c0_61] : memref<96x128xf32, #tpu.memory_space<vmem>>, vector<16x128xf32>
      tpu.vector_store %arg13[%c80, %c0_61], %128 {strides = array<i32>} : memref<96x128xf32, #tpu.memory_space<vmem>>, vector<16x128xf32>,
      %c0_62 = arith.constant 0 : index
      %c0_63 = arith.constant 0 : index
      %c0_64 = arith.constant 0 : index
      %c0_65 = arith.constant 0 : index
      %130 = vector.load %arg2[%c0_62, %c0_63, %c0_64, %c0_65] : memref<1x2x32x128xbf16, #tpu.memory_space<vmem>>, vector<1x1x32x128xbf16>
      %131 = vector.shape_cast %130 : vector<1x1x32x128xbf16> to vector<32x128xbf16>
      %c0_66 = arith.constant 0 : index
      %c0_67 = arith.constant 0 : index
      %132 = vector.load %arg3[%c0_66, %c0_67] : memref<128x128xbf16, #tpu.memory_space<vmem>>, vector<128x128xbf16>
      %cst_68 = arith.constant dense<0.000000e+00> : vector<32x128xf32>
      %133 = tpu.matmul %131, %132, %cst_68 {dimension_numbers = #tpu.dot_dimension_numbers<[1], [0], [0], [1], [0, 0, 1, 1], [], []>} : vector<32x128xbf16>, vector<128x128xbf16>, vector<32x128xf32> -> vector<32x128xf32>
      %c0_69 = arith.constant 0 : index
      %c0_70 = arith.constant 0 : index
      %134 = vector.load %arg4[%c0_69, %c0_70] : memref<1x128xf32, #tpu.memory_space<vmem>>, vector<1x128xf32>
      %135 = vector.broadcast %134 : vector<1x128xf32> to vector<32x128xf32>
      %136 = arith.mulf %133, %135 : vector<32x128xf32>
      %c0_71 = arith.constant 0 : index
      %c0_72 = arith.constant 0 : index
      %137 = vector.load %arg5[%c0_71, %c0_72] : memref<1x128xf32, #tpu.memory_space<vmem>>, vector<1x128xf32>
      %138 = vector.broadcast %137 : vector<1x128xf32> to vector<32x128xf32>
      %139 = arith.addf %136, %138 : vector<32x128xf32>
      %cst_73 = arith.constant 0.000000e+00 : f32
      %140 = vector.broadcast %cst_73 : f32 to vector<32x128xf32>
      %141 = arith.maximumf %139, %140 : vector<32x128xf32>
      %c16 = arith.constant 16 : index
      %c0_74 = arith.constant 0 : index
      %142 = vector.load %arg13[%c16, %c0_74] : memref<96x128xf32, #tpu.memory_space<vmem>>, vector<32x128xf32>
      tpu.vector_store %arg13[%c16, %c0_74], %141 {strides = array<i32>} : memref<96x128xf32, #tpu.memory_space<vmem>>, vector<32x128xf32>,
      %c0_75 = arith.constant 0 : index
      %c1 = arith.constant 1 : index
      %c0_76 = arith.constant 0 : index
      %c0_77 = arith.constant 0 : index
      %143 = vector.load %arg2[%c0_75, %c1, %c0_76, %c0_77] : memref<1x2x32x128xbf16, #tpu.memory_space<vmem>>, vector<1x1x32x128xbf16>
      %144 = vector.shape_cast %143 : vector<1x1x32x128xbf16> to vector<32x128xbf16>
      %c0_78 = arith.constant 0 : index
      %c0_79 = arith.constant 0 : index
      %145 = vector.load %arg3[%c0_78, %c0_79] : memref<128x128xbf16, #tpu.memory_space<vmem>>, vector<128x128xbf16>
      %cst_80 = arith.constant dense<0.000000e+00> : vector<32x128xf32>
      %146 = tpu.matmul %144, %145, %cst_80 {dimension_numbers = #tpu.dot_dimension_numbers<[1], [0], [0], [1], [0, 0, 1, 1], [], []>} : vector<32x128xbf16>, vector<128x128xbf16>, vector<32x128xf32> -> vector<32x128xf32>
      %c0_81 = arith.constant 0 : index
      %c0_82 = arith.constant 0 : index
      %147 = vector.load %arg4[%c0_81, %c0_82] : memref<1x128xf32, #tpu.memory_space<vmem>>, vector<1x128xf32>
      %148 = vector.broadcast %147 : vector<1x128xf32> to vector<32x128xf32>
      %149 = arith.mulf %146, %148 : vector<32x128xf32>
      %c0_83 = arith.constant 0 : index
      %c0_84 = arith.constant 0 : index
      %150 = vector.load %arg5[%c0_83, %c0_84] : memref<1x128xf32, #tpu.memory_space<vmem>>, vector<1x128xf32>
      %151 = vector.broadcast %150 : vector<1x128xf32> to vector<32x128xf32>
      %152 = arith.addf %149, %151 : vector<32x128xf32>
      %cst_85 = arith.constant 0.000000e+00 : f32
      %153 = vector.broadcast %cst_85 : f32 to vector<32x128xf32>
      %154 = arith.maximumf %152, %153 : vector<32x128xf32>
      %c48 = arith.constant 48 : index
      %c0_86 = arith.constant 0 : index
      %155 = vector.load %arg13[%c48, %c0_86] : memref<96x128xf32, #tpu.memory_space<vmem>>, vector<32x128xf32>
      tpu.vector_store %arg13[%c48, %c0_86], %154 {strides = array<i32>} : memref<96x128xf32, #tpu.memory_space<vmem>>, vector<32x128xf32>,
    } else {
    }
    %c32_i32 = arith.constant 32 : i32
    %3 = arith.muli %arg1, %c32_i32 : i32
    %c8_i32 = arith.constant 8 : i32
    %4 = arith.addi %c8_i32, %3 : i32
    %5 = tpu.iota {dimensions = array<i32: 0>} : vector<32x1xi32>
    %c8_i32_1 = arith.constant 8 : i32
    %c0_i32_2 = arith.constant 0 : i32
    %6 = arith.cmpi eq, %c8_i32_1, %c0_i32_2 : i32
    %c1_i32 = arith.constant 1 : i32
    %7 = arith.select %6, %c1_i32, %c8_i32_1 : i32
    %8 = vector.broadcast %7 : i32 to vector<32x1xi32>
    %9 = arith.remsi %5, %8 : vector<32x1xi32>
    %c0_i32_3 = arith.constant 0 : i32
    %10 = vector.broadcast %c0_i32_3 : i32 to vector<32x1xi32>
    %11 = arith.cmpi ne, %9, %10 : vector<32x1xi32>
    %c0_i32_4 = arith.constant 0 : i32
    %12 = vector.broadcast %c0_i32_4 : i32 to vector<32x1xi32>
    %13 = arith.cmpi slt, %9, %12 : vector<32x1xi32>
    %c0_i32_5 = arith.constant 0 : i32
    %14 = arith.cmpi slt, %7, %c0_i32_5 : i32
    %15 = vector.broadcast %14 : i1 to vector<32x1xi1>
    %16 = vector.broadcast %15 : vector<32x1xi1> to vector<32x1xi1>
    %17 = arith.xori %13, %16 : vector<32x1xi1>
    %18 = arith.andi %17, %11 : vector<32x1xi1>
    %19 = vector.broadcast %7 : i32 to vector<32x1xi32>
    %20 = arith.addi %9, %19 : vector<32x1xi32>
    %21 = arith.select %18, %20, %9 : vector<32x1xi1>, vector<32x1xi32>
    %c0_i32_6 = arith.constant 0 : i32
    %22 = vector.broadcast %c0_i32_6 : i32 to vector<32x1xi32>
    %23 = arith.cmpi sgt, %21, %22 : vector<32x1xi32>
    %c7_i32 = arith.constant 7 : i32
    %24 = vector.broadcast %c7_i32 : i32 to vector<32x1xi32>
    %25 = arith.cmpi slt, %21, %24 : vector<32x1xi32>
    %c0_i32_7 = arith.constant 0 : i32
    %26 = arith.addi %4, %c0_i32_7 : i32
    %27 = tpu.assume_multiple %26, 8 : i32
    %28 = arith.index_cast %27 : i32 to index
    %c0 = arith.constant 0 : index
    %29 = vector.load %arg13[%28, %c0] : memref<96x128xf32, #tpu.memory_space<vmem>>, vector<32x128xf32>
    %c0_i32_8 = arith.constant 0 : i32
    %30 = arith.addi %4, %c0_i32_8 : i32
    %c1_i32_9 = arith.constant 1 : i32
    %31 = arith.subi %30, %c1_i32_9 : i32
    %32 = arith.index_cast %31 : i32 to index
    %c0_10 = arith.constant 0 : index
    %33 = vector.load %arg13[%32, %c0_10] : memref<96x128xf32, #tpu.memory_space<vmem>>, vector<32x128xf32>
    %c0_i32_11 = arith.constant 0 : i32
    %34 = arith.addi %4, %c0_i32_11 : i32
    %c1_i32_12 = arith.constant 1 : i32
    %35 = arith.addi %34, %c1_i32_12 : i32
    %36 = arith.index_cast %35 : i32 to index
    %c0_13 = arith.constant 0 : index
    %37 = vector.load %arg13[%36, %c0_13] : memref<96x128xf32, #tpu.memory_space<vmem>>, vector<32x128xf32>
    %cst = arith.constant 0.000000e+00 : f32
    %38 = vector.shape_cast %23 : vector<32x1xi1> to vector<32x1xi1>
    %39 = vector.broadcast %38 : vector<32x1xi1> to vector<32x128xi1>
    %40 = vector.broadcast %cst : f32 to vector<32x128xf32>
    %41 = arith.select %39, %33, %40 : vector<32x128xi1>, vector<32x128xf32>
    %42 = arith.truncf %41 : vector<32x128xf32> to vector<32x128xbf16>
    %43 = arith.truncf %29 : vector<32x128xf32> to vector<32x128xbf16>
    %cst_14 = arith.constant 0.000000e+00 : f32
    %44 = vector.shape_cast %25 : vector<32x1xi1> to vector<32x1xi1>
    %45 = vector.broadcast %44 : vector<32x1xi1> to vector<32x128xi1>
    %46 = vector.broadcast %cst_14 : f32 to vector<32x128xf32>
    %47 = arith.select %45, %37, %46 : vector<32x128xi1>, vector<32x128xf32>
    %48 = arith.truncf %47 : vector<32x128xf32> to vector<32x128xbf16>
    %c8_i32_15 = arith.constant 8 : i32
    %49 = arith.addi %4, %c8_i32_15 : i32
    %50 = tpu.assume_multiple %49, 8 : i32
    %51 = arith.index_cast %50 : i32 to index
    %c0_16 = arith.constant 0 : index
    %52 = vector.load %arg13[%51, %c0_16] : memref<96x128xf32, #tpu.memory_space<vmem>>, vector<32x128xf32>
    %c8_i32_17 = arith.constant 8 : i32
    %53 = arith.addi %4, %c8_i32_17 : i32
    %c1_i32_18 = arith.constant 1 : i32
    %54 = arith.subi %53, %c1_i32_18 : i32
    %55 = arith.index_cast %54 : i32 to index
    %c0_19 = arith.constant 0 : index
    %56 = vector.load %arg13[%55, %c0_19] : memref<96x128xf32, #tpu.memory_space<vmem>>, vector<32x128xf32>
    %c8_i32_20 = arith.constant 8 : i32
    %57 = arith.addi %4, %c8_i32_20 : i32
    %c1_i32_21 = arith.constant 1 : i32
    %58 = arith.addi %57, %c1_i32_21 : i32
    %59 = arith.index_cast %58 : i32 to index
    %c0_22 = arith.constant 0 : index
    %60 = vector.load %arg13[%59, %c0_22] : memref<96x128xf32, #tpu.memory_space<vmem>>, vector<32x128xf32>
    %cst_23 = arith.constant 0.000000e+00 : f32
    %61 = vector.shape_cast %23 : vector<32x1xi1> to vector<32x1xi1>
    %62 = vector.broadcast %61 : vector<32x1xi1> to vector<32x128xi1>
    %63 = vector.broadcast %cst_23 : f32 to vector<32x128xf32>
    %64 = arith.select %62, %56, %63 : vector<32x128xi1>, vector<32x128xf32>
    %65 = arith.truncf %64 : vector<32x128xf32> to vector<32x128xbf16>
    %66 = arith.truncf %52 : vector<32x128xf32> to vector<32x128xbf16>
    %cst_24 = arith.constant 0.000000e+00 : f32
    %67 = vector.shape_cast %25 : vector<32x1xi1> to vector<32x1xi1>
    %68 = vector.broadcast %67 : vector<32x1xi1> to vector<32x128xi1>
    %69 = vector.broadcast %cst_24 : f32 to vector<32x128xf32>
    %70 = arith.select %68, %60, %69 : vector<32x128xi1>, vector<32x128xf32>
    %71 = arith.truncf %70 : vector<32x128xf32> to vector<32x128xbf16>
    %c16_i32 = arith.constant 16 : i32
    %72 = arith.addi %4, %c16_i32 : i32
    %73 = tpu.assume_multiple %72, 8 : i32
    %74 = arith.index_cast %73 : i32 to index
    %c0_25 = arith.constant 0 : index
    %75 = vector.load %arg13[%74, %c0_25] : memref<96x128xf32, #tpu.memory_space<vmem>>, vector<32x128xf32>
    %c16_i32_26 = arith.constant 16 : i32
    %76 = arith.addi %4, %c16_i32_26 : i32
    %c1_i32_27 = arith.constant 1 : i32
    %77 = arith.subi %76, %c1_i32_27 : i32
    %78 = arith.index_cast %77 : i32 to index
    %c0_28 = arith.constant 0 : index
    %79 = vector.load %arg13[%78, %c0_28] : memref<96x128xf32, #tpu.memory_space<vmem>>, vector<32x128xf32>
    %c16_i32_29 = arith.constant 16 : i32
    %80 = arith.addi %4, %c16_i32_29 : i32
    %c1_i32_30 = arith.constant 1 : i32
    %81 = arith.addi %80, %c1_i32_30 : i32
    %82 = arith.index_cast %81 : i32 to index
    %c0_31 = arith.constant 0 : index
    %83 = vector.load %arg13[%82, %c0_31] : memref<96x128xf32, #tpu.memory_space<vmem>>, vector<32x128xf32>
    %cst_32 = arith.constant 0.000000e+00 : f32
    %84 = vector.shape_cast %23 : vector<32x1xi1> to vector<32x1xi1>
    %85 = vector.broadcast %84 : vector<32x1xi1> to vector<32x128xi1>
    %86 = vector.broadcast %cst_32 : f32 to vector<32x128xf32>
    %87 = arith.select %85, %79, %86 : vector<32x128xi1>, vector<32x128xf32>
    %88 = arith.truncf %87 : vector<32x128xf32> to vector<32x128xbf16>
    %89 = arith.truncf %75 : vector<32x128xf32> to vector<32x128xbf16>
    %cst_33 = arith.constant 0.000000e+00 : f32
    %90 = vector.shape_cast %25 : vector<32x1xi1> to vector<32x1xi1>
    %91 = vector.broadcast %90 : vector<32x1xi1> to vector<32x128xi1>
    %92 = vector.broadcast %cst_33 : f32 to vector<32x128xf32>
    %93 = arith.select %91, %83, %92 : vector<32x128xi1>, vector<32x128xf32>
    %94 = arith.truncf %93 : vector<32x128xf32> to vector<32x128xbf16>
    %95 = tpu.concatenate %42, %43, %48, %65, %66, %71, %88, %89, %94 in 1 : vector<32x128xbf16>, vector<32x128xbf16>, vector<32x128xbf16>, vector<32x128xbf16>, vector<32x128xbf16>, vector<32x128xbf16>, vector<32x128xbf16>, vector<32x128xbf16>, vector<32x128xbf16> -> vector<32x1152xbf16>
    %c0_34 = arith.constant 0 : index
    %c0_35 = arith.constant 0 : index
    %96 = vector.load %arg6[%c0_34, %c0_35] : memref<1152x128xbf16, #tpu.memory_space<vmem>>, vector<1152x128xbf16>
    %cst_36 = arith.constant dense<0.000000e+00> : vector<32x128xf32>
    %97 = tpu.matmul %95, %96, %cst_36 {dimension_numbers = #tpu.dot_dimension_numbers<[1], [0], [0], [1], [0, 0, 1, 1], [], []>} : vector<32x1152xbf16>, vector<1152x128xbf16>, vector<32x128xf32> -> vector<32x128xf32>
    %c0_37 = arith.constant 0 : index
    %c0_38 = arith.constant 0 : index
    %98 = vector.load %arg7[%c0_37, %c0_38] : memref<1x128xf32, #tpu.memory_space<vmem>>, vector<1x128xf32>
    %99 = vector.broadcast %98 : vector<1x128xf32> to vector<32x128xf32>
    %100 = arith.mulf %97, %99 : vector<32x128xf32>
    %c0_39 = arith.constant 0 : index
    %c0_40 = arith.constant 0 : index
    %101 = vector.load %arg8[%c0_39, %c0_40] : memref<1x128xf32, #tpu.memory_space<vmem>>, vector<1x128xf32>
    %102 = vector.broadcast %101 : vector<1x128xf32> to vector<32x128xf32>
    %103 = arith.addf %100, %102 : vector<32x128xf32>
    %cst_41 = arith.constant 0.000000e+00 : f32
    %104 = vector.broadcast %cst_41 : f32 to vector<32x128xf32>
    %105 = arith.maximumf %103, %104 : vector<32x128xf32>
    %106 = arith.truncf %105 : vector<32x128xf32> to vector<32x128xbf16>
    %c0_42 = arith.constant 0 : index
    %c0_43 = arith.constant 0 : index
    %107 = vector.load %arg9[%c0_42, %c0_43] : memref<128x128xbf16, #tpu.memory_space<vmem>>, vector<128x128xbf16>
    %cst_44 = arith.constant dense<0.000000e+00> : vector<32x128xf32>
    %108 = tpu.matmul %106, %107, %cst_44 {dimension_numbers = #tpu.dot_dimension_numbers<[1], [0], [0], [1], [0, 0, 1, 1], [], []>} : vector<32x128xbf16>, vector<128x128xbf16>, vector<32x128xf32> -> vector<32x128xf32>
    %c0_45 = arith.constant 0 : index
    %c0_46 = arith.constant 0 : index
    %109 = vector.load %arg10[%c0_45, %c0_46] : memref<1x128xf32, #tpu.memory_space<vmem>>, vector<1x128xf32>
    %110 = vector.broadcast %109 : vector<1x128xf32> to vector<32x128xf32>
    %111 = arith.mulf %108, %110 : vector<32x128xf32>
    %c0_47 = arith.constant 0 : index
    %c0_48 = arith.constant 0 : index
    %112 = vector.load %arg11[%c0_47, %c0_48] : memref<1x128xf32, #tpu.memory_space<vmem>>, vector<1x128xf32>
    %113 = vector.broadcast %112 : vector<1x128xf32> to vector<32x128xf32>
    %114 = arith.addf %111, %113 : vector<32x128xf32>
    %c0_49 = arith.constant 0 : index
    %115 = arith.index_cast %arg1 : i32 to index
    %c0_50 = arith.constant 0 : index
    %c0_51 = arith.constant 0 : index
    %116 = vector.load %arg2[%c0_49, %115, %c0_50, %c0_51] : memref<1x2x32x128xbf16, #tpu.memory_space<vmem>>, vector<1x1x32x128xbf16>
    %117 = vector.shape_cast %116 : vector<1x1x32x128xbf16> to vector<32x128xbf16>
    %118 = arith.extf %117 : vector<32x128xbf16> to vector<32x128xf32>
    %119 = arith.addf %114, %118 : vector<32x128xf32>
    %cst_52 = arith.constant 0.000000e+00 : f32
    %120 = vector.broadcast %cst_52 : f32 to vector<32x128xf32>
    %121 = arith.maximumf %119, %120 : vector<32x128xf32>
    %122 = arith.truncf %121 : vector<32x128xf32> to vector<32x128xbf16>
    %c0_53 = arith.constant 0 : index
    %c0_54 = arith.constant 0 : index
    %c0_55 = arith.constant 0 : index
    %c0_56 = arith.constant 0 : index
    %123 = vector.load %arg12[%c0_53, %c0_54, %c0_55, %c0_56] : memref<1x1x32x128xbf16, #tpu.memory_space<vmem>>, vector<1x1x32x128xbf16>
    %124 = vector.shape_cast %123 : vector<1x1x32x128xbf16> to vector<32x128xbf16>
    %125 = vector.shape_cast %122 : vector<32x128xbf16> to vector<1x1x32x128xbf16>
    tpu.vector_store %arg12[%c0_53, %c0_54, %c0_55, %c0_56], %125 {strides = array<i32>} : memref<1x1x32x128xbf16, #tpu.memory_space<vmem>>, vector<1x1x32x128xbf16>,
    return
  }
  func.func @transform_0(%arg0: i32, %arg1: i32) -> (i32, i32, i32, i32) {
    %c0_i32 = arith.constant 0 : i32
    %c0_i32_0 = arith.constant 0 : i32
    %c0_i32_1 = arith.constant 0 : i32
    %c0_i32_2 = arith.constant 0 : i32
    return %arg0, %c0_i32, %c0_i32_0, %c0_i32_1 : i32, i32, i32, i32
  }
  func.func @transform_1(%arg0: i32, %arg1: i32) -> (i32, i32) {
    %c0_i32 = arith.constant 0 : i32
    %c0_i32_0 = arith.constant 0 : i32
    %c0_i32_1 = arith.constant 0 : i32
    return %c0_i32, %c0_i32_0 : i32, i32
  }
  func.func @transform_2(%arg0: i32, %arg1: i32) -> (i32, i32) {
    %c0_i32 = arith.constant 0 : i32
    %c0_i32_0 = arith.constant 0 : i32
    %c0_i32_1 = arith.constant 0 : i32
    return %c0_i32, %c0_i32_0 : i32, i32
  }
  func.func @transform_3(%arg0: i32, %arg1: i32) -> (i32, i32) {
    %c0_i32 = arith.constant 0 : i32
    %c0_i32_0 = arith.constant 0 : i32
    %c0_i32_1 = arith.constant 0 : i32
    return %c0_i32, %c0_i32_0 : i32, i32
  }
  func.func @transform_4(%arg0: i32, %arg1: i32) -> (i32, i32) {
    %c0_i32 = arith.constant 0 : i32
    %c0_i32_0 = arith.constant 0 : i32
    %c0_i32_1 = arith.constant 0 : i32
    return %c0_i32, %c0_i32_0 : i32, i32
  }
  func.func @transform_5(%arg0: i32, %arg1: i32) -> (i32, i32) {
    %c0_i32 = arith.constant 0 : i32
    %c0_i32_0 = arith.constant 0 : i32
    %c0_i32_1 = arith.constant 0 : i32
    return %c0_i32, %c0_i32_0 : i32, i32
  }
  func.func @transform_6(%arg0: i32, %arg1: i32) -> (i32, i32) {
    %c0_i32 = arith.constant 0 : i32
    %c0_i32_0 = arith.constant 0 : i32
    %c0_i32_1 = arith.constant 0 : i32
    return %c0_i32, %c0_i32_0 : i32, i32
  }
  func.func @transform_7(%arg0: i32, %arg1: i32) -> (i32, i32) {
    %c0_i32 = arith.constant 0 : i32
    %c0_i32_0 = arith.constant 0 : i32
    %c0_i32_1 = arith.constant 0 : i32
    return %c0_i32, %c0_i32_0 : i32, i32
  }
  func.func @transform_8(%arg0: i32, %arg1: i32) -> (i32, i32) {
    %c0_i32 = arith.constant 0 : i32
    %c0_i32_0 = arith.constant 0 : i32
    %c0_i32_1 = arith.constant 0 : i32
    return %c0_i32, %c0_i32_0 : i32, i32
  }
  func.func @transform_9(%arg0: i32, %arg1: i32) -> (i32, i32) {
    %c0_i32 = arith.constant 0 : i32
    %c0_i32_0 = arith.constant 0 : i32
    %c0_i32_1 = arith.constant 0 : i32
    return %c0_i32, %c0_i32_0 : i32, i32
  }
  func.func @transform_10(%arg0: i32, %arg1: i32) -> (i32, i32, i32, i32) {
    %c0_i32 = arith.constant 0 : i32
    %c0_i32_0 = arith.constant 0 : i32
    %c0_i32_1 = arith.constant 0 : i32
    return %arg0, %arg1, %c0_i32, %c0_i32_0 : i32, i32, i32, i32
  }
}

</mosaic_0001>

<bundles_post_ra>
// kernel: tpu_custom_call.1
= control target key start
LH: loop header
LB: loop body
LE: loop exit
PB: predicated region body
PF: predicated region fallthrough
CT: control target
= control target key end

     0   :  { %s3571_s0 = inlined_call_operand.hbm [shape: bf16[2,2,32,128], index: 0, kind: input, shape index: {}]   ;;  %s3572_s1 = inlined_call_operand.hbm [shape: bf16[128,128], index: 1, kind: input, shape index: {}]   ;;  %s3573_s2 = inlined_call_operand.vmem [shape: f32[1,128], index: 2, kind: input, shape index: {}]   ;;  %s3574_s3 = inlined_call_operand.vmem [shape: f32[1,128], index: 3, kind: input, shape index: {}]   ;;  %s3575_s4 = inlined_call_operand.hbm [shape: bf16[1152,128], index: 4, kind: input, shape index: {}]   ;;  %s3576_s5 = inlined_call_operand.vmem [shape: f32[1,128], index: 5, kind: input, shape index: {}]   ;;  %s3577_s6 = inlined_call_operand.vmem [shape: f32[1,128], index: 6, kind: input, shape index: {}]   ;;  %s3578_s7 = inlined_call_operand.hbm [shape: bf16[128,128], index: 7, kind: input, shape index: {}]   ;;  %s3579_s8 = inlined_call_operand.vmem [shape: f32[1,128], index: 8, kind: input, shape index: {}]   ;;  %s3580_s9 = inlined_call_operand.vmem [shape: f32[1,128], index: 9, kind: input, shape index: {}]   ;;  %s3581_s10 = inlined_call_operand.hbm [shape: bf16[2,2,32,128], index: 10, kind: output, shape index: {}]  }
   0x1   :  { %3592 = sst [smem:[#allocation23_spill]] %s3572_s1 }
   0x2   :  { %3593 = sst [smem:[#allocation24_spill]] %s3575_s4 }
   0x3   :  { %3594 = sst [smem:[#allocation25_spill]] %s3576_s5 }
   0x4   :  { %3595 = sst [smem:[#allocation26_spill]] %s3577_s6 }
   0x5   :  { %3596 = sst [smem:[#allocation27_spill]] %s3578_s7 }
   0x6   :  { %3597 = sst [smem:[#allocation28_spill]] %s3579_s8 }
   0x7   :  { %3598 = sst [smem:[#allocation29_spill]] %s3580_s9 }
   0x8   :  { %3599 = sst [smem:[#allocation30_spill]] %s3581_s10 }
   0x9   :  { %15 = vsyncpa [#allocation4], 0 }
   0xa   :  { %17 = vsyncpa [#allocation4 + $0x1], 0 }
   0xb   :  { %18 = vsyncpa [#allocation7], 0 }
   0xc   :  { %19 = vsyncpa [#allocation10], 0 }
   0xd   :  { %20 = vsyncpa [#allocation5], 0 }
   0xe   :  { %22 = vsyncpa [#allocation5 + $0x1], 0  ;;  %s3146_s13 = smov 0   ;;  %s3148_s14 = smov 0  }
   0xf   :  { %s3150_s15 = smov 0   ;;  %s3152_s16 = smov 0  }
  0x10   :  { %s3154_s17 = smov 0   ;;  %s3156_s18 = smov 0  }
  0x11   :  { %s3158_s19 = smov 0   ;;  %s3160_s20 = smov 0  }
  0x12   :  { %s3162_s21 = smov 0   ;;  %s3164_s22 = smov 0  }
  0x13   :  { %s3166_s23 = smov 0  }
  0x14 LB: > { %3600 = sst [smem:[#allocation16_spill]] %s3041_s13  ;;  %s2057_s24 = sadd.s32 4294967295, %s3081_s23   ;;  %s3081_s23 = sphi %s3166_s23, %s28_s23   ;;  %s3077_s22 = sphi %s3164_s22, %s3655_s22   ;;  %s3073_s21 = sphi %s3162_s21, %s3646_s21   ;;  %s3069_s20 = sphi %s3160_s20, %s3654_s20   ;;  %s3065_s19 = sphi %s3158_s19, %s3645_s19   ;;  %s3061_s18 = sphi %s3156_s18, %s3653_s18   ;;  %s3057_s17 = sphi %s3154_s17, %s3652_s17   ;;  %s3053_s16 = sphi %s3152_s16, %s3651_s16   ;;  %s3049_s15 = sphi %s3150_s15, %s3650_s15   ;;  %s3045_s14 = sphi %s3148_s14, %s3649_s14   ;;  %s3041_s13 = sphi %s3146_s13, %s3648_s13  }
  0x15   : > { %3601 = sst [smem:[#allocation17_spill]] %s3069_s20  ;;  %s2058_s25 = sadd.s32 4294967294, %s3081_s23  }
  0x16   : > { %3602 = sst [smem:[#allocation18_spill]] %s3073_s21  ;;  %p60_p0 = scmp.ne.s32.totalorder %s3057_s17, %s3053_s16 }
  0x17   : > { %p3202_p1 = scmp.eq.s32.totalorder %s2057_s24, 0  ;;  %p274_p2 = scmp.ne.s32.totalorder %s3049_s15, %s3045_s14 }
  0x18   : > { %p275_p3 = scmp.eq.s32.totalorder %s2057_s24, 3  ;;  %p280_p5 = scmp.ne.s32.totalorder %s3045_s14, %s3041_s13 }
  0x19   : > { %p3210_p4 = por %p3202_p1, %p60_p0  ;;  %p281_p7 = scmp.eq.s32.totalorder %s2058_s25, 3 }
  0x1a   : > { %p3216_p6 = por %p275_p3, %p274_p2  ;;  %p2059_p8 = scmp.ge.s32.totalorder %s3081_s23, 1 }
  0x1b   : > { %p288_p9 = scmp.lt.s32.totalorder %s3081_s23, 5  ;;  %p3222_p10 = por %p281_p7, %p280_p5 }
  0x1c   : > { %s3605_s28 = scalar_select %p3216_p6, 1, 0 }
  0x1d   : > { %s3607_s29 = scalar_select %p3222_p10, 1, 0 }
  0x1e   : > { %3606 = sst [smem:[#allocation19_spill]] %s3605_s28  ;;  %p3226_p11 = pnand %p2059_p8, %p288_p9 }
  0x1f   : > { %3608 = sst [smem:[#allocation20_spill]] %s3607_s29  ;;  %s3083_s24 = smov [#allocation6]  }
  0x20   : > { %s3610_s1 = sld [smem:[#allocation23_spill]]  ;;  %p2701_p12 = pneg %p3226_p11 }
  0x21   : > { %s301_s25 = sshll.u32 %s3083_s24, 4  ;;  %s3612_s4 = sld [smem:[#allocation24_spill]]  ;;  %s302_s25 = int_to_ptr.vmem [resolvable:$true] %s301_s25 }
  0x22   : > { %p3237_p13 = pnand %p2701_p12, %p3202_p1  ;;  %s3587_s12 = smov 64  }
  0x23   : > { %s3613_s7 = sld [smem:[#allocation27_spill]]  ;;  %s3086_s29 = smov [#allocation8]  }
  0x24   : > { %s3087_s9 = smov [#allocation9]   ;;  %s37_s10 = sadd.s32 1, %s3073_s21 }
  0x25   : > { %p38_p0 = scmp.ge.s32.totalorder %s37_s10, 2  ;;  %s47_s24 = sadd.s32 1, %s3061_s18 }
  0x26   : > { %s299_s16 = sshll.u32 %s3610_s1, 4  ;;  %s3588_s1 = smov 4   ;;  %s300_s16 = int_to_ptr.hbm [resolvable:$true] %s299_s16 }
  0x27   : > { %s319_s11 = sshll.u32 %s3612_s4, 4  ;;  %s321_s4 = sshll.u32 %s3086_s29, 4  ;;  %s320_s11 = int_to_ptr.hbm [resolvable:$true] %s319_s11  ;;  %s322_s4 = int_to_ptr.vmem [resolvable:$true] %s321_s4 }
  0x28   : > { %2704 = dma.hbm_to_vmem [thread:$0]  (!%p3237_p13), %s300_s16, 1024, %s302_s25, [#allocation7], %s3587_s12, %s3587_s12, %s3588_s1  }
  0x29   : > { %s339_s28 = sshll.u32 %s3613_s7, 4  ;;  %s341_s16 = sshll.u32 %s3087_s9, 4  ;;  %s340_s28 = int_to_ptr.hbm [resolvable:$true] %s339_s28  ;;  %s342_s16 = int_to_ptr.vmem [resolvable:$true] %s341_s16 }
  0x2a   : > { %2707 = dma.hbm_to_vmem [thread:$0]  (!%p3237_p13), %s320_s11, 9216, %s322_s4, [#allocation7], %s3587_s12, %s3587_s12, %s3588_s1  }
  0x2b   : > { %2710 = dma.hbm_to_vmem [thread:$0]  (!%p3237_p13), %s340_s28, 1024, %s342_s16, [#allocation10], %s3587_s12, %s3587_s12, %s3588_s1  }
  0x2c   : > { %s40_s25 = sadd.s32 1, %s3077_s22  ;;  %p54_p2 = scmp.ne.s32.totalorder %s3061_s18, %s3057_s17 }
  0x2d   : > { %p55_p3 = scmp.eq.s32.totalorder %s3081_s23, 0  ;;  %s3657_s10 = smov (%p38_p0, %s37_s10), 0 }
  0x2e   : > { %3614 = sst [smem:[#allocation21_spill]] %s3657_s10  ;;  %s3659_s25 = smov (!%p38_p0, %s40_s25), %s3077_s22 }
  0x2f   : > { %p3271_p5 = por %p55_p3, %p54_p2  ;;  %s260_s9 = ssub.s32 %s3073_s21, %s3657_s10 }
  0x30   : > { %p42_p7 = scmp.ge.s32.totalorder %s3659_s25, 2  ;;  %s264_s13 = sadd.s32 1, %s3049_s15 }
  0x31   : > { %p2722_p8 = scmp.lt.s32.totalorder %s3081_s23, 4  ;;  %s361_s11 = sand.u32 1, %s3061_s18  }
  0x32   : > { %s3661_s25 = smov (%p42_p7, %s3659_s25), 0  ;;  %s2064_s28 = sshll.u32 %s361_s11, 5 }
  0x33   : > { %3616 = sst [smem:[#allocation22_spill]] %s3661_s25  ;;  %s44_s29 = ssub.s32 %s3077_s22, %s3661_s25 }
  0x34   : > { %p45_p9 = scmp.eq.s32.totalorder %s44_s29, 0  ;;  %s261_s16 = sor.u32 %s260_s9, %s44_s29 }
  0x35   : > { %p262_p12 = scmp.eq.s32.totalorder %s261_s16, 0  ;;  %s2531_s12 = sshll.u32 %s3077_s22, 5 }
  0x36   : > { %s3286_s1 = scalar_select %p45_p9, %s3061_s18, %s47_s24  }
  0x37   : > { %s3289_s7 = scalar_select %p262_p12, %s3049_s15, %s264_s13  }
  0x38   : > { %s370_s20 = scalar_lea.hbm %s3571_s0, %s2531_s12  ;;  %s365_s8 = scalar_lea.vmem [#allocation3], %s2064_s28 }
  0x39   : > { %s373_s6 = sshll.u32 %s365_s8, 4  ;;  %s371_s5 = sshll.u32 %s370_s20, 4  ;;  %s374_s6 = int_to_ptr.vmem [resolvable:$true] %s373_s6  ;;  %s372_s5 = int_to_ptr.hbm [resolvable:$true] %s371_s5 }
  0x3a   : > { %p2712_p13 = pnand %p2722_p8, %p3271_p5  ;;  %s362_s25 = scalar_lea.sflag [#allocation4], %s361_s11 }
  0x3b   : > { %s3617_s9 = smov 4   ;;  %s3618_s29 = smov 64  }
  0x3c   : > { %2714 = dma.hbm_to_vmem [thread:$0]  (!%p2712_p13), %s372_s5, 512, %s374_s6, %s362_s25, %s3618_s29, %s3618_s29, %s3617_s9  }
  0x3d   : > { %385 = sbr.rel (%p3226_p11) target bundleno = 659 (0x293), region = 60  ;;  %s387_s21 = sand.u32 (!%p3226_p11), 1, %s3057_s17  }
  0x3e   : > { %s2068_s12 = sshll.u32 (!%p3226_p11), %s387_s21, 5  ;;  %s388_s10 = scalar_lea.sflag (!%p3226_p11), [#allocation4], %s387_s21 }
  0x3f   : > { %s3304_s8 = scalar_lea.vmem (!%p3226_p11), [#allocation3], %s2068_s12 }
  0x42   : > { %3024 = dma.done.wait (%p3210_p4), %s388_s10, 512  }
  0x43   : > { %3026 = vsyncadd (%p3210_p4), %s388_s10, 4294966784 }
  0x44   : > { %3028 = dma.done.wait (%p3202_p1), [#allocation7], 10240  }
  0x45   : > { %3030 = vsyncadd (%p3202_p1), [#allocation7], 4294957056 }
  0x46   : > { %3032 = dma.done.wait (%p3202_p1), [#allocation10], 1024  }
  0x47   : > { %3034 = vsyncadd (%p3202_p1), [#allocation10], 4294966272  ;;  %s441_s5 = sand.u32 1, %s3045_s14   ;;  %p2073_p4 = scmp.ne.s32.totalorder %s3065_s19, 0 }
  0x48   : > { %s2072_s6 = sshll.u32 %s441_s5, 4 }
  0x49   : > { %s3321_s20 = scalar_lea.vmem [#allocation11], %s2072_s6  ;;  %447 = sbr.rel (%p2073_p4) target bundleno = 258 (0x102), region = 80 }
  0x4e   : > { %v2541_v0 = vld [vmem:[#allocation6 + $0x38] sm:$0xff]  ;;  %v3088_v2 = vmov 0.0   ;;  %v2540_v3 = vld [vmem:[#allocation6 + $0x30] sm:$0xff]  ;;  %v2539_v5 = vld [vmem:[#allocation6 + $0x28] sm:$0xff] }
  0x4f   : > { %v2551_v1 = vld [vmem:[#allocation6 + $0x38] sm:$0xff]  ;;  %448 = vst [vmem:[#allocation2] sm:$0xff] %v3088_v2  ;;  %532 = vmatpush.bf16.msra.mxu0 %v2541_v0  ;;  %2653 = vmatpush.bf16.msra.mxu2 %v2541_v0  ;;  %v2550_v4 = vld [vmem:[#allocation6 + $0x30] sm:$0xff]  ;;  %v2549_v6 = vld [vmem:[#allocation6 + $0x28] sm:$0xff] }
  0x50   : > { %449 = vst [vmem:[#allocation2 + $0x8] sm:$0xff] %v3088_v2  ;;  %656 = vmatpush.bf16.msra.mxu1 %v2551_v1  ;;  %2661 = vmatpush.bf16.msra.mxu3 %v2551_v1  ;;  %v2538_v7 = vld [vmem:[#allocation6 + $0x20] sm:$0xff]  ;;  %v2537_v9 = vld [vmem:[#allocation6 + $0x18] sm:$0xff]  ;;  %v2536_v11 = vld [vmem:[#allocation6 + $0x10] sm:$0xff] }
  0x51   : > { %450 = vst [vmem:[#allocation2 + $0x50] sm:$0xff] %v3088_v2  ;;  %v2548_v8 = vld [vmem:[#allocation6 + $0x20] sm:$0xff]  ;;  %v2547_v10 = vld [vmem:[#allocation6 + $0x18] sm:$0xff]  ;;  %v2546_v12 = vld [vmem:[#allocation6 + $0x10] sm:$0xff] }
  0x52   : > { %451 = vst [vmem:[#allocation2 + $0x58] sm:$0xff] %v3088_v2  ;;  %v2535_v13 = vld [vmem:[#allocation6 + $0x8] sm:$0xff]  ;;  %v2534_v15 = vld [vmem:[#allocation6] sm:$0xff]  ;;  %v2542_v19 = vld [vmem:[%s3304_s8 + $0x10] sm:$0xff] }
  0x53   : > { %533 = vmatpush.bf16.msra.mxu0 %v2540_v3  ;;  %2654 = vmatpush.bf16.msra.mxu2 %v2540_v3  ;;  %v2545_v14 = vld [vmem:[#allocation6 + $0x8] sm:$0xff]  ;;  %v2544_v16 = vld [vmem:[#allocation6] sm:$0xff]  ;;  %v2543_v20 = vld [vmem:[%s3304_s8 + $0x18] sm:$0xff] }
  0x54   : > { %657 = vmatpush.bf16.msra.mxu1 %v2550_v4  ;;  %2662 = vmatpush.bf16.msra.mxu3 %v2550_v4  ;;  %v2532_v17 = vld [vmem:[%s3304_s8] sm:$0xff]  ;;  %v2533_v18 = vld [vmem:[%s3304_s8 + $0x8] sm:$0xff] }
  0x55   : > { %v2823_v21 = vld [vmem:[%s3573_s2] ss:$0 sm:$0xff] }
  0x56   : > { %v2825_v22 = vld [vmem:[%s3573_s2] ss:$0 sm:$0xff] }
  0x57   : > { %534 = vmatpush.bf16.msra.mxu0 %v2539_v5  ;;  %2655 = vmatpush.bf16.msra.mxu2 %v2539_v5  ;;  %v2824_v23 = vld [vmem:[%s3574_s3] ss:$0 sm:$0xff] }
  0x58   : > { %658 = vmatpush.bf16.msra.mxu1 %v2549_v6  ;;  %2663 = vmatpush.bf16.msra.mxu3 %v2549_v6  ;;  %v2826_v25 = vld [vmem:[%s3574_s3] ss:$0 sm:$0xff] }
  0x5b   : > { %535 = vmatpush.bf16.msra.mxu0 %v2538_v7  ;;  %2656 = vmatpush.bf16.msra.mxu2 %v2538_v7 }
  0x5c   : > { %659 = vmatpush.bf16.msra.mxu1 %v2548_v8  ;;  %2664 = vmatpush.bf16.msra.mxu3 %v2548_v8 }
  0x5f   : > { %536 = vmatpush.bf16.msra.mxu0 %v2537_v9  ;;  %2657 = vmatpush.bf16.msra.mxu2 %v2537_v9 }
  0x60   : > { %660 = vmatpush.bf16.msra.mxu1 %v2547_v10  ;;  %2665 = vmatpush.bf16.msra.mxu3 %v2547_v10 }
  0x63   : > { %537 = vmatpush.bf16.msra.mxu0 %v2536_v11  ;;  %2658 = vmatpush.bf16.msra.mxu2 %v2536_v11 }
  0x64   : > { %661 = vmatpush.bf16.msra.mxu1 %v2546_v12  ;;  %2666 = vmatpush.bf16.msra.mxu3 %v2546_v12 }
  0x67   : > { %538 = vmatpush.bf16.msra.mxu0 %v2535_v13  ;;  %2659 = vmatpush.bf16.msra.mxu2 %v2535_v13 }
  0x68   : > { %662 = vmatpush.bf16.msra.mxu1 %v2545_v14  ;;  %2667 = vmatpush.bf16.msra.mxu3 %v2545_v14 }
  0x6b   : > { %539 = vmatpush.bf16.msra.mxu0 %v2534_v15  ;;  %2660 = vmatpush.bf16.msra.mxu2 %v2534_v15 }
  0x6c   : > { %663 = vmatpush.bf16.msra.mxu1 %v2544_v16  ;;  %2668 = vmatpush.bf16.msra.mxu3 %v2544_v16 }
  0x6e   : > { %540 = vmatmul.bf16.vlgmr.msra.gmra.mxu0 %v2532_v17  ;;  %545 = vmatmul.bf16.vlgmr.msra.gmra.mxu2 %v2533_v18 }
  0x6f   : > { %664 = vmatmul.bf16.vlgmr.msra.gmra.mxu1 %v2542_v19  ;;  %669 = vmatmul.bf16.vlgmr.msra.gmra.mxu3 %v2543_v20 }
  0xeb   : > { %v541_v24 = vpop.f32.mrf.mxu0 }
  0xec   : > { %v555_v26 = vmul.f32 %v2823_v21, %v541_v24  ;;  %v665_v27 = vpop.f32.mrf.mxu1 }
  0xed   : > { %v679_v28 = vmul.f32 %v2825_v22, %v665_v27 }
  0xee   : > { %v563_v29 = vadd.f32 %v2824_v23, %v555_v26 }
  0xef   : > { %v687_v30 = vadd.f32 %v2826_v25, %v679_v28 }
  0xf0   : > { %v567_v31 = vmax.f32 %v563_v29, 0.0 }
  0xf1   : > { %v691_v32 = vmax.f32 %v687_v30, 0.0  ;;  %v546_v33 = vpop.f32.mrf.mxu2 }
  0xf2   : > { %571 = vst [vmem:[#allocation2 + $0x10] sm:$0xff] %v567_v31  ;;  %v557_v34 = vmul.f32 %v2823_v21, %v546_v33  ;;  %v670_v35 = vpop.f32.mrf.mxu3 }
  0xf3   : > { %695 = vst [vmem:[#allocation2 + $0x30] sm:$0xff] %v691_v32  ;;  %v681_v36 = vmul.f32 %v2825_v22, %v670_v35  ;;  %v543_v37 = vpop.f32.mrf.mxu0 }
  0xf4   : > { %v565_v38 = vadd.f32 %v2824_v23, %v557_v34  ;;  %v556_v39 = vmul.f32 %v2823_v21, %v543_v37  ;;  %v667_v40 = vpop.f32.mrf.mxu1 }
  0xf5   : > { %v689_v41 = vadd.f32 %v2826_v25, %v681_v36  ;;  %v680_v42 = vmul.f32 %v2825_v22, %v667_v40 }
  0xf6   : > { %v569_v43 = vmax.f32 %v565_v38, 0.0  ;;  %v564_v44 = vadd.f32 %v2824_v23, %v556_v39 }
  0xf7   : > { %v693_v45 = vmax.f32 %v689_v41, 0.0  ;;  %v688_v46 = vadd.f32 %v2826_v25, %v680_v42 }
  0xf8   : > { %573 = vst [vmem:[#allocation2 + $0x20] sm:$0xff] %v569_v43  ;;  %v568_v47 = vmax.f32 %v564_v44, 0.0 }
  0xf9   : > { %697 = vst [vmem:[#allocation2 + $0x40] sm:$0xff] %v693_v45  ;;  %v692_v48 = vmax.f32 %v688_v46, 0.0  ;;  %v548_v49 = vpop.f32.mrf.mxu2 }
  0xfa   : > { %572 = vst [vmem:[#allocation2 + $0x18] sm:$0xff] %v568_v47  ;;  %v558_v50 = vmul.f32 %v2823_v21, %v548_v49  ;;  %v672_v51 = vpop.f32.mrf.mxu3 }
  0xfb   : > { %696 = vst [vmem:[#allocation2 + $0x38] sm:$0xff] %v692_v48  ;;  %v682_v52 = vmul.f32 %v2825_v22, %v672_v51 }
  0xfc   : > { %v566_v53 = vadd.f32 %v2824_v23, %v558_v50 }
  0xfd   : > { %v690_v54 = vadd.f32 %v2826_v25, %v682_v52 }
  0xfe   : > { %v570_v55 = vmax.f32 %v566_v53, 0.0 }
  0xff   : > { %v694_v56 = vmax.f32 %v690_v54, 0.0 }
 0x100   : > { %574 = vst [vmem:[#allocation2 + $0x28] sm:$0xff] %v570_v55 }
 0x101   : > { %698 = vst [vmem:[#allocation2 + $0x48] sm:$0xff] %v694_v56 }
 0x102 PF: > { %v2559_v57 = vld [vmem:[#allocation8 + $0x38] sm:$0xff]  ;;  %v701_v60 = vlaneseq  ;;  %v2558_v62 = vld [vmem:[#allocation8 + $0x30] sm:$0xff]  ;;  %v2557_v3 = vld [vmem:[#allocation8 + $0x28] sm:$0xff]  ;;  %s2158_s28 = sshll.u32 %s3065_s19, 5  ;;  %s3635_s21 = sld [smem:[#allocation25_spill]] }
 0x103   : > { %v2575_v58 = vld [vmem:[#allocation8 + $0xb8] sm:$0xff]  ;;  %1575 = vmatpush.bf16.msra.mxu0 %v2559_v57  ;;  %v2574_v63 = vld [vmem:[#allocation8 + $0xb0] sm:$0xff]  ;;  %v2573_v4 = vld [vmem:[#allocation8 + $0xa8] sm:$0xff]  ;;  %s3349_s16 = scalar_lea.vmem [#allocation2], %s2158_s28  ;;  %s3636_s6 = sld [smem:[#allocation26_spill]] }
 0x104   : > { %v2567_v59 = vld [vmem:[#allocation8 + $0x78] sm:$0xff]  ;;  %1613 = vmatpush.bf16.msra.mxu2 %v2575_v58  ;;  %v2566_v0 = vld [vmem:[#allocation8 + $0x70] sm:$0xff]  ;;  %v3340_v2 = vshrl.u32 %v701_v60, 7  ;;  %v2565_v5 = vld [vmem:[#allocation8 + $0x68] sm:$0xff]  ;;  %s2632_s26 = sshll.u32 %s3065_s19, 4  ;;  %s3637_s25 = sld [smem:[#allocation28_spill]] }
 0x105   : > { %v2583_v61 = vld [vmem:[#allocation8 + $0xf8] sm:$0xff]  ;;  %1594 = vmatpush.bf16.msra.mxu1 %v2567_v59  ;;  %v2582_v1 = vld [vmem:[#allocation8 + $0xf0] sm:$0xff]  ;;  %v2581_v6 = vld [vmem:[#allocation8 + $0xe8] sm:$0xff]  ;;  %s3638_s24 = sld [smem:[#allocation17_spill]]  ;;  %s1869_s4 = scalar_lea.vmem %s3304_s8, %s2632_s26 [#allocation3] }
 0x106   : > { %1632 = vmatpush.bf16.msra.mxu3 %v2583_v61  ;;  %v703_v7 = vadd.s32 8, %v3340_v2  ;;  %v2556_v8 = vld [vmem:[#allocation8 + $0x20] sm:$0xff]  ;;  %v710_v10 = vand.u32 7, %v3340_v2  ;;  %v2555_v14 = vld [vmem:[#allocation8 + $0x18] sm:$0xff]  ;;  %v2554_v28 = vld [vmem:[#allocation8 + $0x10] sm:$0xff]  ;;  %v704_v40 = vadd.s32 16, %v3340_v2 }
 0x107   : > { %1576 = vmatpush.bf16.msra.mxu0 %v2558_v62  ;;  %v2572_v9 = vld [vmem:[#allocation8 + $0xa0] sm:$0xff]  ;;  %v2571_v15 = vld [vmem:[#allocation8 + $0x98] sm:$0xff]  ;;  %v2570_v29 = vld [vmem:[#allocation8 + $0x90] sm:$0xff]  ;;  %v705_v52 = vadd.s32 24, %v3340_v2  ;;  %s3639_s28 = sld [smem:[#allocation29_spill]]  ;;  %s1909_s27 = sshll.u32 %s3321_s20, 4  ;;  %s1910_s27 = int_to_ptr.vmem [resolvable:$true] %s1909_s27 }
 0x108   : > { %1614 = vmatpush.bf16.msra.mxu2 %v2574_v63  ;;  %v2564_v11 = vld [vmem:[#allocation8 + $0x60] sm:$0xff]  ;;  %v717_v13 = vand.u32 7, %v703_v7  ;;  %v2563_v16 = vld [vmem:[#allocation8 + $0x58] sm:$0xff]  ;;  %vm3345_vm0 = vcmp.gt.s32.totalorder %v710_v10, 0  ;;  %v2165_v21 = vld [vmem:[%s3349_s16 + $0xf] sm:$0xff]  ;;  %vm3357_vm2 = vcmp.lt.s32.totalorder %v710_v10, 7 }
 0x109   : > { %1595 = vmatpush.bf16.msra.mxu1 %v2566_v0  ;;  %v2580_v12 = vld [vmem:[#allocation8 + $0xe0] sm:$0xff]  ;;  %v2579_v17 = vld [vmem:[#allocation8 + $0xd8] sm:$0xff]  ;;  %v2169_v24 = vld [vmem:[%s3349_s16 + $0x9] sm:$0xff]  ;;  %v833_v37 = vsel %vm3345_vm0, %v2165_v21, 0.0  ;;  %v724_v53 = vand.u32 7, %v704_v40  ;;  %v731_v2 = vand.u32 7, %v705_v52 }
 0x10a   : > { %1633 = vmatpush.bf16.msra.mxu3 %v2582_v1  ;;  %v2164_v19 = vld [vmem:[%s3349_s16 + $0x7] sm:$0xff]  ;;  %vm3352_vm1 = vcmp.gt.s32.totalorder %v717_v13, 0  ;;  %vm3361_vm3 = vcmp.lt.s32.totalorder %v717_v13, 7  ;;  %v3367_v25 = vld [vmem:[%s3349_s16 + $0x11] sm:$0xff]  ;;  %v807_v31 = vsel %vm3357_vm2, %v2169_v24, 0.0  ;;  %v837_v48 = vpack.c.bf16 %v833_v37, %v833_v37  ;;  %v3393_v7 = vld [vmem:[%s3349_s16 + $0x19] sm:$0xff] }
 0x10b   : > { %1577 = vmatpush.bf16.msra.mxu0 %v2557_v3  ;;  %v3370_v26 = vld [vmem:[%s3349_s16 + $0x17] sm:$0xff]  ;;  %v787_v27 = vsel %vm3345_vm0, %v2164_v19, 0.0  ;;  %v788_v30 = vsel %vm3352_vm1, %v2165_v21, 0.0  ;;  %v808_v32 = vsel %vm3361_vm3, %v3367_v25, 0.0  ;;  %v2159_v33 = vld [vmem:[%s3349_s16 + $0x8] sm:$0xff]  ;;  %v811_v42 = vpack.c.bf16 %v807_v31, %v807_v31  ;;  %v2552_v58 = vld [vmem:[#allocation8] sm:$0xff] }
 0x10c   : > { %1615 = vmatpush.bf16.msra.mxu2 %v2573_v4  ;;  %v2562_v34 = vld [vmem:[#allocation8 + $0x50] sm:$0xff]  ;;  %v834_v38 = vsel %vm3352_vm1, %v3370_v26, 0.0  ;;  %v791_v39 = vpack.c.bf16 %v787_v27, %v787_v27  ;;  %v792_v41 = vpack.c.bf16 %v788_v30, %v788_v30  ;;  %v812_v43 = vpack.c.bf16 %v808_v32, %v808_v32  ;;  %v2553_v45 = vld [vmem:[#allocation8 + $0x8] sm:$0xff]  ;;  %v2568_v59 = vld [vmem:[#allocation8 + $0x80] sm:$0xff]  ;;  %s2527_s9 = sshll.u32 %s3638_s24, 3 }
 0x10d   : > { %1596 = vmatpush.bf16.msra.mxu1 %v2565_v5  ;;  %v2578_v35 = vld [vmem:[#allocation8 + $0xd0] sm:$0xff]  ;;  %v795_v44 = vpack.c.bf16 %v2159_v33, %v2159_v33  ;;  %v2569_v46 = vld [vmem:[#allocation8 + $0x88] sm:$0xff]  ;;  %v838_v49 = vpack.c.bf16 %v834_v38, %v834_v38  ;;  %v919_v56 = vunpack.c.l.b16 %v811_v42  ;;  %v931_v62 = vunpack.c.l.b16 %v837_v48  ;;  %v2560_v0 = vld [vmem:[#allocation8 + $0x40] sm:$0xff] }
 0x10e   : > { %1634 = vmatpush.bf16.msra.mxu3 %v2581_v6  ;;  %v2160_v36 = vld [vmem:[%s3349_s16 + $0x10] sm:$0xff]  ;;  %v2561_v50 = vld [vmem:[#allocation8 + $0x48] sm:$0xff]  ;;  %v895_v54 = vunpack.c.l.b16 %v791_v39  ;;  %v896_v55 = vunpack.c.l.b16 %v792_v41  ;;  %v920_v57 = vunpack.c.l.b16 %v812_v43  ;;  %v2576_v1 = vld [vmem:[#allocation8 + $0xc0] sm:$0xff]  ;;  %vm3399_vm4 = vcmp.gt.s32.totalorder %v724_v53, 0 }
 0x10f   : > { %1578 = vmatpush.bf16.msra.mxu0 %v2556_v8  ;;  %v796_v47 = vpack.c.bf16 %v2160_v36, %v2160_v36  ;;  %v2577_v51 = vld [vmem:[#allocation8 + $0xc8] sm:$0xff]  ;;  %v907_v60 = vunpack.c.l.b16 %v795_v44  ;;  %v932_v63 = vunpack.c.l.b16 %v838_v49  ;;  %v2607_v3 = vld [vmem:[#allocation8 + $0x1b8] sm:$0xff]  ;;  %vm3403_vm5 = vcmp.gt.s32.totalorder %v731_v2, 0  ;;  %v2606_v19 = vld [vmem:[#allocation8 + $0x1b0] sm:$0xff] }
 0x110   : > { %1616 = vmatpush.bf16.msra.mxu2 %v2572_v9  ;;  %v2591_v4 = vld [vmem:[#allocation8 + $0x138] sm:$0xff]  ;;  %v899_v5 = vpack.c.b16 %v896_v55, %v895_v54  ;;  %v923_v6 = vpack.c.b16 %v920_v57, %v919_v56  ;;  %v3396_v8 = vld [vmem:[%s3349_s16 + $0x21] sm:$0xff]  ;;  %vm3410_vm6 = vcmp.lt.s32.totalorder %v724_v53, 7  ;;  %vm3414_vm7 = vcmp.lt.s32.totalorder %v731_v2, 7  ;;  %v2590_v21 = vld [vmem:[#allocation8 + $0x130] sm:$0xff] }
 0x111   : > { %1597 = vmatpush.bf16.msra.mxu1 %v2564_v11  ;;  %v3390_v61 = vunpack.c.l.b16 %v796_v47  ;;  %v935_v10 = vpack.c.b16 %v932_v63, %v931_v62  ;;  %v2615_v13 = vld [vmem:[#allocation8 + $0x1f8] sm:$0xff]  ;;  %v3419_v24 = vld [vmem:[%s3349_s16 + $0x27] sm:$0xff]  ;;  %v2598_v27 = vld [vmem:[#allocation8 + $0x170] sm:$0xff]  ;;  %v809_v30 = vsel %vm3410_vm6, %v3393_v7, 0.0  ;;  %v810_v31 = vsel %vm3414_vm7, %v3396_v8, 0.0 }
 0x112   : > { %1635 = vmatpush.bf16.msra.mxu3 %v2580_v12  ;;  %v2599_v12 = vld [vmem:[#allocation8 + $0x178] sm:$0xff]  ;;  %v2614_v32 = vld [vmem:[#allocation8 + $0x1f0] sm:$0xff]  ;;  %v836_v36 = vsel %vm3403_vm5, %v3419_v24, 0.0  ;;  %v2605_v37 = vld [vmem:[#allocation8 + $0x1a8] sm:$0xff]  ;;  %v813_v41 = vpack.c.bf16 %v809_v30, %v809_v30  ;;  %v814_v42 = vpack.c.bf16 %v810_v31, %v810_v31  ;;  %v883_v18 = vsel %vm3357_vm2, %v3393_v7, 0.0 }
 0x113   : > { %1579 = vmatpush.bf16.msra.mxu0 %v2555_v14  ;;  %v911_v9 = vpack.c.b16 %v3390_v61, %v907_v60  ;;  %v2161_v33 = vld [vmem:[%s3349_s16 + $0x18] sm:$0xff]  ;;  %v2589_v38 = vld [vmem:[#allocation8 + $0x128] sm:$0xff]  ;;  %v2604_v49 = vld [vmem:[#allocation8 + $0x1a0] sm:$0xff]  ;;  %v884_v20 = vsel %vm3361_vm3, %v3396_v8, 0.0  ;;  %v887_v31 = vpack.c.bf16 %v883_v18, %v883_v18 }
 0x114   : > { %1617 = vmatpush.bf16.msra.mxu2 %v2571_v15  ;;  %v3408_v15 = vld [vmem:[%s3349_s16 + $0x1f] sm:$0xff]  ;;  %v797_v43 = vpack.c.bf16 %v2161_v33, %v2161_v33  ;;  %v2597_v47 = vld [vmem:[#allocation8 + $0x168] sm:$0xff]  ;;  %v921_v53 = vunpack.c.l.b16 %v813_v41  ;;  %v922_v54 = vunpack.c.l.b16 %v814_v42 }
 0x115   : > { %1598 = vmatpush.bf16.msra.mxu1 %v2563_v16  ;;  %v2613_v48 = vld [vmem:[#allocation8 + $0x1e8] sm:$0xff]  ;;  %v2612_v60 = vld [vmem:[#allocation8 + $0x1e0] sm:$0xff]  ;;  %v2603_v62 = vld [vmem:[#allocation8 + $0x198] sm:$0xff]  ;;  %v3468_v41 = vunpack.c.l.b16 %v887_v31 }
 0x116   : > { %1636 = vmatpush.bf16.msra.mxu3 %v2579_v17  ;;  %v3441_v55 = vunpack.c.l.b16 %v797_v43  ;;  %v2587_v63 = vld [vmem:[#allocation8 + $0x118] sm:$0xff]  ;;  %v2593_v33 = vld [vmem:[#allocation8 + $0x148] sm:$0xff]  ;;  %v2600_v22 = vld [vmem:[#allocation8 + $0x180] sm:$0xff] }
 0x117   : > { %1580 = vmatpush.bf16.msra.mxu0 %v2554_v28  ;;  %v789_v28 = vsel %vm3399_vm4, %v3370_v26, 0.0  ;;  %v2620_v14 = vld [vmem:[#allocation8 + $0x220] sm:$0xff] }
 0x118   : > { %1618 = vmatpush.bf16.msra.mxu2 %v2570_v29  ;;  %v790_v29 = vsel %vm3403_vm5, %v3408_v15, 0.0  ;;  %v793_v39 = vpack.c.bf16 %v789_v28, %v789_v28  ;;  %v947_v43 = vpack.c.b16 %v3441_v55, %v3390_v61  ;;  %v873_v61 = vsel %vm3399_vm4, %v3419_v24, 0.0  ;;  %v2616_v18 = vld [vmem:[#allocation8 + $0x200] sm:$0xff] }
 0x119   : > { %1599 = vmatpush.bf16.msra.mxu1 %v2562_v34  ;;  %v2162_v34 = vld [vmem:[%s3349_s16 + $0x20] sm:$0xff]  ;;  %v794_v40 = vpack.c.bf16 %v790_v29, %v790_v29 }
 0x11a   : > { %1637 = vmatpush.bf16.msra.mxu3 %v2578_v35  ;;  %v835_v35 = vsel %vm3399_vm4, %v3408_v15, 0.0  ;;  %v798_v44 = vpack.c.bf16 %v2162_v34, %v2162_v34  ;;  %v2609_v34 = vld [vmem:[#allocation8 + $0x1c8] sm:$0xff] }
 0x11b   : > { %1581 = vmatpush.bf16.msra.mxu0 %v2553_v45  ;;  %v839_v45 = vpack.c.bf16 %v835_v35, %v835_v35  ;;  %v898_v52 = vunpack.c.l.b16 %v794_v40  ;;  %v2608_v40 = vld [vmem:[#allocation8 + $0x1c0] sm:$0xff] }
 0x11c   : > { %1619 = vmatpush.bf16.msra.mxu2 %v2569_v46  ;;  %v840_v46 = vpack.c.bf16 %v836_v36, %v836_v36  ;;  %v3443_v56 = vunpack.c.l.b16 %v798_v44  ;;  %v2623_v36 = vld [vmem:[#allocation8 + $0x238] sm:$0xff] }
 0x11d   : > { %1600 = vmatpush.bf16.msra.mxu1 %v2561_v50  ;;  %v2588_v50 = vld [vmem:[#allocation8 + $0x120] sm:$0xff]  ;;  %v933_v57 = vunpack.c.l.b16 %v839_v45 }
 0x11e   : > { %1638 = vmatpush.bf16.msra.mxu3 %v2577_v51  ;;  %v897_v51 = vunpack.c.l.b16 %v793_v39  ;;  %v3447_v2 = vpack.c.b16 %v3443_v56, %v3441_v55  ;;  %v2592_v39 = vld [vmem:[#allocation8 + $0x140] sm:$0xff]  ;;  %v2192_v55 = vld [vmem:[%s3349_s16 + $0x30] sm:$0xff] }
 0x11f   : > { %1582 = vmatpush.bf16.msra.mxu0 %v2552_v58  ;;  %v934_v58 = vunpack.c.l.b16 %v840_v46  ;;  %v882_v24 = vpack.c.bf16 %v2192_v55, %v2192_v55 }
 0x120   : > { %1620 = vmatpush.bf16.msra.mxu2 %v2568_v59  ;;  %v2596_v59 = vld [vmem:[#allocation8 + $0x160] sm:$0xff] }
 0x121   : > { %1601 = vmatpush.bf16.msra.mxu1 %v2560_v0  ;;  %v900_v0 = vpack.c.b16 %v898_v52, %v897_v51  ;;  %v2621_v52 = vld [vmem:[#allocation8 + $0x228] sm:$0xff] }
 0x122   : > { %1639 = vmatpush.bf16.msra.mxu3 %v2576_v1  ;;  %1583 = vmatmul.bf16.vlgmr.msra.gmra.mxu0 %v899_v5  ;;  %v924_v1 = vpack.c.b16 %v922_v54, %v921_v53  ;;  %v2611_v5 = vld [vmem:[#allocation8 + $0x1d8] sm:$0xff]  ;;  %v847_v53 = vsel %vm3410_vm6, %v3396_v8, 0.0  ;;  %v982_v8 = vunpack.c.l.b16 %v882_v24 }
 0x123   : > { %1651 = vmatpush.bf16.msrb.mxu0 %v2591_v4  ;;  %1621 = vmatmul.bf16.vlgmr.msra.gmra.mxu2 %v923_v6  ;;  %v2595_v4 = vld [vmem:[#allocation8 + $0x158] sm:$0xff]  ;;  %v2602_v6 = vld [vmem:[#allocation8 + $0x190] sm:$0xff] }
 0x124   : > { %1689 = vmatpush.bf16.msrb.mxu2 %v2607_v3  ;;  %1602 = vmatmul.bf16.vlgmr.msra.gmra.mxu1 %v911_v9  ;;  %v936_v3 = vpack.c.b16 %v934_v58, %v933_v57  ;;  %v2586_v9 = vld [vmem:[#allocation8 + $0x110] sm:$0xff]  ;;  %v877_v58 = vpack.c.bf16 %v873_v61, %v873_v61 }
 0x125   : > { %1640 = vmatmul.bf16.vlgmr.msra.gmra.mxu3 %v935_v10  ;;  %1670 = vmatpush.bf16.msrb.mxu1 %v2599_v12  ;;  %v871_v10 = vsel %vm3345_vm0, %v3370_v26, 0.0  ;;  %v872_v12 = vsel %vm3352_vm1, %v3408_v15, 0.0  ;;  %v2601_v26 = vld [vmem:[#allocation8 + $0x188] sm:$0xff] }
 0x126   : > { %1708 = vmatpush.bf16.msrb.mxu3 %v2615_v13  ;;  %v2594_v13 = vld [vmem:[#allocation8 + $0x150] sm:$0xff]  ;;  %v2585_v15 = vld [vmem:[#allocation8 + $0x108] sm:$0xff]  ;;  %v875_v28 = vpack.c.bf16 %v871_v10, %v871_v10  ;;  %v876_v29 = vpack.c.bf16 %v872_v12, %v872_v12 }
 0x127   : > { %1652 = vmatpush.bf16.msrb.mxu0 %v2590_v21  ;;  %v845_v21 = vsel %vm3357_vm2, %v3367_v25, 0.0  ;;  %v2202_v10 = vld [vmem:[%s3349_s16 + $0x31] sm:$0xff] }
 0x128   : > { %1690 = vmatpush.bf16.msrb.mxu2 %v2606_v19  ;;  %v2610_v19 = vld [vmem:[#allocation8 + $0x1d0] sm:$0xff]  ;;  %v849_v30 = vpack.c.bf16 %v845_v21, %v845_v21  ;;  %v967_v23 = vunpack.c.l.b16 %v875_v28  ;;  %v968_v35 = vunpack.c.l.b16 %v876_v29 }
 0x129   : > { %1671 = vmatpush.bf16.msrb.mxu1 %v2598_v27  ;;  %v846_v27 = vsel %vm3361_vm3, %v3393_v7, 0.0  ;;  %v2584_v7 = vld [vmem:[#allocation8 + $0x100] sm:$0xff]  ;;  %v2618_v12 = vld [vmem:[#allocation8 + $0x210] sm:$0xff] }
 0x12a   : > { %1709 = vmatpush.bf16.msrb.mxu3 %v2614_v32  ;;  %v850_v25 = vpack.c.bf16 %v846_v27, %v846_v27  ;;  %v888_v32 = vpack.c.bf16 %v884_v20, %v884_v20  ;;  %v971_v44 = vpack.c.b16 %v968_v35, %v967_v23  ;;  %v2630_v23 = vld [vmem:[#allocation9 + $0x30] sm:$0xff] }
 0x12b   : > { %1653 = vmatpush.bf16.msrb.mxu0 %v2589_v38 }
 0x12c   : > { %1691 = vmatpush.bf16.msrb.mxu2 %v2605_v37  ;;  %v955_v37 = vunpack.c.l.b16 %v849_v30  ;;  %v956_v38 = vunpack.c.l.b16 %v850_v25  ;;  %v3470_v42 = vunpack.c.l.b16 %v888_v32 }
 0x12d   : > { %1672 = vmatpush.bf16.msrb.mxu1 %v2597_v47  ;;  %v2622_v47 = vld [vmem:[#allocation8 + $0x230] sm:$0xff] }
 0x12e   : > { %1710 = vmatpush.bf16.msrb.mxu3 %v2613_v48  ;;  %v995_v45 = vpack.c.b16 %v3470_v42, %v3468_v41  ;;  %v959_v46 = vpack.c.b16 %v956_v38, %v955_v37  ;;  %v2197_v48 = vld [vmem:[%s3349_s16 + $0x2f] sm:$0xff] }
 0x12f   : > { %1654 = vmatpush.bf16.msrb.mxu0 %v2588_v50  ;;  %v2177_v50 = vld [vmem:[%s3349_s16 + $0x28] sm:$0xff]  ;;  %v874_v51 = vsel %vm3403_vm5, %v2197_v48, 0.0 }
 0x130   : > { %1692 = vmatpush.bf16.msrb.mxu2 %v2604_v49  ;;  %v2201_v49 = vld [vmem:[%s3349_s16 + $0x29] sm:$0xff]  ;;  %v844_v57 = vpack.c.bf16 %v2177_v50, %v2177_v50  ;;  %s2526_s16 = sshll.u32 %s3065_s19, 2  ;;  %s3640_s19 = sld [smem:[#allocation30_spill]] }
 0x131   : > { %1673 = vmatpush.bf16.msrb.mxu1 %v2596_v59  ;;  %v848_v54 = vsel %vm3414_vm7, %v2201_v49, 0.0  ;;  %v878_v59 = vpack.c.bf16 %v874_v51, %v874_v51  ;;  %v2629_v37 = vld [vmem:[#allocation9 + $0x28] sm:$0xff]  ;;  %v2624_v51 = vld [vmem:[#allocation9] sm:$0xff]  ;;  %s1906_s8 = sadd.s32 %s2527_s9, %s2526_s16 }
 0x132   : > { %1711 = vmatpush.bf16.msrb.mxu3 %v2612_v60  ;;  %1588 = vmatmul.bf16.gmra.mxu0 %v900_v0  ;;  %v851_v60 = vpack.c.bf16 %v847_v53, %v847_v53  ;;  %v852_v11 = vpack.c.bf16 %v848_v54, %v848_v54  ;;  %v2625_v48 = vld [vmem:[#allocation9 + $0x8] sm:$0xff]  ;;  %s2528_s29 = sshll.u32 %s1906_s8, 2 }
 0x133   : > { %1655 = vmatpush.bf16.msrb.mxu0 %v2587_v63  ;;  %1626 = vmatmul.bf16.gmra.mxu2 %v924_v1  ;;  %v969_v63 = vunpack.c.l.b16 %v877_v58  ;;  %v970_v0 = vunpack.c.l.b16 %v878_v59 }
 0x134   : > { %1693 = vmatpush.bf16.msrb.mxu2 %v2603_v62  ;;  %1607 = vmatmul.bf16.gmra.mxu1 %v3447_v2  ;;  %v946_v62 = vunpack.c.l.b16 %v844_v57  ;;  %v957_v1 = vunpack.c.l.b16 %v851_v60 }
 0x135   : > { %1645 = vmatmul.bf16.gmra.mxu3 %v936_v3  ;;  %1674 = vmatpush.bf16.msrb.mxu1 %v2595_v4  ;;  %v2619_v3 = vld [vmem:[#allocation8 + $0x218] sm:$0xff] }
 0x136   : > { %1712 = vmatpush.bf16.msrb.mxu3 %v2611_v5  ;;  %v948_v4 = vpack.c.b16 %v946_v62, %v3443_v56  ;;  %v972_v5 = vpack.c.b16 %v970_v0, %v969_v63  ;;  %v2617_v56 = vld [vmem:[#allocation8 + $0x208] sm:$0xff]  ;;  %s3641_s10 = smov %s3640_s19 }
 0x137   : > { %1656 = vmatpush.bf16.msrb.mxu0 %v2586_v9  ;;  %v984_v9 = vpack.c.b16 %v982_v8, %v946_v62 }
 0x138   : > { %1694 = vmatpush.bf16.msrb.mxu2 %v2602_v6 }
 0x139   : > { %1675 = vmatpush.bf16.msrb.mxu1 %v2594_v13  ;;  %v885_v13 = vsel %vm3410_vm6, %v2201_v49, 0.0 }
 0x13a   : > { %1713 = vmatpush.bf16.msrb.mxu3 %v2610_v19  ;;  %v886_v19 = vsel %vm3414_vm7, %v2202_v10, 0.0  ;;  %v889_v21 = vpack.c.bf16 %v885_v13, %v885_v13 }
 0x13b   : > { %1657 = vmatpush.bf16.msrb.mxu0 %v2585_v15  ;;  %v890_v27 = vpack.c.bf16 %v886_v19, %v886_v19 }
 0x13c   : > { %1695 = vmatpush.bf16.msrb.mxu2 %v2601_v26  ;;  %v993_v20 = vunpack.c.l.b16 %v889_v21 }
 0x13d   : > { %1676 = vmatpush.bf16.msrb.mxu1 %v2593_v33  ;;  %v994_v26 = vunpack.c.l.b16 %v890_v27 }
 0x13e   : > { %1714 = vmatpush.bf16.msrb.mxu3 %v2609_v34 }
 0x13f   : > { %1658 = vmatpush.bf16.msrb.mxu0 %v2584_v7  ;;  %v996_v15 = vpack.c.b16 %v994_v26, %v993_v20 }
 0x140   : > { %1696 = vmatpush.bf16.msrb.mxu2 %v2600_v22  ;;  %v2631_v22 = vld [vmem:[#allocation9 + $0x38] sm:$0xff] }
 0x141   : > { %1677 = vmatpush.bf16.msrb.mxu1 %v2592_v39 }
 0x142   : > { %1715 = vmatpush.bf16.msrb.mxu3 %v2608_v40  ;;  %1659 = vmatmul.bf16.vlgmr.msrb.gmra.mxu0 %v947_v43  ;;  %v2628_v40 = vld [vmem:[#allocation9 + $0x20] sm:$0xff]  ;;  %v2627_v43 = vld [vmem:[#allocation9 + $0x18] sm:$0xff] }
 0x143   : > { %1727 = vmatpush.bf16.msra.mxu0 %v2623_v36  ;;  %1697 = vmatmul.bf16.vlgmr.msrb.gmra.mxu2 %v971_v44 }
 0x144   : > { %2669 = vmatpush.bf16.msra.mxu2 %v2623_v36  ;;  %1678 = vmatmul.bf16.vlgmr.msrb.gmra.mxu1 %v959_v46  ;;  %v2626_v46 = vld [vmem:[#allocation9 + $0x10] sm:$0xff] }
 0x145   : > { %1716 = vmatmul.bf16.vlgmr.msrb.gmra.mxu3 %v3447_v2  ;;  %v958_v2 = vunpack.c.l.b16 %v852_v11  ;;  %1832 = vmatpush.bf16.msra.mxu1 %v2631_v22 }
 0x146   : > { %2677 = vmatpush.bf16.msra.mxu3 %v2631_v22 }
 0x147   : > { %1728 = vmatpush.bf16.msra.mxu0 %v2622_v47  ;;  %v960_v6 = vpack.c.b16 %v958_v2, %v957_v1 }
 0x148   : > { %2670 = vmatpush.bf16.msra.mxu2 %v2622_v47 }
 0x149   : > { %1833 = vmatpush.bf16.msra.mxu1 %v2630_v23 }
 0x14a   : > { %2678 = vmatpush.bf16.msra.mxu3 %v2630_v23 }
 0x14b   : > { %1729 = vmatpush.bf16.msra.mxu0 %v2621_v52 }
 0x14c   : > { %2671 = vmatpush.bf16.msra.mxu2 %v2621_v52 }
 0x14d   : > { %1834 = vmatpush.bf16.msra.mxu1 %v2629_v37 }
 0x14e   : > { %2679 = vmatpush.bf16.msra.mxu3 %v2629_v37 }
 0x14f   : > { %1730 = vmatpush.bf16.msra.mxu0 %v2620_v14 }
 0x150   : > { %2672 = vmatpush.bf16.msra.mxu2 %v2620_v14 }
 0x151   : > { %1835 = vmatpush.bf16.msra.mxu1 %v2628_v40 }
 0x152   : > { %1664 = vmatmul.bf16.gmra.mxu0 %v948_v4  ;;  %2680 = vmatpush.bf16.msra.mxu3 %v2628_v40 }
 0x153   : > { %1731 = vmatpush.bf16.msra.mxu0 %v2619_v3  ;;  %1702 = vmatmul.bf16.gmra.mxu2 %v972_v5 }
 0x154   : > { %2673 = vmatpush.bf16.msra.mxu2 %v2619_v3  ;;  %1683 = vmatmul.bf16.gmra.mxu1 %v960_v6 }
 0x155   : > { %1721 = vmatmul.bf16.gmra.mxu3 %v984_v9  ;;  %1836 = vmatpush.bf16.msra.mxu1 %v2627_v43 }
 0x156   : > { %2681 = vmatpush.bf16.msra.mxu3 %v2627_v43 }
 0x157   : > { %1732 = vmatpush.bf16.msra.mxu0 %v2618_v12 }
 0x158   : > { %2674 = vmatpush.bf16.msra.mxu2 %v2618_v12 }
 0x159   : > { %1837 = vmatpush.bf16.msra.mxu1 %v2626_v46 }
 0x15a   : > { %2682 = vmatpush.bf16.msra.mxu3 %v2626_v46 }
 0x15b   : > { %1733 = vmatpush.bf16.msra.mxu0 %v2617_v56 }
 0x15c   : > { %2675 = vmatpush.bf16.msra.mxu2 %v2617_v56 }
 0x15d   : > { %1838 = vmatpush.bf16.msra.mxu1 %v2625_v48 }
 0x15e   : > { %2683 = vmatpush.bf16.msra.mxu3 %v2625_v48 }
 0x15f   : > { %1734 = vmatpush.bf16.msra.mxu0 %v2616_v18 }
 0x160   : > { %2676 = vmatpush.bf16.msra.mxu2 %v2616_v18 }
 0x161   : > { %1839 = vmatpush.bf16.msra.mxu1 %v2624_v51 }
 0x162   : > { %1735 = vmatmul.bf16.vlgmr.msra.gmra.mxu0 %v995_v45  ;;  %2684 = vmatpush.bf16.msra.mxu3 %v2624_v51 }
 0x163   : > { %1740 = vmatmul.bf16.vlgmr.msra.gmra.mxu2 %v996_v15  ;;  %v2827_v15 = vld [vmem:[%s3635_s21] ss:$0 sm:$0xff] }
 0x19f   : > { %v1584_v16 = vpop.f32.mrf.mxu0 }
 0x1a1   : > { %v1603_v17 = vpop.f32.mrf.mxu1 }
 0x1a2   : > { %v1604_v50 = vadd.f32 %v1603_v17, %v1584_v16 }
 0x1a6   : > { %v1622_v28 = vpop.f32.mrf.mxu2 }
 0x1a7   : > { %v1586_v30 = vpop.f32.mrf.mxu0  ;;  %v1623_v54 = vadd.f32 %v1622_v28, %v1604_v50  ;;  %v2829_v50 = vld [vmem:[%s3637_s25] ss:$0 sm:$0xff]  ;;  %s1895_s25 = scalar_lea.sflag [#allocation5], %s441_s5 }
 0x1a8   : > { %v1641_v29 = vpop.f32.mrf.mxu3 }
 0x1a9   : > { %v1605_v25 = vpop.f32.mrf.mxu1  ;;  %v1642_v58 = vadd.f32 %v1641_v29, %v1623_v54 }
 0x1aa   : > { %v1606_v55 = vadd.f32 %v1605_v25, %v1586_v30 }
 0x1ae   : > { %v1624_v31 = vpop.f32.mrf.mxu2 }
 0x1af   : > { %v1589_v33 = vpop.f32.mrf.mxu0  ;;  %v1625_v11 = vadd.f32 %v1624_v31, %v1606_v55  ;;  %v2828_v31 = vld [vmem:[%s3636_s6] ss:$0 sm:$0xff]  ;;  %s1908_s6 = scalar_lea.hbm %s3640_s19, %s2528_s29 }
 0x1b0   : > { %v1643_v32 = vpop.f32.mrf.mxu3  ;;  %s1911_s30 = sshll.u32 %s1908_s6, 4  ;;  %s1912_s30 = int_to_ptr.hbm [resolvable:$true] %s1911_s30 }
 0x1b1   : > { %v1608_v34 = vpop.f32.mrf.mxu1  ;;  %v1644_v1 = vadd.f32 %v1643_v32, %v1625_v11  ;;  %s2965_s24 = sshra.s32 %s1912_s30, 4  ;;  %s2966_s24 = int_to_ptr.hbm [resolvable:$true] %s2965_s24 }
 0x1b2   : > { %v1609_v57 = vadd.f32 %v1608_v34, %v1589_v33  ;;  %p2972_p2 = scmp.lt.s32.totalorder %s2966_s24, %s3641_s10 }
 0x1b6   : > { %v1627_v7 = vpop.f32.mrf.mxu2 }
 0x1b7   : > { %v1591_v35 = vpop.f32.mrf.mxu0  ;;  %v1628_v24 = vadd.f32 %v1627_v7, %v1609_v57 }
 0x1b8   : > { %v1646_v36 = vpop.f32.mrf.mxu3 }
 0x1b9   : > { %v1610_v38 = vpop.f32.mrf.mxu1  ;;  %v1647_v2 = vadd.f32 %v1646_v36, %v1628_v24 }
 0x1ba   : > { %v1611_v63 = vadd.f32 %v1610_v38, %v1591_v35 }
 0x1be   : > { %v1629_v39 = vpop.f32.mrf.mxu2 }
 0x1bf   : > { %v1660_v41 = vpop.f32.mrf.mxu0  ;;  %v1630_v3 = vadd.f32 %v1629_v39, %v1611_v63 }
 0x1c0   : > { %v1648_v42 = vpop.f32.mrf.mxu3  ;;  %v1661_v14 = vadd.f32 %v1660_v41, %v1642_v58 }
 0x1c1   : > { %v1679_v44 = vpop.f32.mrf.mxu1  ;;  %v1649_v13 = vadd.f32 %v1648_v42, %v1630_v3 }
 0x1c2   : > { %v1680_v8 = vadd.f32 %v1679_v44, %v1661_v14 }
 0x1c6   : > { %v1698_v45 = vpop.f32.mrf.mxu2 }
 0x1c7   : > { %v1662_v47 = vpop.f32.mrf.mxu0  ;;  %v1699_v4 = vadd.f32 %v1698_v45, %v1680_v8 }
 0x1c8   : > { %v1717_v49 = vpop.f32.mrf.mxu3  ;;  %v1663_v5 = vadd.f32 %v1662_v47, %v1644_v1  ;;  %v2651_v1 = vld [vmem:[%s1869_s4 + $0x8] sm:$0xff]  }
 0x1c9   : > { %v1681_v52 = vpop.f32.mrf.mxu1  ;;  %v1718_v19 = vadd.f32 %v1717_v49, %v1699_v4  ;;  %v2639_v3 = vunpack.c.l.bf16 %v2651_v1 }
 0x1ca   : > { %v1682_v56 = vadd.f32 %v1681_v52, %v1663_v5  ;;  %v2830_v52 = vld [vmem:[%s3639_s28] ss:$0 sm:$0xff]  ;;  %s2971_s28 = scalar_lea.hbm %s3641_s10, 64 }
 0x1ce   : > { %v1700_v61 = vpop.f32.mrf.mxu2 }
 0x1cf   : > { %v1665_v53 = vpop.f32.mrf.mxu0  ;;  %v1701_v27 = vadd.f32 %v1700_v61, %v1682_v56 }
 0x1d0   : > { %v1719_v59 = vpop.f32.mrf.mxu3  ;;  %v1666_v6 = vadd.f32 %v1665_v53, %v1647_v2  ;;  %v2634_v53 = vld [vmem:[%s1869_s4] sm:$0xff]   ;;  %s2967_s4 = scalar_lea.hbm %s2966_s24, 16 }
 0x1d1   : > { %v1684_v0 = vpop.f32.mrf.mxu1  ;;  %v1720_v28 = vadd.f32 %v1719_v59, %v1701_v27  ;;  %v2635_v55 = vunpack.c.l.bf16 %v2634_v53  ;;  %v2636_v59 = vunpack.c.h.bf16 %v2634_v53  ;;  %p2968_p1 = scmp.ne.s32.totalorder %s2966_s24, %s2967_s4  ;;  %p2973_p3 = scmp.lt.s32.totalorder %s2971_s28, %s2967_s4 }
 0x1d2   : > { %v1685_v21 = vadd.f32 %v1684_v0, %v1666_v6  ;;  %v2640_v6 = vunpack.c.h.bf16 %v2651_v1 }
 0x1d3   : > { %p2969_p11 = pnand %p2968_p1, %p3216_p6  ;;  %p2974_p5 = por %p2973_p3, %p2972_p2 }
 0x1d5   : > { %p2970_p0 = pneg %p2969_p11 }
 0x1d6   : > { %v1703_v60 = vpop.f32.mrf.mxu2 }
 0x1d7   : > { %v1667_v62 = vpop.f32.mrf.mxu0  ;;  %v1704_v18 = vadd.f32 %v1703_v60, %v1685_v21  ;;  %p2975_p7 = pnand %p2974_p5, %p2970_p0 }
 0x1d8   : > { %v1722_v10 = vpop.f32.mrf.mxu3  ;;  %v1668_v20 = vadd.f32 %v1667_v62, %v1649_v13 }
 0x1d9   : > { %v1686_v16 = vpop.f32.mrf.mxu1  ;;  %v1723_v29 = vadd.f32 %v1722_v10, %v1704_v18 }
 0x1da   : > { %v1687_v30 = vadd.f32 %v1686_v16, %v1668_v20 }
 0x1de   : > { %v1705_v9 = vpop.f32.mrf.mxu2 }
 0x1df   : > { %v1736_v12 = vpop.f32.mrf.mxu0  ;;  %v1706_v33 = vadd.f32 %v1705_v9, %v1687_v30 }
 0x1e0   : > { %v1737_v26 = vadd.f32 %v1736_v12, %v1718_v19  ;;  %v1724_v7 = vpop.f32.mrf.mxu3 }
 0x1e1   : > { %v1725_v36 = vadd.f32 %v1724_v7, %v1706_v33 }
 0x1e2   : > { %v1750_v25 = vmul.f32 %v2827_v15, %v1737_v26 }
 0x1e4   : > { %v1758_v23 = vadd.f32 %v2828_v31, %v1750_v25 }
 0x1e6   : > { %v1741_v17 = vpop.f32.mrf.mxu2  ;;  %v1762_v40 = vmax.f32 %v1758_v23, 0.0 }
 0x1e7   : > { %v1738_v32 = vpop.f32.mrf.mxu0  ;;  %v1742_v34 = vadd.f32 %v1741_v17, %v1723_v29 }
 0x1e8   : > { %v1739_v22 = vadd.f32 %v1738_v32, %v1720_v28 }
 0x1e9   : > { %v1752_v37 = vmul.f32 %v2827_v15, %v1742_v34 }
 0x1ea   : > { %v1751_v35 = vmul.f32 %v2827_v15, %v1739_v22 }
 0x1eb   : > { %v1760_v43 = vadd.f32 %v2828_v31, %v1752_v37 }
 0x1ec   : > { %v1759_v38 = vadd.f32 %v2828_v31, %v1751_v35 }
 0x1ed   : > { %v1764_v47 = vmax.f32 %v1760_v43, 0.0 }
 0x1ee   : > { %v1743_v39 = vpop.f32.mrf.mxu2  ;;  %v1763_v41 = vmax.f32 %v1759_v38, 0.0 }
 0x1ef   : > { %v1744_v42 = vadd.f32 %v1743_v39, %v1725_v36 }
 0x1f0   : > { %v1766_v44 = vpack.c.bf16 %v1763_v41, %v1762_v40 }
 0x1f1   : > { %v1753_v45 = vmul.f32 %v2827_v15, %v1744_v42 }
 0x1f2   : > { %1840 = vmatmul.bf16.vlgmr.msra.gmra.mxu1 %v1766_v44 }
 0x1f3   : > { %v1761_v46 = vadd.f32 %v2828_v31, %v1753_v45 }
 0x1f5   : > { %v1765_v48 = vmax.f32 %v1761_v46, 0.0 }
 0x1f7   : > { %v1767_v49 = vpack.c.bf16 %v1765_v48, %v1764_v47 }
 0x1f9   : > { %1845 = vmatmul.bf16.vlgmr.msra.gmra.mxu3 %v1767_v49 }
 0x26f   : > { %v1841_v61 = vpop.f32.mrf.mxu1 }
 0x270   : > { %v1855_v51 = vmul.f32 %v2829_v50, %v1841_v61 }
 0x272   : > { %v1863_v54 = vadd.f32 %v2830_v52, %v1855_v51 }
 0x274   : > { %v1878_v60 = vadd.f32 %v2635_v55, %v1863_v54 }
 0x276   : > { %v1882_v62 = vmax.f32 %v1878_v60, 0.0 }
 0x277   : > { %v1843_v57 = vpop.f32.mrf.mxu1 }
 0x278   : > { %v1856_v58 = vmul.f32 %v2829_v50, %v1843_v57 }
 0x27a   : > { %v1864_v11 = vadd.f32 %v2830_v52, %v1856_v58 }
 0x27c   : > { %v1846_v24 = vpop.f32.mrf.mxu3  ;;  %v1879_v14 = vadd.f32 %v2636_v59, %v1864_v11 }
 0x27d   : > { %v1857_v0 = vmul.f32 %v2829_v50, %v1846_v24 }
 0x27e   : > { %v1883_v63 = vmax.f32 %v1879_v14, 0.0 }
 0x27f   : > { %v1865_v8 = vadd.f32 %v2830_v52, %v1857_v0 }
 0x280   : > { %v2644_v2 = vpack.c.bf16 %v1883_v63, %v1882_v62 }
 0x281   : > { %v1880_v9 = vadd.f32 %v2639_v3, %v1865_v8 }
 0x282   : > { %2645 = vst [vmem:[%s3321_s20] sm:$0xff] %v2644_v2  }
 0x283   : > { %v1884_v13 = vmax.f32 %v1880_v9, 0.0 }
 0x284   : > { %v1848_v4 = vpop.f32.mrf.mxu3 }
 0x285   : > { %v1858_v5 = vmul.f32 %v2829_v50, %v1848_v4 }
 0x287   : > { %v1866_v10 = vadd.f32 %v2830_v52, %v1858_v5 }
 0x289   : > { %v1881_v12 = vadd.f32 %v2640_v6, %v1866_v10 }
 0x28b   : > { %v1885_v19 = vmax.f32 %v1881_v12, 0.0 }
 0x28d   : > { %v2649_v56 = vpack.c.bf16 %v1885_v19, %v1884_v13 }
 0x28f   : > { %2652 = vst [vmem:[%s3321_s20 + $0x8] sm:$0xff] %v2649_v56  }
 0x290   : > { %2978 = shalt.err (!%p2975_p7)
}
 0x291   : > { %s3089_s5 = smov 64   ;;  %s3090_s20 = smov 4  }
 0x292   : > { %2699 = dma.vmem_to_hbm [thread:$0]  (%p3216_p6), %s1910_s27, 256, %s1912_s30, %s1895_s25, %s3089_s5, %s3089_s5, %s3090_s20  }
 0x293 PF: > { %s3643_s8 = sld [smem:[#allocation16_spill]]  ;;  %p2726_p8 = scmp.ge.s32.totalorder %s3081_s23, 2 }
 0x295   : > { %p2716_p9 = pnand %p2726_p8, %p3222_p10 }
 0x297   : > { %p2717_p12 = pneg %p2716_p9 }
 0x299   : > { %s1926_s21 = sand.u32 1, %s3643_s8  }
 0x29a   : > { %s1927_s12 = scalar_lea.sflag [#allocation5], %s1926_s21 }
 0x29b   : > { %3036 = dma.done.wait (%p2717_p12), %s1927_s12, 256  }
 0x29c   : > { %3038 = vsyncadd (%p2717_p12), %s1927_s12, 4294967040  ;;  %s28_s23 = sadd.s32 1, %s3081_s23   ;;  %s3645_s19 = sld [smem:[#allocation18_spill]] }
 0x29d   : > { %p25_p13 = scmp.ge.s32.totalorder %s28_s23, 6   ;;  %s3646_s21 = sld [smem:[#allocation21_spill]] }
 0x29e   : > { %s3647_s6 = sld [smem:[#allocation22_spill]]  ;;  %s3648_s13 = smov %s3045_s14 }
 0x29f   : > { %s3649_s14 = smov %s3049_s15  ;;  %s3650_s15 = smov %s3289_s7 }
 0x2a0   : > { %s3651_s16 = smov %s3057_s17  ;;  %s3652_s17 = smov %s3061_s18 }
 0x2a1   : > { %s3653_s18 = smov %s3286_s1  ;;  %s3654_s20 = smov %s3077_s22 }
 0x2a2   :  { %27 = sbr.rel (!%p25_p13) target bundleno = 20 (0x14), region = 132 }
 0x2a4   : > { %s3655_s22 = smov %s3647_s6 }
 0x2a7   :  { %1933 = vsyncpa [#allocation4], 1 }
 0x2a8   :  { %1935 = vsyncpa [#allocation4 + $0x1], 1 }
 0x2a9   :  { %1936 = vsyncpa [#allocation7], 1 }
 0x2aa   :  { %1937 = vsyncpa [#allocation10], 1 }
 0x2ab   :  { %1938 = vsyncpa [#allocation5], 1 }
 0x2ac   :  { %1940 = vsyncpa [#allocation5 + $0x1], 1 }

// kernel: tpu_custom_call.1
= control target key start
LH: loop header
LB: loop body
LE: loop exit
PB: predicated region body
PF: predicated region fallthrough
CT: control target
= control target key end

     0   :  { %s3571_s0 = inlined_call_operand.hbm [shape: bf16[2,2,32,128], index: 0, kind: input, shape index: {}]   ;;  %s3572_s1 = inlined_call_operand.hbm [shape: bf16[128,128], index: 1, kind: input, shape index: {}]   ;;  %s3573_s2 = inlined_call_operand.vmem [shape: f32[1,128], index: 2, kind: input, shape index: {}]   ;;  %s3574_s3 = inlined_call_operand.vmem [shape: f32[1,128], index: 3, kind: input, shape index: {}]   ;;  %s3575_s4 = inlined_call_operand.hbm [shape: bf16[1152,128], index: 4, kind: input, shape index: {}]   ;;  %s3576_s5 = inlined_call_operand.vmem [shape: f32[1,128], index: 5, kind: input, shape index: {}]   ;;  %s3577_s6 = inlined_call_operand.vmem [shape: f32[1,128], index: 6, kind: input, shape index: {}]   ;;  %s3578_s7 = inlined_call_operand.hbm [shape: bf16[128,128], index: 7, kind: input, shape index: {}]   ;;  %s3579_s8 = inlined_call_operand.vmem [shape: f32[1,128], index: 8, kind: input, shape index: {}]   ;;  %s3580_s9 = inlined_call_operand.vmem [shape: f32[1,128], index: 9, kind: input, shape index: {}]   ;;  %s3581_s10 = inlined_call_operand.hbm [shape: bf16[2,2,32,128], index: 10, kind: output, shape index: {}]  }
   0x1   :  { %3592 = sst [smem:[#allocation23_spill]] %s3572_s1 }
   0x2   :  { %3593 = sst [smem:[#allocation24_spill]] %s3575_s4 }
   0x3   :  { %3594 = sst [smem:[#allocation25_spill]] %s3576_s5 }
   0x4   :  { %3595 = sst [smem:[#allocation26_spill]] %s3577_s6 }
   0x5   :  { %3596 = sst [smem:[#allocation27_spill]] %s3578_s7 }
   0x6   :  { %3597 = sst [smem:[#allocation28_spill]] %s3579_s8 }
   0x7   :  { %3598 = sst [smem:[#allocation29_spill]] %s3580_s9 }
   0x8   :  { %3599 = sst [smem:[#allocation30_spill]] %s3581_s10 }
   0x9   :  { %15 = vsyncpa [#allocation4], 0 }
   0xa   :  { %17 = vsyncpa [#allocation4 + $0x1], 0 }
   0xb   :  { %18 = vsyncpa [#allocation7], 0 }
   0xc   :  { %19 = vsyncpa [#allocation10], 0 }
   0xd   :  { %20 = vsyncpa [#allocation5], 0 }
   0xe   :  { %22 = vsyncpa [#allocation5 + $0x1], 0  ;;  %s3146_s13 = smov 0   ;;  %s3148_s14 = smov 0  }
   0xf   :  { %s3150_s15 = smov 0   ;;  %s3152_s16 = smov 0  }
  0x10   :  { %s3154_s17 = smov 0   ;;  %s3156_s18 = smov 0  }
  0x11   :  { %s3158_s19 = smov 0   ;;  %s3160_s20 = smov 0  }
  0x12   :  { %s3162_s21 = smov 0   ;;  %s3164_s22 = smov 0  }
  0x13   :  { %s3166_s23 = smov 0  }
  0x14 LB: > { %3600 = sst [smem:[#allocation16_spill]] %s3041_s13  ;;  %s2057_s24 = sadd.s32 4294967295, %s3081_s23   ;;  %s3081_s23 = sphi %s3166_s23, %s28_s23   ;;  %s3077_s22 = sphi %s3164_s22, %s3655_s22   ;;  %s3073_s21 = sphi %s3162_s21, %s3646_s21   ;;  %s3069_s20 = sphi %s3160_s20, %s3654_s20   ;;  %s3065_s19 = sphi %s3158_s19, %s3645_s19   ;;  %s3061_s18 = sphi %s3156_s18, %s3653_s18   ;;  %s3057_s17 = sphi %s3154_s17, %s3652_s17   ;;  %s3053_s16 = sphi %s3152_s16, %s3651_s16   ;;  %s3049_s15 = sphi %s3150_s15, %s3650_s15   ;;  %s3045_s14 = sphi %s3148_s14, %s3649_s14   ;;  %s3041_s13 = sphi %s3146_s13, %s3648_s13  }
  0x15   : > { %3601 = sst [smem:[#allocation17_spill]] %s3069_s20  ;;  %s2058_s25 = sadd.s32 4294967294, %s3081_s23  }
  0x16   : > { %3602 = sst [smem:[#allocation18_spill]] %s3073_s21  ;;  %p60_p0 = scmp.ne.s32.totalorder %s3057_s17, %s3053_s16 }
  0x17   : > { %p3202_p1 = scmp.eq.s32.totalorder %s2057_s24, 0  ;;  %p274_p2 = scmp.ne.s32.totalorder %s3049_s15, %s3045_s14 }
  0x18   : > { %p275_p3 = scmp.eq.s32.totalorder %s2057_s24, 3  ;;  %p280_p5 = scmp.ne.s32.totalorder %s3045_s14, %s3041_s13 }
  0x19   : > { %p3210_p4 = por %p3202_p1, %p60_p0  ;;  %p281_p7 = scmp.eq.s32.totalorder %s2058_s25, 3 }
  0x1a   : > { %p3216_p6 = por %p275_p3, %p274_p2  ;;  %p2059_p8 = scmp.ge.s32.totalorder %s3081_s23, 1 }
  0x1b   : > { %p288_p9 = scmp.lt.s32.totalorder %s3081_s23, 5  ;;  %p3222_p10 = por %p281_p7, %p280_p5 }
  0x1c   : > { %s3605_s28 = scalar_select %p3216_p6, 1, 0 }
  0x1d   : > { %s3607_s29 = scalar_select %p3222_p10, 1, 0 }
  0x1e   : > { %3606 = sst [smem:[#allocation19_spill]] %s3605_s28  ;;  %p3226_p11 = pnand %p2059_p8, %p288_p9 }
  0x1f   : > { %3608 = sst [smem:[#allocation20_spill]] %s3607_s29  ;;  %s3083_s24 = smov [#allocation6]  }
  0x20   : > { %s3610_s1 = sld [smem:[#allocation23_spill]]  ;;  %p2701_p12 = pneg %p3226_p11 }
  0x21   : > { %s301_s25 = sshll.u32 %s3083_s24, 4  ;;  %s3612_s4 = sld [smem:[#allocation24_spill]]  ;;  %s302_s25 = int_to_ptr.vmem [resolvable:$true] %s301_s25 }
  0x22   : > { %p3237_p13 = pnand %p2701_p12, %p3202_p1  ;;  %s3587_s12 = smov 64  }
  0x23   : > { %s3613_s7 = sld [smem:[#allocation27_spill]]  ;;  %s3086_s29 = smov [#allocation8]  }
  0x24   : > { %s3087_s9 = smov [#allocation9]   ;;  %s37_s10 = sadd.s32 1, %s3073_s21 }
  0x25   : > { %p38_p0 = scmp.ge.s32.totalorder %s37_s10, 2  ;;  %s47_s24 = sadd.s32 1, %s3061_s18 }
  0x26   : > { %s299_s16 = sshll.u32 %s3610_s1, 4  ;;  %s3588_s1 = smov 4   ;;  %s300_s16 = int_to_ptr.hbm [resolvable:$true] %s299_s16 }
  0x27   : > { %s319_s11 = sshll.u32 %s3612_s4, 4  ;;  %s321_s4 = sshll.u32 %s3086_s29, 4  ;;  %s320_s11 = int_to_ptr.hbm [resolvable:$true] %s319_s11  ;;  %s322_s4 = int_to_ptr.vmem [resolvable:$true] %s321_s4 }
  0x28   : > { %2704 = dma.hbm_to_vmem [thread:$0]  (!%p3237_p13), %s300_s16, 1024, %s302_s25, [#allocation7], %s3587_s12, %s3587_s12, %s3588_s1  }
  0x29   : > { %s339_s28 = sshll.u32 %s3613_s7, 4  ;;  %s341_s16 = sshll.u32 %s3087_s9, 4  ;;  %s340_s28 = int_to_ptr.hbm [resolvable:$true] %s339_s28  ;;  %s342_s16 = int_to_ptr.vmem [resolvable:$true] %s341_s16 }
  0x2a   : > { %2707 = dma.hbm_to_vmem [thread:$0]  (!%p3237_p13), %s320_s11, 9216, %s322_s4, [#allocation7], %s3587_s12, %s3587_s12, %s3588_s1  }
  0x2b   : > { %2710 = dma.hbm_to_vmem [thread:$0]  (!%p3237_p13), %s340_s28, 1024, %s342_s16, [#allocation10], %s3587_s12, %s3587_s12, %s3588_s1  }
  0x2c   : > { %s40_s25 = sadd.s32 1, %s3077_s22  ;;  %p54_p2 = scmp.ne.s32.totalorder %s3061_s18, %s3057_s17 }
  0x2d   : > { %p55_p3 = scmp.eq.s32.totalorder %s3081_s23, 0  ;;  %s3657_s10 = smov (%p38_p0, %s37_s10), 0 }
  0x2e   : > { %3614 = sst [smem:[#allocation21_spill]] %s3657_s10  ;;  %s3659_s25 = smov (!%p38_p0, %s40_s25), %s3077_s22 }
  0x2f   : > { %p3271_p5 = por %p55_p3, %p54_p2  ;;  %s260_s9 = ssub.s32 %s3073_s21, %s3657_s10 }
  0x30   : > { %p42_p7 = scmp.ge.s32.totalorder %s3659_s25, 2  ;;  %s264_s13 = sadd.s32 1, %s3049_s15 }
  0x31   : > { %p2722_p8 = scmp.lt.s32.totalorder %s3081_s23, 4  ;;  %s361_s11 = sand.u32 1, %s3061_s18  }
  0x32   : > { %s3661_s25 = smov (%p42_p7, %s3659_s25), 0  ;;  %s2064_s28 = sshll.u32 %s361_s11, 5 }
  0x33   : > { %3616 = sst [smem:[#allocation22_spill]] %s3661_s25  ;;  %s44_s29 = ssub.s32 %s3077_s22, %s3661_s25 }
  0x34   : > { %p45_p9 = scmp.eq.s32.totalorder %s44_s29, 0  ;;  %s261_s16 = sor.u32 %s260_s9, %s44_s29 }
  0x35   : > { %p262_p12 = scmp.eq.s32.totalorder %s261_s16, 0  ;;  %s2531_s12 = sshll.u32 %s3077_s22, 5 }
  0x36   : > { %s3286_s1 = scalar_select %p45_p9, %s3061_s18, %s47_s24  }
  0x37   : > { %s3289_s7 = scalar_select %p262_p12, %s3049_s15, %s264_s13  }
  0x38   : > { %s370_s20 = scalar_lea.hbm %s3571_s0, %s2531_s12  ;;  %s365_s8 = scalar_lea.vmem [#allocation3], %s2064_s28 }
  0x39   : > { %s373_s6 = sshll.u32 %s365_s8, 4  ;;  %s371_s5 = sshll.u32 %s370_s20, 4  ;;  %s374_s6 = int_to_ptr.vmem [resolvable:$true] %s373_s6  ;;  %s372_s5 = int_to_ptr.hbm [resolvable:$true] %s371_s5 }
  0x3a   : > { %p2712_p13 = pnand %p2722_p8, %p3271_p5  ;;  %s362_s25 = scalar_lea.sflag [#allocation4], %s361_s11 }
  0x3b   : > { %s3617_s9 = smov 4   ;;  %s3618_s29 = smov 64  }
  0x3c   : > { %2714 = dma.hbm_to_vmem [thread:$0]  (!%p2712_p13), %s372_s5, 512, %s374_s6, %s362_s25, %s3618_s29, %s3618_s29, %s3617_s9  }
  0x3d   : > { %385 = sbr.rel (%p3226_p11) target bundleno = 659 (0x293), region = 60  ;;  %s387_s21 = sand.u32 (!%p3226_p11), 1, %s3057_s17  }
  0x3e   : > { %s2068_s12 = sshll.u32 (!%p3226_p11), %s387_s21, 5  ;;  %s388_s10 = scalar_lea.sflag (!%p3226_p11), [#allocation4], %s387_s21 }
  0x3f   : > { %s3304_s8 = scalar_lea.vmem (!%p3226_p11), [#allocation3], %s2068_s12 }
  0x42   : > { %3024 = dma.done.wait (%p3210_p4), %s388_s10, 512  }
  0x43   : > { %3026 = vsyncadd (%p3210_p4), %s388_s10, 4294966784 }
  0x44   : > { %3028 = dma.done.wait (%p3202_p1), [#allocation7], 10240  }
  0x45   : > { %3030 = vsyncadd (%p3202_p1), [#allocation7], 4294957056 }
  0x46   : > { %3032 = dma.done.wait (%p3202_p1), [#allocation10], 1024  }
  0x47   : > { %3034 = vsyncadd (%p3202_p1), [#allocation10], 4294966272  ;;  %s441_s5 = sand.u32 1, %s3045_s14   ;;  %p2073_p4 = scmp.ne.s32.totalorder %s3065_s19, 0 }
  0x48   : > { %s2072_s6 = sshll.u32 %s441_s5, 4 }
  0x49   : > { %s3321_s20 = scalar_lea.vmem [#allocation11], %s2072_s6  ;;  %447 = sbr.rel (%p2073_p4) target bundleno = 258 (0x102), region = 80 }
  0x4e   : > { %v2541_v0 = vld [vmem:[#allocation6 + $0x38] sm:$0xff]  ;;  %v3088_v2 = vmov 0.0   ;;  %v2540_v3 = vld [vmem:[#allocation6 + $0x30] sm:$0xff]  ;;  %v2539_v5 = vld [vmem:[#allocation6 + $0x28] sm:$0xff] }
  0x4f   : > { %v2551_v1 = vld [vmem:[#allocation6 + $0x38] sm:$0xff]  ;;  %448 = vst [vmem:[#allocation2] sm:$0xff] %v3088_v2  ;;  %532 = vmatpush.bf16.msra.mxu0 %v2541_v0  ;;  %2653 = vmatpush.bf16.msra.mxu2 %v2541_v0  ;;  %v2550_v4 = vld [vmem:[#allocation6 + $0x30] sm:$0xff]  ;;  %v2549_v6 = vld [vmem:[#allocation6 + $0x28] sm:$0xff] }
  0x50   : > { %449 = vst [vmem:[#allocation2 + $0x8] sm:$0xff] %v3088_v2  ;;  %656 = vmatpush.bf16.msra.mxu1 %v2551_v1  ;;  %2661 = vmatpush.bf16.msra.mxu3 %v2551_v1  ;;  %v2538_v7 = vld [vmem:[#allocation6 + $0x20] sm:$0xff]  ;;  %v2537_v9 = vld [vmem:[#allocation6 + $0x18] sm:$0xff]  ;;  %v2536_v11 = vld [vmem:[#allocation6 + $0x10] sm:$0xff] }
  0x51   : > { %450 = vst [vmem:[#allocation2 + $0x50] sm:$0xff] %v3088_v2  ;;  %v2548_v8 = vld [vmem:[#allocation6 + $0x20] sm:$0xff]  ;;  %v2547_v10 = vld [vmem:[#allocation6 + $0x18] sm:$0xff]  ;;  %v2546_v12 = vld [vmem:[#allocation6 + $0x10] sm:$0xff] }
  0x52   : > { %451 = vst [vmem:[#allocation2 + $0x58] sm:$0xff] %v3088_v2  ;;  %v2535_v13 = vld [vmem:[#allocation6 + $0x8] sm:$0xff]  ;;  %v2534_v15 = vld [vmem:[#allocation6] sm:$0xff]  ;;  %v2542_v19 = vld [vmem:[%s3304_s8 + $0x10] sm:$0xff] }
  0x53   : > { %533 = vmatpush.bf16.msra.mxu0 %v2540_v3  ;;  %2654 = vmatpush.bf16.msra.mxu2 %v2540_v3  ;;  %v2545_v14 = vld [vmem:[#allocation6 + $0x8] sm:$0xff]  ;;  %v2544_v16 = vld [vmem:[#allocation6] sm:$0xff]  ;;  %v2543_v20 = vld [vmem:[%s3304_s8 + $0x18] sm:$0xff] }
  0x54   : > { %657 = vmatpush.bf16.msra.mxu1 %v2550_v4  ;;  %2662 = vmatpush.bf16.msra.mxu3 %v2550_v4  ;;  %v2532_v17 = vld [vmem:[%s3304_s8] sm:$0xff]  ;;  %v2533_v18 = vld [vmem:[%s3304_s8 + $0x8] sm:$0xff] }
  0x55   : > { %v2823_v21 = vld [vmem:[%s3573_s2] ss:$0 sm:$0xff] }
  0x56   : > { %v2825_v22 = vld [vmem:[%s3573_s2] ss:$0 sm:$0xff] }
  0x57   : > { %534 = vmatpush.bf16.msra.mxu0 %v2539_v5  ;;  %2655 = vmatpush.bf16.msra.mxu2 %v2539_v5  ;;  %v2824_v23 = vld [vmem:[%s3574_s3] ss:$0 sm:$0xff] }
  0x58   : > { %658 = vmatpush.bf16.msra.mxu1 %v2549_v6  ;;  %2663 = vmatpush.bf16.msra.mxu3 %v2549_v6  ;;  %v2826_v25 = vld [vmem:[%s3574_s3] ss:$0 sm:$0xff] }
  0x5b   : > { %535 = vmatpush.bf16.msra.mxu0 %v2538_v7  ;;  %2656 = vmatpush.bf16.msra.mxu2 %v2538_v7 }
  0x5c   : > { %659 = vmatpush.bf16.msra.mxu1 %v2548_v8  ;;  %2664 = vmatpush.bf16.msra.mxu3 %v2548_v8 }
  0x5f   : > { %536 = vmatpush.bf16.msra.mxu0 %v2537_v9  ;;  %2657 = vmatpush.bf16.msra.mxu2 %v2537_v9 }
  0x60   : > { %660 = vmatpush.bf16.msra.mxu1 %v2547_v10  ;;  %2665 = vmatpush.bf16.msra.mxu3 %v2547_v10 }
  0x63   : > { %537 = vmatpush.bf16.msra.mxu0 %v2536_v11  ;;  %2658 = vmatpush.bf16.msra.mxu2 %v2536_v11 }
  0x64   : > { %661 = vmatpush.bf16.msra.mxu1 %v2546_v12  ;;  %2666 = vmatpush.bf16.msra.mxu3 %v2546_v12 }
  0x67   : > { %538 = vmatpush.bf16.msra.mxu0 %v2535_v13  ;;  %2659 = vmatpush.bf16.msra.mxu2 %v2535_v13 }
  0x68   : > { %662 = vmatpush.bf16.msra.mxu1 %v2545_v14  ;;  %2667 = vmatpush.bf16.msra.mxu3 %v2545_v14 }
  0x6b   : > { %539 = vmatpush.bf16.msra.mxu0 %v2534_v15  ;;  %2660 = vmatpush.bf16.msra.mxu2 %v2534_v15 }
  0x6c   : > { %663 = vmatpush.bf16.msra.mxu1 %v2544_v16  ;;  %2668 = vmatpush.bf16.msra.mxu3 %v2544_v16 }
  0x6e   : > { %540 = vmatmul.bf16.vlgmr.msra.gmra.mxu0 %v2532_v17  ;;  %545 = vmatmul.bf16.vlgmr.msra.gmra.mxu2 %v2533_v18 }
  0x6f   : > { %664 = vmatmul.bf16.vlgmr.msra.gmra.mxu1 %v2542_v19  ;;  %669 = vmatmul.bf16.vlgmr.msra.gmra.mxu3 %v2543_v20 }
  0xeb   : > { %v541_v24 = vpop.f32.mrf.mxu0 }
  0xec   : > { %v555_v26 = vmul.f32 %v2823_v21, %v541_v24  ;;  %v665_v27 = vpop.f32.mrf.mxu1 }
  0xed   : > { %v679_v28 = vmul.f32 %v2825_v22, %v665_v27 }
  0xee   : > { %v563_v29 = vadd.f32 %v2824_v23, %v555_v26 }
  0xef   : > { %v687_v30 = vadd.f32 %v2826_v25, %v679_v28 }
  0xf0   : > { %v567_v31 = vmax.f32 %v563_v29, 0.0 }
  0xf1   : > { %v691_v32 = vmax.f32 %v687_v30, 0.0  ;;  %v546_v33 = vpop.f32.mrf.mxu2 }
  0xf2   : > { %571 = vst [vmem:[#allocation2 + $0x10] sm:$0xff] %v567_v31  ;;  %v557_v34 = vmul.f32 %v2823_v21, %v546_v33  ;;  %v670_v35 = vpop.f32.mrf.mxu3 }
  0xf3   : > { %695 = vst [vmem:[#allocation2 + $0x30] sm:$0xff] %v691_v32  ;;  %v681_v36 = vmul.f32 %v2825_v22, %v670_v35  ;;  %v543_v37 = vpop.f32.mrf.mxu0 }
  0xf4   : > { %v565_v38 = vadd.f32 %v2824_v23, %v557_v34  ;;  %v556_v39 = vmul.f32 %v2823_v21, %v543_v37  ;;  %v667_v40 = vpop.f32.mrf.mxu1 }
  0xf5   : > { %v689_v41 = vadd.f32 %v2826_v25, %v681_v36  ;;  %v680_v42 = vmul.f32 %v2825_v22, %v667_v40 }
  0xf6   : > { %v569_v43 = vmax.f32 %v565_v38, 0.0  ;;  %v564_v44 = vadd.f32 %v2824_v23, %v556_v39 }
  0xf7   : > { %v693_v45 = vmax.f32 %v689_v41, 0.0  ;;  %v688_v46 = vadd.f32 %v2826_v25, %v680_v42 }
  0xf8   : > { %573 = vst [vmem:[#allocation2 + $0x20] sm:$0xff] %v569_v43  ;;  %v568_v47 = vmax.f32 %v564_v44, 0.0 }
  0xf9   : > { %697 = vst [vmem:[#allocation2 + $0x40] sm:$0xff] %v693_v45  ;;  %v692_v48 = vmax.f32 %v688_v46, 0.0  ;;  %v548_v49 = vpop.f32.mrf.mxu2 }
  0xfa   : > { %572 = vst [vmem:[#allocation2 + $0x18] sm:$0xff] %v568_v47  ;;  %v558_v50 = vmul.f32 %v2823_v21, %v548_v49  ;;  %v672_v51 = vpop.f32.mrf.mxu3 }
  0xfb   : > { %696 = vst [vmem:[#allocation2 + $0x38] sm:$0xff] %v692_v48  ;;  %v682_v52 = vmul.f32 %v2825_v22, %v672_v51 }
  0xfc   : > { %v566_v53 = vadd.f32 %v2824_v23, %v558_v50 }
  0xfd   : > { %v690_v54 = vadd.f32 %v2826_v25, %v682_v52 }
  0xfe   : > { %v570_v55 = vmax.f32 %v566_v53, 0.0 }
  0xff   : > { %v694_v56 = vmax.f32 %v690_v54, 0.0 }
 0x100   : > { %574 = vst [vmem:[#allocation2 + $0x28] sm:$0xff] %v570_v55 }
 0x101   : > { %698 = vst [vmem:[#allocation2 + $0x48] sm:$0xff] %v694_v56 }
 0x102 PF: > { %v2559_v57 = vld [vmem:[#allocation8 + $0x38] sm:$0xff]  ;;  %v701_v60 = vlaneseq  ;;  %v2558_v62 = vld [vmem:[#allocation8 + $0x30] sm:$0xff]  ;;  %v2557_v3 = vld [vmem:[#allocation8 + $0x28] sm:$0xff]  ;;  %s2158_s28 = sshll.u32 %s3065_s19, 5  ;;  %s3635_s21 = sld [smem:[#allocation25_spill]] }
 0x103   : > { %v2575_v58 = vld [vmem:[#allocation8 + $0xb8] sm:$0xff]  ;;  %1575 = vmatpush.bf16.msra.mxu0 %v2559_v57  ;;  %v2574_v63 = vld [vmem:[#allocation8 + $0xb0] sm:$0xff]  ;;  %v2573_v4 = vld [vmem:[#allocation8 + $0xa8] sm:$0xff]  ;;  %s3349_s16 = scalar_lea.vmem [#allocation2], %s2158_s28  ;;  %s3636_s6 = sld [smem:[#allocation26_spill]] }
 0x104   : > { %v2567_v59 = vld [vmem:[#allocation8 + $0x78] sm:$0xff]  ;;  %1613 = vmatpush.bf16.msra.mxu2 %v2575_v58  ;;  %v2566_v0 = vld [vmem:[#allocation8 + $0x70] sm:$0xff]  ;;  %v3340_v2 = vshrl.u32 %v701_v60, 7  ;;  %v2565_v5 = vld [vmem:[#allocation8 + $0x68] sm:$0xff]  ;;  %s2632_s26 = sshll.u32 %s3065_s19, 4  ;;  %s3637_s25 = sld [smem:[#allocation28_spill]] }
 0x105   : > { %v2583_v61 = vld [vmem:[#allocation8 + $0xf8] sm:$0xff]  ;;  %1594 = vmatpush.bf16.msra.mxu1 %v2567_v59  ;;  %v2582_v1 = vld [vmem:[#allocation8 + $0xf0] sm:$0xff]  ;;  %v2581_v6 = vld [vmem:[#allocation8 + $0xe8] sm:$0xff]  ;;  %s3638_s24 = sld [smem:[#allocation17_spill]]  ;;  %s1869_s4 = scalar_lea.vmem %s3304_s8, %s2632_s26 [#allocation3] }
 0x106   : > { %1632 = vmatpush.bf16.msra.mxu3 %v2583_v61  ;;  %v703_v7 = vadd.s32 8, %v3340_v2  ;;  %v2556_v8 = vld [vmem:[#allocation8 + $0x20] sm:$0xff]  ;;  %v710_v10 = vand.u32 7, %v3340_v2  ;;  %v2555_v14 = vld [vmem:[#allocation8 + $0x18] sm:$0xff]  ;;  %v2554_v28 = vld [vmem:[#allocation8 + $0x10] sm:$0xff]  ;;  %v704_v40 = vadd.s32 16, %v3340_v2 }
 0x107   : > { %1576 = vmatpush.bf16.msra.mxu0 %v2558_v62  ;;  %v2572_v9 = vld [vmem:[#allocation8 + $0xa0] sm:$0xff]  ;;  %v2571_v15 = vld [vmem:[#allocation8 + $0x98] sm:$0xff]  ;;  %v2570_v29 = vld [vmem:[#allocation8 + $0x90] sm:$0xff]  ;;  %v705_v52 = vadd.s32 24, %v3340_v2  ;;  %s3639_s28 = sld [smem:[#allocation29_spill]]  ;;  %s1909_s27 = sshll.u32 %s3321_s20, 4  ;;  %s1910_s27 = int_to_ptr.vmem [resolvable:$true] %s1909_s27 }
 0x108   : > { %1614 = vmatpush.bf16.msra.mxu2 %v2574_v63  ;;  %v2564_v11 = vld [vmem:[#allocation8 + $0x60] sm:$0xff]  ;;  %v717_v13 = vand.u32 7, %v703_v7  ;;  %v2563_v16 = vld [vmem:[#allocation8 + $0x58] sm:$0xff]  ;;  %vm3345_vm0 = vcmp.gt.s32.totalorder %v710_v10, 0  ;;  %v2165_v21 = vld [vmem:[%s3349_s16 + $0xf] sm:$0xff]  ;;  %vm3357_vm2 = vcmp.lt.s32.totalorder %v710_v10, 7 }
 0x109   : > { %1595 = vmatpush.bf16.msra.mxu1 %v2566_v0  ;;  %v2580_v12 = vld [vmem:[#allocation8 + $0xe0] sm:$0xff]  ;;  %v2579_v17 = vld [vmem:[#allocation8 + $0xd8] sm:$0xff]  ;;  %v2169_v24 = vld [vmem:[%s3349_s16 + $0x9] sm:$0xff]  ;;  %v833_v37 = vsel %vm3345_vm0, %v2165_v21, 0.0  ;;  %v724_v53 = vand.u32 7, %v704_v40  ;;  %v731_v2 = vand.u32 7, %v705_v52 }
 0x10a   : > { %1633 = vmatpush.bf16.msra.mxu3 %v2582_v1  ;;  %v2164_v19 = vld [vmem:[%s3349_s16 + $0x7] sm:$0xff]  ;;  %vm3352_vm1 = vcmp.gt.s32.totalorder %v717_v13, 0  ;;  %vm3361_vm3 = vcmp.lt.s32.totalorder %v717_v13, 7  ;;  %v3367_v25 = vld [vmem:[%s3349_s16 + $0x11] sm:$0xff]  ;;  %v807_v31 = vsel %vm3357_vm2, %v2169_v24, 0.0  ;;  %v837_v48 = vpack.c.bf16 %v833_v37, %v833_v37  ;;  %v3393_v7 = vld [vmem:[%s3349_s16 + $0x19] sm:$0xff] }
 0x10b   : > { %1577 = vmatpush.bf16.msra.mxu0 %v2557_v3  ;;  %v3370_v26 = vld [vmem:[%s3349_s16 + $0x17] sm:$0xff]  ;;  %v787_v27 = vsel %vm3345_vm0, %v2164_v19, 0.0  ;;  %v788_v30 = vsel %vm3352_vm1, %v2165_v21, 0.0  ;;  %v808_v32 = vsel %vm3361_vm3, %v3367_v25, 0.0  ;;  %v2159_v33 = vld [vmem:[%s3349_s16 + $0x8] sm:$0xff]  ;;  %v811_v42 = vpack.c.bf16 %v807_v31, %v807_v31  ;;  %v2552_v58 = vld [vmem:[#allocation8] sm:$0xff] }
 0x10c   : > { %1615 = vmatpush.bf16.msra.mxu2 %v2573_v4  ;;  %v2562_v34 = vld [vmem:[#allocation8 + $0x50] sm:$0xff]  ;;  %v834_v38 = vsel %vm3352_vm1, %v3370_v26, 0.0  ;;  %v791_v39 = vpack.c.bf16 %v787_v27, %v787_v27  ;;  %v792_v41 = vpack.c.bf16 %v788_v30, %v788_v30  ;;  %v812_v43 = vpack.c.bf16 %v808_v32, %v808_v32  ;;  %v2553_v45 = vld [vmem:[#allocation8 + $0x8] sm:$0xff]  ;;  %v2568_v59 = vld [vmem:[#allocation8 + $0x80] sm:$0xff]  ;;  %s2527_s9 = sshll.u32 %s3638_s24, 3 }
 0x10d   : > { %1596 = vmatpush.bf16.msra.mxu1 %v2565_v5  ;;  %v2578_v35 = vld [vmem:[#allocation8 + $0xd0] sm:$0xff]  ;;  %v795_v44 = vpack.c.bf16 %v2159_v33, %v2159_v33  ;;  %v2569_v46 = vld [vmem:[#allocation8 + $0x88] sm:$0xff]  ;;  %v838_v49 = vpack.c.bf16 %v834_v38, %v834_v38  ;;  %v919_v56 = vunpack.c.l.b16 %v811_v42  ;;  %v931_v62 = vunpack.c.l.b16 %v837_v48  ;;  %v2560_v0 = vld [vmem:[#allocation8 + $0x40] sm:$0xff] }
 0x10e   : > { %1634 = vmatpush.bf16.msra.mxu3 %v2581_v6  ;;  %v2160_v36 = vld [vmem:[%s3349_s16 + $0x10] sm:$0xff]  ;;  %v2561_v50 = vld [vmem:[#allocation8 + $0x48] sm:$0xff]  ;;  %v895_v54 = vunpack.c.l.b16 %v791_v39  ;;  %v896_v55 = vunpack.c.l.b16 %v792_v41  ;;  %v920_v57 = vunpack.c.l.b16 %v812_v43  ;;  %v2576_v1 = vld [vmem:[#allocation8 + $0xc0] sm:$0xff]  ;;  %vm3399_vm4 = vcmp.gt.s32.totalorder %v724_v53, 0 }
 0x10f   : > { %1578 = vmatpush.bf16.msra.mxu0 %v2556_v8  ;;  %v796_v47 = vpack.c.bf16 %v2160_v36, %v2160_v36  ;;  %v2577_v51 = vld [vmem:[#allocation8 + $0xc8] sm:$0xff]  ;;  %v907_v60 = vunpack.c.l.b16 %v795_v44  ;;  %v932_v63 = vunpack.c.l.b16 %v838_v49  ;;  %v2607_v3 = vld [vmem:[#allocation8 + $0x1b8] sm:$0xff]  ;;  %vm3403_vm5 = vcmp.gt.s32.totalorder %v731_v2, 0  ;;  %v2606_v19 = vld [vmem:[#allocation8 + $0x1b0] sm:$0xff] }
 0x110   : > { %1616 = vmatpush.bf16.msra.mxu2 %v2572_v9  ;;  %v2591_v4 = vld [vmem:[#allocation8 + $0x138] sm:$0xff]  ;;  %v899_v5 = vpack.c.b16 %v896_v55, %v895_v54  ;;  %v923_v6 = vpack.c.b16 %v920_v57, %v919_v56  ;;  %v3396_v8 = vld [vmem:[%s3349_s16 + $0x21] sm:$0xff]  ;;  %vm3410_vm6 = vcmp.lt.s32.totalorder %v724_v53, 7  ;;  %vm3414_vm7 = vcmp.lt.s32.totalorder %v731_v2, 7  ;;  %v2590_v21 = vld [vmem:[#allocation8 + $0x130] sm:$0xff] }
 0x111   : > { %1597 = vmatpush.bf16.msra.mxu1 %v2564_v11  ;;  %v3390_v61 = vunpack.c.l.b16 %v796_v47  ;;  %v935_v10 = vpack.c.b16 %v932_v63, %v931_v62  ;;  %v2615_v13 = vld [vmem:[#allocation8 + $0x1f8] sm:$0xff]  ;;  %v3419_v24 = vld [vmem:[%s3349_s16 + $0x27] sm:$0xff]  ;;  %v2598_v27 = vld [vmem:[#allocation8 + $0x170] sm:$0xff]  ;;  %v809_v30 = vsel %vm3410_vm6, %v3393_v7, 0.0  ;;  %v810_v31 = vsel %vm3414_vm7, %v3396_v8, 0.0 }
 0x112   : > { %1635 = vmatpush.bf16.msra.mxu3 %v2580_v12  ;;  %v2599_v12 = vld [vmem:[#allocation8 + $0x178] sm:$0xff]  ;;  %v2614_v32 = vld [vmem:[#allocation8 + $0x1f0] sm:$0xff]  ;;  %v836_v36 = vsel %vm3403_vm5, %v3419_v24, 0.0  ;;  %v2605_v37 = vld [vmem:[#allocation8 + $0x1a8] sm:$0xff]  ;;  %v813_v41 = vpack.c.bf16 %v809_v30, %v809_v30  ;;  %v814_v42 = vpack.c.bf16 %v810_v31, %v810_v31  ;;  %v883_v18 = vsel %vm3357_vm2, %v3393_v7, 0.0 }
 0x113   : > { %1579 = vmatpush.bf16.msra.mxu0 %v2555_v14  ;;  %v911_v9 = vpack.c.b16 %v3390_v61, %v907_v60  ;;  %v2161_v33 = vld [vmem:[%s3349_s16 + $0x18] sm:$0xff]  ;;  %v2589_v38 = vld [vmem:[#allocation8 + $0x128] sm:$0xff]  ;;  %v2604_v49 = vld [vmem:[#allocation8 + $0x1a0] sm:$0xff]  ;;  %v884_v20 = vsel %vm3361_vm3, %v3396_v8, 0.0  ;;  %v887_v31 = vpack.c.bf16 %v883_v18, %v883_v18 }
 0x114   : > { %1617 = vmatpush.bf16.msra.mxu2 %v2571_v15  ;;  %v3408_v15 = vld [vmem:[%s3349_s16 + $0x1f] sm:$0xff]  ;;  %v797_v43 = vpack.c.bf16 %v2161_v33, %v2161_v33  ;;  %v2597_v47 = vld [vmem:[#allocation8 + $0x168] sm:$0xff]  ;;  %v921_v53 = vunpack.c.l.b16 %v813_v41  ;;  %v922_v54 = vunpack.c.l.b16 %v814_v42 }
 0x115   : > { %1598 = vmatpush.bf16.msra.mxu1 %v2563_v16  ;;  %v2613_v48 = vld [vmem:[#allocation8 + $0x1e8] sm:$0xff]  ;;  %v2612_v60 = vld [vmem:[#allocation8 + $0x1e0] sm:$0xff]  ;;  %v2603_v62 = vld [vmem:[#allocation8 + $0x198] sm:$0xff]  ;;  %v3468_v41 = vunpack.c.l.b16 %v887_v31 }
 0x116   : > { %1636 = vmatpush.bf16.msra.mxu3 %v2579_v17  ;;  %v3441_v55 = vunpack.c.l.b16 %v797_v43  ;;  %v2587_v63 = vld [vmem:[#allocation8 + $0x118] sm:$0xff]  ;;  %v2593_v33 = vld [vmem:[#allocation8 + $0x148] sm:$0xff]  ;;  %v2600_v22 = vld [vmem:[#allocation8 + $0x180] sm:$0xff] }
 0x117   : > { %1580 = vmatpush.bf16.msra.mxu0 %v2554_v28  ;;  %v789_v28 = vsel %vm3399_vm4, %v3370_v26, 0.0  ;;  %v2620_v14 = vld [vmem:[#allocation8 + $0x220] sm:$0xff] }
 0x118   : > { %1618 = vmatpush.bf16.msra.mxu2 %v2570_v29  ;;  %v790_v29 = vsel %vm3403_vm5, %v3408_v15, 0.0  ;;  %v793_v39 = vpack.c.bf16 %v789_v28, %v789_v28  ;;  %v947_v43 = vpack.c.b16 %v3441_v55, %v3390_v61  ;;  %v873_v61 = vsel %vm3399_vm4, %v3419_v24, 0.0  ;;  %v2616_v18 = vld [vmem:[#allocation8 + $0x200] sm:$0xff] }
 0x119   : > { %1599 = vmatpush.bf16.msra.mxu1 %v2562_v34  ;;  %v2162_v34 = vld [vmem:[%s3349_s16 + $0x20] sm:$0xff]  ;;  %v794_v40 = vpack.c.bf16 %v790_v29, %v790_v29 }
 0x11a   : > { %1637 = vmatpush.bf16.msra.mxu3 %v2578_v35  ;;  %v835_v35 = vsel %vm3399_vm4, %v3408_v15, 0.0  ;;  %v798_v44 = vpack.c.bf16 %v2162_v34, %v2162_v34  ;;  %v2609_v34 = vld [vmem:[#allocation8 + $0x1c8] sm:$0xff] }
 0x11b   : > { %1581 = vmatpush.bf16.msra.mxu0 %v2553_v45  ;;  %v839_v45 = vpack.c.bf16 %v835_v35, %v835_v35  ;;  %v898_v52 = vunpack.c.l.b16 %v794_v40  ;;  %v2608_v40 = vld [vmem:[#allocation8 + $0x1c0] sm:$0xff] }
 0x11c   : > { %1619 = vmatpush.bf16.msra.mxu2 %v2569_v46  ;;  %v840_v46 = vpack.c.bf16 %v836_v36, %v836_v36  ;;  %v3443_v56 = vunpack.c.l.b16 %v798_v44  ;;  %v2623_v36 = vld [vmem:[#allocation8 + $0x238] sm:$0xff] }
 0x11d   : > { %1600 = vmatpush.bf16.msra.mxu1 %v2561_v50  ;;  %v2588_v50 = vld [vmem:[#allocation8 + $0x120] sm:$0xff]  ;;  %v933_v57 = vunpack.c.l.b16 %v839_v45 }
 0x11e   : > { %1638 = vmatpush.bf16.msra.mxu3 %v2577_v51  ;;  %v897_v51 = vunpack.c.l.b16 %v793_v39  ;;  %v3447_v2 = vpack.c.b16 %v3443_v56, %v3441_v55  ;;  %v2592_v39 = vld [vmem:[#allocation8 + $0x140] sm:$0xff]  ;;  %v2192_v55 = vld [vmem:[%s3349_s16 + $0x30] sm:$0xff] }
 0x11f   : > { %1582 = vmatpush.bf16.msra.mxu0 %v2552_v58  ;;  %v934_v58 = vunpack.c.l.b16 %v840_v46  ;;  %v882_v24 = vpack.c.bf16 %v2192_v55, %v2192_v55 }
 0x120   : > { %1620 = vmatpush.bf16.msra.mxu2 %v2568_v59  ;;  %v2596_v59 = vld [vmem:[#allocation8 + $0x160] sm:$0xff] }
 0x121   : > { %1601 = vmatpush.bf16.msra.mxu1 %v2560_v0  ;;  %v900_v0 = vpack.c.b16 %v898_v52, %v897_v51  ;;  %v2621_v52 = vld [vmem:[#allocation8 + $0x228] sm:$0xff] }
 0x122   : > { %1639 = vmatpush.bf16.msra.mxu3 %v2576_v1  ;;  %1583 = vmatmul.bf16.vlgmr.msra.gmra.mxu0 %v899_v5  ;;  %v924_v1 = vpack.c.b16 %v922_v54, %v921_v53  ;;  %v2611_v5 = vld [vmem:[#allocation8 + $0x1d8] sm:$0xff]  ;;  %v847_v53 = vsel %vm3410_vm6, %v3396_v8, 0.0  ;;  %v982_v8 = vunpack.c.l.b16 %v882_v24 }
 0x123   : > { %1651 = vmatpush.bf16.msrb.mxu0 %v2591_v4  ;;  %1621 = vmatmul.bf16.vlgmr.msra.gmra.mxu2 %v923_v6  ;;  %v2595_v4 = vld [vmem:[#allocation8 + $0x158] sm:$0xff]  ;;  %v2602_v6 = vld [vmem:[#allocation8 + $0x190] sm:$0xff] }
 0x124   : > { %1689 = vmatpush.bf16.msrb.mxu2 %v2607_v3  ;;  %1602 = vmatmul.bf16.vlgmr.msra.gmra.mxu1 %v911_v9  ;;  %v936_v3 = vpack.c.b16 %v934_v58, %v933_v57  ;;  %v2586_v9 = vld [vmem:[#allocation8 + $0x110] sm:$0xff]  ;;  %v877_v58 = vpack.c.bf16 %v873_v61, %v873_v61 }
 0x125   : > { %1640 = vmatmul.bf16.vlgmr.msra.gmra.mxu3 %v935_v10  ;;  %1670 = vmatpush.bf16.msrb.mxu1 %v2599_v12  ;;  %v871_v10 = vsel %vm3345_vm0, %v3370_v26, 0.0  ;;  %v872_v12 = vsel %vm3352_vm1, %v3408_v15, 0.0  ;;  %v2601_v26 = vld [vmem:[#allocation8 + $0x188] sm:$0xff] }
 0x126   : > { %1708 = vmatpush.bf16.msrb.mxu3 %v2615_v13  ;;  %v2594_v13 = vld [vmem:[#allocation8 + $0x150] sm:$0xff]  ;;  %v2585_v15 = vld [vmem:[#allocation8 + $0x108] sm:$0xff]  ;;  %v875_v28 = vpack.c.bf16 %v871_v10, %v871_v10  ;;  %v876_v29 = vpack.c.bf16 %v872_v12, %v872_v12 }
 0x127   : > { %1652 = vmatpush.bf16.msrb.mxu0 %v2590_v21  ;;  %v845_v21 = vsel %vm3357_vm2, %v3367_v25, 0.0  ;;  %v2202_v10 = vld [vmem:[%s3349_s16 + $0x31] sm:$0xff] }
 0x128   : > { %1690 = vmatpush.bf16.msrb.mxu2 %v2606_v19  ;;  %v2610_v19 = vld [vmem:[#allocation8 + $0x1d0] sm:$0xff]  ;;  %v849_v30 = vpack.c.bf16 %v845_v21, %v845_v21  ;;  %v967_v23 = vunpack.c.l.b16 %v875_v28  ;;  %v968_v35 = vunpack.c.l.b16 %v876_v29 }
 0x129   : > { %1671 = vmatpush.bf16.msrb.mxu1 %v2598_v27  ;;  %v846_v27 = vsel %vm3361_vm3, %v3393_v7, 0.0  ;;  %v2584_v7 = vld [vmem:[#allocation8 + $0x100] sm:$0xff]  ;;  %v2618_v12 = vld [vmem:[#allocation8 + $0x210] sm:$0xff] }
 0x12a   : > { %1709 = vmatpush.bf16.msrb.mxu3 %v2614_v32  ;;  %v850_v25 = vpack.c.bf16 %v846_v27, %v846_v27  ;;  %v888_v32 = vpack.c.bf16 %v884_v20, %v884_v20  ;;  %v971_v44 = vpack.c.b16 %v968_v35, %v967_v23  ;;  %v2630_v23 = vld [vmem:[#allocation9 + $0x30] sm:$0xff] }
 0x12b   : > { %1653 = vmatpush.bf16.msrb.mxu0 %v2589_v38 }
 0x12c   : > { %1691 = vmatpush.bf16.msrb.mxu2 %v2605_v37  ;;  %v955_v37 = vunpack.c.l.b16 %v849_v30  ;;  %v956_v38 = vunpack.c.l.b16 %v850_v25  ;;  %v3470_v42 = vunpack.c.l.b16 %v888_v32 }
 0x12d   : > { %1672 = vmatpush.bf16.msrb.mxu1 %v2597_v47  ;;  %v2622_v47 = vld [vmem:[#allocation8 + $0x230] sm:$0xff] }
 0x12e   : > { %1710 = vmatpush.bf16.msrb.mxu3 %v2613_v48  ;;  %v995_v45 = vpack.c.b16 %v3470_v42, %v3468_v41  ;;  %v959_v46 = vpack.c.b16 %v956_v38, %v955_v37  ;;  %v2197_v48 = vld [vmem:[%s3349_s16 + $0x2f] sm:$0xff] }
 0x12f   : > { %1654 = vmatpush.bf16.msrb.mxu0 %v2588_v50  ;;  %v2177_v50 = vld [vmem:[%s3349_s16 + $0x28] sm:$0xff]  ;;  %v874_v51 = vsel %vm3403_vm5, %v2197_v48, 0.0 }
 0x130   : > { %1692 = vmatpush.bf16.msrb.mxu2 %v2604_v49  ;;  %v2201_v49 = vld [vmem:[%s3349_s16 + $0x29] sm:$0xff]  ;;  %v844_v57 = vpack.c.bf16 %v2177_v50, %v2177_v50  ;;  %s2526_s16 = sshll.u32 %s3065_s19, 2  ;;  %s3640_s19 = sld [smem:[#allocation30_spill]] }
 0x131   : > { %1673 = vmatpush.bf16.msrb.mxu1 %v2596_v59  ;;  %v848_v54 = vsel %vm3414_vm7, %v2201_v49, 0.0  ;;  %v878_v59 = vpack.c.bf16 %v874_v51, %v874_v51  ;;  %v2629_v37 = vld [vmem:[#allocation9 + $0x28] sm:$0xff]  ;;  %v2624_v51 = vld [vmem:[#allocation9] sm:$0xff]  ;;  %s1906_s8 = sadd.s32 %s2527_s9, %s2526_s16 }
 0x132   : > { %1711 = vmatpush.bf16.msrb.mxu3 %v2612_v60  ;;  %1588 = vmatmul.bf16.gmra.mxu0 %v900_v0  ;;  %v851_v60 = vpack.c.bf16 %v847_v53, %v847_v53  ;;  %v852_v11 = vpack.c.bf16 %v848_v54, %v848_v54  ;;  %v2625_v48 = vld [vmem:[#allocation9 + $0x8] sm:$0xff]  ;;  %s2528_s29 = sshll.u32 %s1906_s8, 2 }
 0x133   : > { %1655 = vmatpush.bf16.msrb.mxu0 %v2587_v63  ;;  %1626 = vmatmul.bf16.gmra.mxu2 %v924_v1  ;;  %v969_v63 = vunpack.c.l.b16 %v877_v58  ;;  %v970_v0 = vunpack.c.l.b16 %v878_v59 }
 0x134   : > { %1693 = vmatpush.bf16.msrb.mxu2 %v2603_v62  ;;  %1607 = vmatmul.bf16.gmra.mxu1 %v3447_v2  ;;  %v946_v62 = vunpack.c.l.b16 %v844_v57  ;;  %v957_v1 = vunpack.c.l.b16 %v851_v60 }
 0x135   : > { %1645 = vmatmul.bf16.gmra.mxu3 %v936_v3  ;;  %1674 = vmatpush.bf16.msrb.mxu1 %v2595_v4  ;;  %v2619_v3 = vld [vmem:[#allocation8 + $0x218] sm:$0xff] }
 0x136   : > { %1712 = vmatpush.bf16.msrb.mxu3 %v2611_v5  ;;  %v948_v4 = vpack.c.b16 %v946_v62, %v3443_v56  ;;  %v972_v5 = vpack.c.b16 %v970_v0, %v969_v63  ;;  %v2617_v56 = vld [vmem:[#allocation8 + $0x208] sm:$0xff]  ;;  %s3641_s10 = smov %s3640_s19 }
 0x137   : > { %1656 = vmatpush.bf16.msrb.mxu0 %v2586_v9  ;;  %v984_v9 = vpack.c.b16 %v982_v8, %v946_v62 }
 0x138   : > { %1694 = vmatpush.bf16.msrb.mxu2 %v2602_v6 }
 0x139   : > { %1675 = vmatpush.bf16.msrb.mxu1 %v2594_v13  ;;  %v885_v13 = vsel %vm3410_vm6, %v2201_v49, 0.0 }
 0x13a   : > { %1713 = vmatpush.bf16.msrb.mxu3 %v2610_v19  ;;  %v886_v19 = vsel %vm3414_vm7, %v2202_v10, 0.0  ;;  %v889_v21 = vpack.c.bf16 %v885_v13, %v885_v13 }
 0x13b   : > { %1657 = vmatpush.bf16.msrb.mxu0 %v2585_v15  ;;  %v890_v27 = vpack.c.bf16 %v886_v19, %v886_v19 }
 0x13c   : > { %1695 = vmatpush.bf16.msrb.mxu2 %v2601_v26  ;;  %v993_v20 = vunpack.c.l.b16 %v889_v21 }
 0x13d   : > { %1676 = vmatpush.bf16.msrb.mxu1 %v2593_v33  ;;  %v994_v26 = vunpack.c.l.b16 %v890_v27 }
 0x13e   : > { %1714 = vmatpush.bf16.msrb.mxu3 %v2609_v34 }
 0x13f   : > { %1658 = vmatpush.bf16.msrb.mxu0 %v2584_v7  ;;  %v996_v15 = vpack.c.b16 %v994_v26, %v993_v20 }
 0x140   : > { %1696 = vmatpush.bf16.msrb.mxu2 %v2600_v22  ;;  %v2631_v22 = vld [vmem:[#allocation9 + $0x38] sm:$0xff] }
 0x141   : > { %1677 = vmatpush.bf16.msrb.mxu1 %v2592_v39 }
 0x142   : > { %1715 = vmatpush.bf16.msrb.mxu3 %v2608_v40  ;;  %1659 = vmatmul.bf16.vlgmr.msrb.gmra.mxu0 %v947_v43  ;;  %v2628_v40 = vld [vmem:[#allocation9 + $0x20] sm:$0xff]  ;;  %v2627_v43 = vld [vmem:[#allocation9 + $0x18] sm:$0xff] }
 0x143   : > { %1727 = vmatpush.bf16.msra.mxu0 %v2623_v36  ;;  %1697 = vmatmul.bf16.vlgmr.msrb.gmra.mxu2 %v971_v44 }
 0x144   : > { %2669 = vmatpush.bf16.msra.mxu2 %v2623_v36  ;;  %1678 = vmatmul.bf16.vlgmr.msrb.gmra.mxu1 %v959_v46  ;;  %v2626_v46 = vld [vmem:[#allocation9 + $0x10] sm:$0xff] }
 0x145   : > { %1716 = vmatmul.bf16.vlgmr.msrb.gmra.mxu3 %v3447_v2  ;;  %v958_v2 = vunpack.c.l.b16 %v852_v11  ;;  %1832 = vmatpush.bf16.msra.mxu1 %v2631_v22 }
 0x146   : > { %2677 = vmatpush.bf16.msra.mxu3 %v2631_v22 }
 0x147   : > { %1728 = vmatpush.bf16.msra.mxu0 %v2622_v47  ;;  %v960_v6 = vpack.c.b16 %v958_v2, %v957_v1 }
 0x148   : > { %2670 = vmatpush.bf16.msra.mxu2 %v2622_v47 }
 0x149   : > { %1833 = vmatpush.bf16.msra.mxu1 %v2630_v23 }
 0x14a   : > { %2678 = vmatpush.bf16.msra.mxu3 %v2630_v23 }
 0x14b   : > { %1729 = vmatpush.bf16.msra.mxu0 %v2621_v52 }
 0x14c   : > { %2671 = vmatpush.bf16.msra.mxu2 %v2621_v52 }
 0x14d   : > { %1834 = vmatpush.bf16.msra.mxu1 %v2629_v37 }
 0x14e   : > { %2679 = vmatpush.bf16.msra.mxu3 %v2629_v37 }
 0x14f   : > { %1730 = vmatpush.bf16.msra.mxu0 %v2620_v14 }
 0x150   : > { %2672 = vmatpush.bf16.msra.mxu2 %v2620_v14 }
 0x151   : > { %1835 = vmatpush.bf16.msra.mxu1 %v2628_v40 }
 0x152   : > { %1664 = vmatmul.bf16.gmra.mxu0 %v948_v4  ;;  %2680 = vmatpush.bf16.msra.mxu3 %v2628_v40 }
 0x153   : > { %1731 = vmatpush.bf16.msra.mxu0 %v2619_v3  ;;  %1702 = vmatmul.bf16.gmra.mxu2 %v972_v5 }
 0x154   : > { %2673 = vmatpush.bf16.msra.mxu2 %v2619_v3  ;;  %1683 = vmatmul.bf16.gmra.mxu1 %v960_v6 }
 0x155   : > { %1721 = vmatmul.bf16.gmra.mxu3 %v984_v9  ;;  %1836 = vmatpush.bf16.msra.mxu1 %v2627_v43 }
 0x156   : > { %2681 = vmatpush.bf16.msra.mxu3 %v2627_v43 }
 0x157   : > { %1732 = vmatpush.bf16.msra.mxu0 %v2618_v12 }
 0x158   : > { %2674 = vmatpush.bf16.msra.mxu2 %v2618_v12 }
 0x159   : > { %1837 = vmatpush.bf16.msra.mxu1 %v2626_v46 }
 0x15a   : > { %2682 = vmatpush.bf16.msra.mxu3 %v2626_v46 }
 0x15b   : > { %1733 = vmatpush.bf16.msra.mxu0 %v2617_v56 }
 0x15c   : > { %2675 = vmatpush.bf16.msra.mxu2 %v2617_v56 }
 0x15d   : > { %1838 = vmatpush.bf16.msra.mxu1 %v2625_v48 }
 0x15e   : > { %2683 = vmatpush.bf16.msra.mxu3 %v2625_v48 }
 0x15f   : > { %1734 = vmatpush.bf16.msra.mxu0 %v2616_v18 }
 0x160   : > { %2676 = vmatpush.bf16.msra.mxu2 %v2616_v18 }
 0x161   : > { %1839 = vmatpush.bf16.msra.mxu1 %v2624_v51 }
 0x162   : > { %1735 = vmatmul.bf16.vlgmr.msra.gmra.mxu0 %v995_v45  ;;  %2684 = vmatpush.bf16.msra.mxu3 %v2624_v51 }
 0x163   : > { %1740 = vmatmul.bf16.vlgmr.msra.gmra.mxu2 %v996_v15  ;;  %v2827_v15 = vld [vmem:[%s3635_s21] ss:$0 sm:$0xff] }
 0x19f   : > { %v1584_v16 = vpop.f32.mrf.mxu0 }
 0x1a1   : > { %v1603_v17 = vpop.f32.mrf.mxu1 }
 0x1a2   : > { %v1604_v50 = vadd.f32 %v1603_v17, %v1584_v16 }
 0x1a6   : > { %v1622_v28 = vpop.f32.mrf.mxu2 }
 0x1a7   : > { %v1586_v30 = vpop.f32.mrf.mxu0  ;;  %v1623_v54 = vadd.f32 %v1622_v28, %v1604_v50  ;;  %v2829_v50 = vld [vmem:[%s3637_s25] ss:$0 sm:$0xff]  ;;  %s1895_s25 = scalar_lea.sflag [#allocation5], %s441_s5 }
 0x1a8   : > { %v1641_v29 = vpop.f32.mrf.mxu3 }
 0x1a9   : > { %v1605_v25 = vpop.f32.mrf.mxu1  ;;  %v1642_v58 = vadd.f32 %v1641_v29, %v1623_v54 }
 0x1aa   : > { %v1606_v55 = vadd.f32 %v1605_v25, %v1586_v30 }
 0x1ae   : > { %v1624_v31 = vpop.f32.mrf.mxu2 }
 0x1af   : > { %v1589_v33 = vpop.f32.mrf.mxu0  ;;  %v1625_v11 = vadd.f32 %v1624_v31, %v1606_v55  ;;  %v2828_v31 = vld [vmem:[%s3636_s6] ss:$0 sm:$0xff]  ;;  %s1908_s6 = scalar_lea.hbm %s3640_s19, %s2528_s29 }
 0x1b0   : > { %v1643_v32 = vpop.f32.mrf.mxu3  ;;  %s1911_s30 = sshll.u32 %s1908_s6, 4  ;;  %s1912_s30 = int_to_ptr.hbm [resolvable:$true] %s1911_s30 }
 0x1b1   : > { %v1608_v34 = vpop.f32.mrf.mxu1  ;;  %v1644_v1 = vadd.f32 %v1643_v32, %v1625_v11  ;;  %s2965_s24 = sshra.s32 %s1912_s30, 4  ;;  %s2966_s24 = int_to_ptr.hbm [resolvable:$true] %s2965_s24 }
 0x1b2   : > { %v1609_v57 = vadd.f32 %v1608_v34, %v1589_v33  ;;  %p2972_p2 = scmp.lt.s32.totalorder %s2966_s24, %s3641_s10 }
 0x1b6   : > { %v1627_v7 = vpop.f32.mrf.mxu2 }
 0x1b7   : > { %v1591_v35 = vpop.f32.mrf.mxu0  ;;  %v1628_v24 = vadd.f32 %v1627_v7, %v1609_v57 }
 0x1b8   : > { %v1646_v36 = vpop.f32.mrf.mxu3 }
 0x1b9   : > { %v1610_v38 = vpop.f32.mrf.mxu1  ;;  %v1647_v2 = vadd.f32 %v1646_v36, %v1628_v24 }
 0x1ba   : > { %v1611_v63 = vadd.f32 %v1610_v38, %v1591_v35 }
 0x1be   : > { %v1629_v39 = vpop.f32.mrf.mxu2 }
 0x1bf   : > { %v1660_v41 = vpop.f32.mrf.mxu0  ;;  %v1630_v3 = vadd.f32 %v1629_v39, %v1611_v63 }
 0x1c0   : > { %v1648_v42 = vpop.f32.mrf.mxu3  ;;  %v1661_v14 = vadd.f32 %v1660_v41, %v1642_v58 }
 0x1c1   : > { %v1679_v44 = vpop.f32.mrf.mxu1  ;;  %v1649_v13 = vadd.f32 %v1648_v42, %v1630_v3 }
 0x1c2   : > { %v1680_v8 = vadd.f32 %v1679_v44, %v1661_v14 }
 0x1c6   : > { %v1698_v45 = vpop.f32.mrf.mxu2 }
 0x1c7   : > { %v1662_v47 = vpop.f32.mrf.mxu0  ;;  %v1699_v4 = vadd.f32 %v1698_v45, %v1680_v8 }
 0x1c8   : > { %v1717_v49 = vpop.f32.mrf.mxu3  ;;  %v1663_v5 = vadd.f32 %v1662_v47, %v1644_v1  ;;  %v2651_v1 = vld [vmem:[%s1869_s4 + $0x8] sm:$0xff]  }
 0x1c9   : > { %v1681_v52 = vpop.f32.mrf.mxu1  ;;  %v1718_v19 = vadd.f32 %v1717_v49, %v1699_v4  ;;  %v2639_v3 = vunpack.c.l.bf16 %v2651_v1 }
 0x1ca   : > { %v1682_v56 = vadd.f32 %v1681_v52, %v1663_v5  ;;  %v2830_v52 = vld [vmem:[%s3639_s28] ss:$0 sm:$0xff]  ;;  %s2971_s28 = scalar_lea.hbm %s3641_s10, 64 }
 0x1ce   : > { %v1700_v61 = vpop.f32.mrf.mxu2 }
 0x1cf   : > { %v1665_v53 = vpop.f32.mrf.mxu0  ;;  %v1701_v27 = vadd.f32 %v1700_v61, %v1682_v56 }
 0x1d0   : > { %v1719_v59 = vpop.f32.mrf.mxu3  ;;  %v1666_v6 = vadd.f32 %v1665_v53, %v1647_v2  ;;  %v2634_v53 = vld [vmem:[%s1869_s4] sm:$0xff]   ;;  %s2967_s4 = scalar_lea.hbm %s2966_s24, 16 }
 0x1d1   : > { %v1684_v0 = vpop.f32.mrf.mxu1  ;;  %v1720_v28 = vadd.f32 %v1719_v59, %v1701_v27  ;;  %v2635_v55 = vunpack.c.l.bf16 %v2634_v53  ;;  %v2636_v59 = vunpack.c.h.bf16 %v2634_v53  ;;  %p2968_p1 = scmp.ne.s32.totalorder %s2966_s24, %s2967_s4  ;;  %p2973_p3 = scmp.lt.s32.totalorder %s2971_s28, %s2967_s4 }
 0x1d2   : > { %v1685_v21 = vadd.f32 %v1684_v0, %v1666_v6  ;;  %v2640_v6 = vunpack.c.h.bf16 %v2651_v1 }
 0x1d3   : > { %p2969_p11 = pnand %p2968_p1, %p3216_p6  ;;  %p2974_p5 = por %p2973_p3, %p2972_p2 }
 0x1d5   : > { %p2970_p0 = pneg %p2969_p11 }
 0x1d6   : > { %v1703_v60 = vpop.f32.mrf.mxu2 }
 0x1d7   : > { %v1667_v62 = vpop.f32.mrf.mxu0  ;;  %v1704_v18 = vadd.f32 %v1703_v60, %v1685_v21  ;;  %p2975_p7 = pnand %p2974_p5, %p2970_p0 }
 0x1d8   : > { %v1722_v10 = vpop.f32.mrf.mxu3  ;;  %v1668_v20 = vadd.f32 %v1667_v62, %v1649_v13 }
 0x1d9   : > { %v1686_v16 = vpop.f32.mrf.mxu1  ;;  %v1723_v29 = vadd.f32 %v1722_v10, %v1704_v18 }
 0x1da   : > { %v1687_v30 = vadd.f32 %v1686_v16, %v1668_v20 }
 0x1de   : > { %v1705_v9 = vpop.f32.mrf.mxu2 }
 0x1df   : > { %v1736_v12 = vpop.f32.mrf.mxu0  ;;  %v1706_v33 = vadd.f32 %v1705_v9, %v1687_v30 }
 0x1e0   : > { %v1737_v26 = vadd.f32 %v1736_v12, %v1718_v19  ;;  %v1724_v7 = vpop.f32.mrf.mxu3 }
 0x1e1   : > { %v1725_v36 = vadd.f32 %v1724_v7, %v1706_v33 }
 0x1e2   : > { %v1750_v25 = vmul.f32 %v2827_v15, %v1737_v26 }
 0x1e4   : > { %v1758_v23 = vadd.f32 %v2828_v31, %v1750_v25 }
 0x1e6   : > { %v1741_v17 = vpop.f32.mrf.mxu2  ;;  %v1762_v40 = vmax.f32 %v1758_v23, 0.0 }
 0x1e7   : > { %v1738_v32 = vpop.f32.mrf.mxu0  ;;  %v1742_v34 = vadd.f32 %v1741_v17, %v1723_v29 }
 0x1e8   : > { %v1739_v22 = vadd.f32 %v1738_v32, %v1720_v28 }
 0x1e9   : > { %v1752_v37 = vmul.f32 %v2827_v15, %v1742_v34 }
 0x1ea   : > { %v1751_v35 = vmul.f32 %v2827_v15, %v1739_v22 }
 0x1eb   : > { %v1760_v43 = vadd.f32 %v2828_v31, %v1752_v37 }
 0x1ec   : > { %v1759_v38 = vadd.f32 %v2828_v31, %v1751_v35 }
 0x1ed   : > { %v1764_v47 = vmax.f32 %v1760_v43, 0.0 }
 0x1ee   : > { %v1743_v39 = vpop.f32.mrf.mxu2  ;;  %v1763_v41 = vmax.f32 %v1759_v38, 0.0 }
 0x1ef   : > { %v1744_v42 = vadd.f32 %v1743_v39, %v1725_v36 }
 0x1f0   : > { %v1766_v44 = vpack.c.bf16 %v1763_v41, %v1762_v40 }
 0x1f1   : > { %v1753_v45 = vmul.f32 %v2827_v15, %v1744_v42 }
 0x1f2   : > { %1840 = vmatmul.bf16.vlgmr.msra.gmra.mxu1 %v1766_v44 }
 0x1f3   : > { %v1761_v46 = vadd.f32 %v2828_v31, %v1753_v45 }
 0x1f5   : > { %v1765_v48 = vmax.f32 %v1761_v46, 0.0 }
 0x1f7   : > { %v1767_v49 = vpack.c.bf16 %v1765_v48, %v1764_v47 }
 0x1f9   : > { %1845 = vmatmul.bf16.vlgmr.msra.gmra.mxu3 %v1767_v49 }
 0x26f   : > { %v1841_v61 = vpop.f32.mrf.mxu1 }
 0x270   : > { %v1855_v51 = vmul.f32 %v2829_v50, %v1841_v61 }
 0x272   : > { %v1863_v54 = vadd.f32 %v2830_v52, %v1855_v51 }
 0x274   : > { %v1878_v60 = vadd.f32 %v2635_v55, %v1863_v54 }
 0x276   : > { %v1882_v62 = vmax.f32 %v1878_v60, 0.0 }
 0x277   : > { %v1843_v57 = vpop.f32.mrf.mxu1 }
 0x278   : > { %v1856_v58 = vmul.f32 %v2829_v50, %v1843_v57 }
 0x27a   : > { %v1864_v11 = vadd.f32 %v2830_v52, %v1856_v58 }
 0x27c   : > { %v1846_v24 = vpop.f32.mrf.mxu3  ;;  %v1879_v14 = vadd.f32 %v2636_v59, %v1864_v11 }
 0x27d   : > { %v1857_v0 = vmul.f32 %v2829_v50, %v1846_v24 }
 0x27e   : > { %v1883_v63 = vmax.f32 %v1879_v14, 0.0 }
 0x27f   : > { %v1865_v8 = vadd.f32 %v2830_v52, %v1857_v0 }
 0x280   : > { %v2644_v2 = vpack.c.bf16 %v1883_v63, %v1882_v62 }
 0x281   : > { %v1880_v9 = vadd.f32 %v2639_v3, %v1865_v8 }
 0x282   : > { %2645 = vst [vmem:[%s3321_s20] sm:$0xff] %v2644_v2  }
 0x283   : > { %v1884_v13 = vmax.f32 %v1880_v9, 0.0 }
 0x284   : > { %v1848_v4 = vpop.f32.mrf.mxu3 }
 0x285   : > { %v1858_v5 = vmul.f32 %v2829_v50, %v1848_v4 }
 0x287   : > { %v1866_v10 = vadd.f32 %v2830_v52, %v1858_v5 }
 0x289   : > { %v1881_v12 = vadd.f32 %v2640_v6, %v1866_v10 }
 0x28b   : > { %v1885_v19 = vmax.f32 %v1881_v12, 0.0 }
 0x28d   : > { %v2649_v56 = vpack.c.bf16 %v1885_v19, %v1884_v13 }
 0x28f   : > { %2652 = vst [vmem:[%s3321_s20 + $0x8] sm:$0xff] %v2649_v56  }
 0x290   : > { %2978 = shalt.err (!%p2975_p7)
}
 0x291   : > { %s3089_s5 = smov 64   ;;  %s3090_s20 = smov 4  }
 0x292   : > { %2699 = dma.vmem_to_hbm [thread:$0]  (%p3216_p6), %s1910_s27, 256, %s1912_s30, %s1895_s25, %s3089_s5, %s3089_s5, %s3090_s20  }
 0x293 PF: > { %s3643_s8 = sld [smem:[#allocation16_spill]]  ;;  %p2726_p8 = scmp.ge.s32.totalorder %s3081_s23, 2 }
 0x295   : > { %p2716_p9 = pnand %p2726_p8, %p3222_p10 }
 0x297   : > { %p2717_p12 = pneg %p2716_p9 }
 0x299   : > { %s1926_s21 = sand.u32 1, %s3643_s8  }
 0x29a   : > { %s1927_s12 = scalar_lea.sflag [#allocation5], %s1926_s21 }
 0x29b   : > { %3036 = dma.done.wait (%p2717_p12), %s1927_s12, 256  }
 0x29c   : > { %3038 = vsyncadd (%p2717_p12), %s1927_s12, 4294967040  ;;  %s28_s23 = sadd.s32 1, %s3081_s23   ;;  %s3645_s19 = sld [smem:[#allocation18_spill]] }
 0x29d   : > { %p25_p13 = scmp.ge.s32.totalorder %s28_s23, 6   ;;  %s3646_s21 = sld [smem:[#allocation21_spill]] }
 0x29e   : > { %s3647_s6 = sld [smem:[#allocation22_spill]]  ;;  %s3648_s13 = smov %s3045_s14 }
 0x29f   : > { %s3649_s14 = smov %s3049_s15  ;;  %s3650_s15 = smov %s3289_s7 }
 0x2a0   : > { %s3651_s16 = smov %s3057_s17  ;;  %s3652_s17 = smov %s3061_s18 }
 0x2a1   : > { %s3653_s18 = smov %s3286_s1  ;;  %s3654_s20 = smov %s3077_s22 }
 0x2a2   :  { %27 = sbr.rel (!%p25_p13) target bundleno = 20 (0x14), region = 132 }
 0x2a4   : > { %s3655_s22 = smov %s3647_s6 }
 0x2a7   :  { %1933 = vsyncpa [#allocation4], 1 }
 0x2a8   :  { %1935 = vsyncpa [#allocation4 + $0x1], 1 }
 0x2a9   :  { %1936 = vsyncpa [#allocation7], 1 }
 0x2aa   :  { %1937 = vsyncpa [#allocation10], 1 }
 0x2ab   :  { %1938 = vsyncpa [#allocation5], 1 }
 0x2ac   :  { %1940 = vsyncpa [#allocation5 + $0x1], 1 }

</bundles_post_ra>
